<compile_context>
chip_gen: v5e
topology: v5e:2x2
jax: 0.10.0
libtpu: 0.0.40
codegen_flags: <defaults>
</compile_context>

<pallas_src>
import functools
import math

import jax
import jax.numpy as jnp
from jax.experimental import pallas as pl
from jax.experimental.pallas import tpu as pltpu


_MASK_VALUE = -1e30                 # large negative instead of -inf (no NaN risk)
_VMEM_LIMIT = 48 * 1024 * 1024      # explicit scoped-VMEM budget (fits v7x's 64 MiB)


# ---------------------------------------------------------------------------
# Fused linear: out = x @ W + b   (W is stored transposed vs nn.Linear.weight)
# ---------------------------------------------------------------------------
def _linear_kernel(x_ref, w_ref, b_ref, o_ref):
    # x_ref: (tm, K)   any float dtype; cast to the weight dtype for the MXU
    # w_ref: (K, N)    bf16, resident across the grid (constant index_map)
    # b_ref: (1, N)    f32
    # o_ref: (tm, N)
    x = x_ref[...].astype(w_ref.dtype)
    acc = jnp.dot(x, w_ref[...], preferred_element_type=jnp.float32)
    o_ref[...] = (acc + b_ref[...]).astype(o_ref.dtype)


def _linear(x2d, w, b, *, tm, out_dtype):
    M, K = x2d.shape
    N = w.shape[1]
    tm = min(tm, M)
    assert M % tm == 0, "token count must be a multiple of the tile size"
    grid = (M // tm,)

    cost = pl.CostEstimate(
        flops=2 * M * K * N,
        transcendentals=0,
        bytes_accessed=(M * K * x2d.dtype.itemsize
                        + K * N * w.dtype.itemsize
                        + M * N * jnp.dtype(out_dtype).itemsize
                        + N * 4),
    )

    return pl.pallas_call(
        _linear_kernel,
        out_shape=jax.ShapeDtypeStruct((M, N), out_dtype),
        grid_spec=pltpu.PrefetchScalarGridSpec(
            num_scalar_prefetch=0,
            grid=grid,
            in_specs=[
                pl.BlockSpec((tm, K), lambda i: (i, 0)),   # x tile
                pl.BlockSpec((K, N), lambda i: (0, 0)),    # W (resident)
                pl.BlockSpec((1, N), lambda i: (0, 0)),    # b (resident)
            ],
            out_specs=pl.BlockSpec((tm, N), lambda i: (i, 0)),
        ),
        compiler_params=pltpu.CompilerParams(
            dimension_semantics=("parallel",),
            vmem_limit_bytes=_VMEM_LIMIT,
        ),
        cost_estimate=cost,
    )(x2d, w, b.reshape(1, N))


# ---------------------------------------------------------------------------
# Causal flash-attention forward (online softmax), q/k/v: (B*H, T, head_dim)
# ---------------------------------------------------------------------------
def _flash_attn_kernel(q_ref, k_ref, v_ref, o_ref, m_sc, l_sc, acc_sc,
                       *, sm_scale, block_q, block_k):
    qi = pl.program_id(1)
    ki = pl.program_id(2)

    @pl.when(ki == 0)
    def _init():
        m_sc[...] = jnp.full(m_sc.shape, -jnp.inf, jnp.float32)
        l_sc[...] = jnp.zeros(l_sc.shape, jnp.float32)
        acc_sc[...] = jnp.zeros(acc_sc.shape, jnp.float32)

    # Skip key/value blocks strictly above the causal diagonal.
    @pl.when(ki * block_k <= qi * block_q + (block_q - 1))
    def _compute():
        q = q_ref[...]                                        # (1, bq, Dh) bf16
        k = k_ref[...]                                        # (1, bk, Dh) bf16
        s = jnp.einsum("bqd,bkd->bqk", q, k,
                       preferred_element_type=jnp.float32) * sm_scale
        rows = qi * block_q + jax.lax.broadcasted_iota(
            jnp.int32, (1, block_q, block_k), 1)
        cols = ki * block_k + jax.lax.broadcasted_iota(
            jnp.int32, (1, block_q, block_k), 2)
        s = jnp.where(rows >= cols, s, _MASK_VALUE)

        m_prev = m_sc[...]
        m_new = jnp.maximum(m_prev, s.max(axis=-1, keepdims=True))
        alpha = jnp.exp(m_prev - m_new)                       # EUP
        p = jnp.exp(s - m_new)
        l_sc[...] = alpha * l_sc[...] + p.sum(axis=-1, keepdims=True)
        acc_sc[...] = alpha * acc_sc[...] + jnp.einsum(
            "bqk,bkd->bqd", p.astype(v_ref.dtype), v_ref[...],
            preferred_element_type=jnp.float32)
        m_sc[...] = m_new

    @pl.when(ki == pl.num_programs(2) - 1)
    def _finalize():
        inv_l = pl.reciprocal(l_sc[...], approx=True)
        o_ref[...] = (acc_sc[...] * inv_l).astype(o_ref.dtype)


def _flash_attention(q, k, v, *, sm_scale, block_q=128, block_k=128):
    BH, T, Dh = q.shape
    block_q = min(block_q, T)
    block_k = min(block_k, T)
    assert T % block_q == 0 and T % block_k == 0

    grid = (BH, T // block_q, T // block_k)
    kernel = functools.partial(_flash_attn_kernel, sm_scale=sm_scale,
                               block_q=block_q, block_k=block_k)

    cost = pl.CostEstimate(
        flops=4 * BH * T * T * Dh,
        transcendentals=BH * T * T,
        bytes_accessed=4 * BH * T * Dh * q.dtype.itemsize,
    )

    return pl.pallas_call(
        kernel,
        out_shape=jax.ShapeDtypeStruct((BH, T, Dh), q.dtype),
        grid_spec=pltpu.PrefetchScalarGridSpec(
            num_scalar_prefetch=0,
            grid=grid,
            in_specs=[
                pl.BlockSpec((1, block_q, Dh), lambda b, qi, ki: (b, qi, 0)),
                pl.BlockSpec((1, block_k, Dh), lambda b, qi, ki: (b, ki, 0)),
                pl.BlockSpec((1, block_k, Dh), lambda b, qi, ki: (b, ki, 0)),
            ],
            out_specs=pl.BlockSpec((1, block_q, Dh), lambda b, qi, ki: (b, qi, 0)),
            scratch_shapes=[
                pltpu.VMEM((1, block_q, 1), jnp.float32),    # running max m
                pltpu.VMEM((1, block_q, 1), jnp.float32),    # running denom l
                pltpu.VMEM((1, block_q, Dh), jnp.float32),   # output accumulator
            ],
        ),
        compiler_params=pltpu.CompilerParams(
            dimension_semantics=("parallel", "parallel", "arbitrary"),
            vmem_limit_bytes=_VMEM_LIMIT,
        ),
        cost_estimate=cost,
    )(q, k, v)


# ---------------------------------------------------------------------------
# Full CausalSelfAttention forward
# ---------------------------------------------------------------------------
def causal_self_attention(x, w_attn, b_attn, w_proj, b_proj, *, n_head,
                          tm=256, block_q=128, block_k=128):
    """x: (B, T, C) f32. Weights stored transposed vs nn.Linear.weight:
       w_attn: (C, 3C), w_proj: (C, C). Returns (B, T, C) in x.dtype."""
    B, T, C = x.shape
    assert C % n_head == 0
    Dh = C // n_head
    sm_scale = 1.0 / math.sqrt(Dh)

    # bf16 weights for the MXU; f32 biases and f32 accumulation in-kernel.
    w_attn_bf16 = w_attn.astype(jnp.bfloat16)
    w_proj_bf16 = w_proj.astype(jnp.bfloat16)

    # --- c_attn: QKV projection (emits bf16 directly for the attention kernel) ---
    x2d = x.reshape(B * T, C)
    qkv = _linear(x2d, w_attn_bf16, b_attn, tm=tm, out_dtype=jnp.bfloat16)

    # --- split heads (wrapper-side layout plumbing, matches torch split/view) ---
    qkv = qkv.reshape(B, T, 3, n_head, Dh)
    q = qkv[:, :, 0].transpose(0, 2, 1, 3).reshape(B * n_head, T, Dh)
    k = qkv[:, :, 1].transpose(0, 2, 1, 3).reshape(B * n_head, T, Dh)
    v = qkv[:, :, 2].transpose(0, 2, 1, 3).reshape(B * n_head, T, Dh)

    # --- causal flash attention ---
    y = _flash_attention(q, k, v, sm_scale=sm_scale,
                         block_q=block_q, block_k=block_k)

    # --- merge heads + c_proj ---
    y2d = y.reshape(B, n_head, T, Dh).transpose(0, 2, 1, 3).reshape(B * T, C)
    out = _linear(y2d, w_proj_bf16, b_proj, tm=tm, out_dtype=x.dtype)
    return out.reshape(B, T, C)


# ---------------------------------------------------------------------------
# Pure-JAX f32 reference matching PyTorch semantics
# ---------------------------------------------------------------------------
def causal_self_attention_reference(x, w_attn, b_attn, w_proj, b_proj, *, n_head):
    B, T, C = x.shape
    Dh = C // n_head
    qkv = jnp.einsum("btc,cd->btd", x, w_attn) + b_attn
    q, k, v = jnp.split(qkv, 3, axis=-1)

    def heads(t):
        return t.reshape(B, T, n_head, Dh).transpose(0, 2, 1, 3)

    q, k, v = heads(q), heads(k), heads(v)
    s = jnp.einsum("bhqd,bhkd->bhqk", q, k) / math.sqrt(Dh)
    mask = jnp.tril(jnp.ones((T, T), dtype=bool))
    s = jnp.where(mask[None, None], s, -jnp.inf)
    p = jax.nn.softmax(s, axis=-1)
    y = jnp.einsum("bhqk,bhkd->bhqd", p, v)
    y = y.transpose(0, 2, 1, 3).reshape(B, T, C)
    return jnp.einsum("btc,cd->btd", y, w_proj) + b_proj


if __name__ == "__main__":
    # Small shapes consistent with GPTConfig: n_embd=384, n_head=6, T <= block_size.
    B, T = 2, 128
    n_head = 6
    n_embd = 384

    key = jax.random.PRNGKey(0)
    kx, kwa, kba, kwp, kbp = jax.random.split(key, 5)

    x = jax.random.normal(kx, (B, T, n_embd), dtype=jnp.float32)
    # Deterministic parameter init; weights stored transposed relative to
    # nn.Linear.weight so the kernel computes x @ W directly (== x @ weight.T).
    w_attn = jax.random.normal(kwa, (n_embd, 3 * n_embd), dtype=jnp.float32) * 0.02
    b_attn = jax.random.normal(kba, (3 * n_embd,), dtype=jnp.float32) * 0.02
    w_proj = jax.random.normal(kwp, (n_embd, n_embd), dtype=jnp.float32) * 0.02
    b_proj = jax.random.normal(kbp, (n_embd,), dtype=jnp.float32) * 0.02

    # tm=128 -> M=256 tokens gives 2 parallel grid steps (keeps both TCs busy
    # on dual-core parts); at larger batch/seq keep the default tm=256.
    out = causal_self_attention(x, w_attn, b_attn, w_proj, b_proj,
                                n_head=n_head, tm=128)
    out = jax.block_until_ready(out)

    ref = causal_self_attention_reference(x, w_attn, b_attn, w_proj, b_proj,
                                          n_head=n_head)
    assert out.shape == (B, T, n_embd)
    max_err = jnp.max(jnp.abs(out.astype(jnp.float32) - ref))
    # bf16 MXU operands with f32 accumulation -> loosened tolerance vs f32 ref.
    assert max_err < 2e-2, f"mismatch vs reference: max abs err {max_err}"

    print("KERNEL_OK")
</pallas_src>

<mosaic_0001>
module attributes {stable_mosaic.version = 11 : i64} {
  func.func @_linear_kernel(%arg0: i32, %arg1: memref<128x384xf32, #tpu.memory_space<vmem>>, %arg2: memref<384x1152xbf16, #tpu.memory_space<vmem>>, %arg3: memref<1x1152xf32, #tpu.memory_space<vmem>>, %arg4: memref<128x1152xbf16, #tpu.memory_space<vmem>>) attributes {dimension_semantics = [#tpu.dimension_semantics<parallel>], iteration_bounds = array<i64: 2>, scalar_prefetch = 0 : i64, scratch_operands = 0 : i64, tpu.core_type = #tpu.core_type<tc>, window_params = [{transform_indices = @transform_0, window_bounds = array<i64: 128, 384>}, {pipeline_mode = #tpu.pipeline_mode<synchronous>, transform_indices = @transform_1, window_bounds = array<i64: 384, 1152>}, {pipeline_mode = #tpu.pipeline_mode<synchronous>, transform_indices = @transform_2, window_bounds = array<i64: 1, 1152>}, {transform_indices = @transform_3, window_bounds = array<i64: 128, 1152>}]} {
    %c0 = arith.constant 0 : index
    %c0_0 = arith.constant 0 : index
    %0 = vector.load %arg1[%c0, %c0_0] : memref<128x384xf32, #tpu.memory_space<vmem>>, vector<128x384xf32>
    %1 = arith.truncf %0 : vector<128x384xf32> to vector<128x384xbf16>
    %c0_1 = arith.constant 0 : index
    %c0_2 = arith.constant 0 : index
    %2 = vector.load %arg2[%c0_1, %c0_2] : memref<384x1152xbf16, #tpu.memory_space<vmem>>, vector<384x1152xbf16>
    %cst = arith.constant dense<0.000000e+00> : vector<128x1152xf32>
    %3 = tpu.matmul %1, %2, %cst {dimension_numbers = #tpu.dot_dimension_numbers<[1], [0], [0], [1], [0, 0, 1, 1], [], []>} : vector<128x384xbf16>, vector<384x1152xbf16>, vector<128x1152xf32> -> vector<128x1152xf32>
    %c0_3 = arith.constant 0 : index
    %c0_4 = arith.constant 0 : index
    %4 = vector.load %arg3[%c0_3, %c0_4] : memref<1x1152xf32, #tpu.memory_space<vmem>>, vector<1x1152xf32>
    %5 = vector.broadcast %4 : vector<1x1152xf32> to vector<128x1152xf32>
    %6 = arith.addf %3, %5 : vector<128x1152xf32>
    %7 = arith.truncf %6 : vector<128x1152xf32> to vector<128x1152xbf16>
    %c0_5 = arith.constant 0 : index
    %c0_6 = arith.constant 0 : index
    %8 = vector.load %arg4[%c0_5, %c0_6] : memref<128x1152xbf16, #tpu.memory_space<vmem>>, vector<128x1152xbf16>
    tpu.vector_store %arg4[%c0_5, %c0_6], %7 {strides = array<i32>} : memref<128x1152xbf16, #tpu.memory_space<vmem>>, vector<128x1152xbf16>,
    return
  }
  func.func @transform_0(%arg0: i32) -> (i32, i32) {
    %c0_i32 = arith.constant 0 : i32
    %c0_i32_0 = arith.constant 0 : i32
    return %arg0, %c0_i32 : i32, i32
  }
  func.func @transform_1(%arg0: i32) -> (i32, i32) {
    %c0_i32 = arith.constant 0 : i32
    %c0_i32_0 = arith.constant 0 : i32
    %c0_i32_1 = arith.constant 0 : i32
    return %c0_i32, %c0_i32_0 : i32, i32
  }
  func.func @transform_2(%arg0: i32) -> (i32, i32) {
    %c0_i32 = arith.constant 0 : i32
    %c0_i32_0 = arith.constant 0 : i32
    %c0_i32_1 = arith.constant 0 : i32
    return %c0_i32, %c0_i32_0 : i32, i32
  }
  func.func @transform_3(%arg0: i32) -> (i32, i32) {
    %c0_i32 = arith.constant 0 : i32
    %c0_i32_0 = arith.constant 0 : i32
    return %arg0, %c0_i32 : i32, i32
  }
}

</mosaic_0001>

<bundles_post_ra>
// kernel: tpu_custom_call.1
= control target key start
LH: loop header
LB: loop body
LE: loop exit
PB: predicated region body
PF: predicated region fallthrough
CT: control target
= control target key end

     0   :  { %8 = vsyncpa [#allocation3], 0  ;;  %s5833_s0 = inlined_call_operand.hbm [shape: f32[256,384], index: 0, kind: input, shape index: {}]   ;;  %s5834_s1 = inlined_call_operand.hbm [shape: bf16[384,1152], index: 1, kind: input, shape index: {}]   ;;  %s5835_s2 = inlined_call_operand.hbm [shape: f32[1,1152], index: 2, kind: input, shape index: {}]   ;;  %s5836_s3 = inlined_call_operand.hbm [shape: bf16[256,1152], index: 3, kind: output, shape index: {}]  }
   0x1   :  { %10 = vsyncpa [#allocation3 + $0x1], 0 }
   0x2   :  { %11 = vsyncpa [#allocation6], 0 }
   0x3   :  { %12 = vsyncpa [#allocation4], 0 }
   0x4   :  { %14 = vsyncpa [#allocation4 + $0x1], 0  ;;  %s4646_s12 = smov 0   ;;  %s4648_s13 = smov 0  }
   0x5   :  { %s4650_s14 = smov 0   ;;  %s4652_s15 = smov 0  }
   0x6 LB: > { %s4667_s16 = sadd.s32 4294967295, %s4616_s15   ;;  %s3255_s17 = sadd.s32 4294967294, %s4616_s15   ;;  %s4616_s15 = sphi %s4652_s15, %s5904_s15   ;;  %s4612_s14 = sphi %s4650_s14, %s5903_s14   ;;  %s4608_s13 = sphi %s4648_s13, %s5902_s13   ;;  %s4604_s12 = sphi %s4646_s12, %s5901_s12  }
   0x7   : > { %p40_p0 = scmp.ne.s32.totalorder %s4608_s13, %s4604_s12  ;;  %p41_p1 = scmp.eq.s32.totalorder %s4667_s16, 0 }
   0x8   : > { %p106_p2 = scmp.eq.s32.totalorder %s4667_s16, 1  ;;  %p112_p3 = scmp.eq.s32.totalorder %s3255_s17, 1 }
   0x9   : > { %p4676_p4 = por %p41_p1, %p40_p0  ;;  %p3256_p5 = scmp.ge.s32.totalorder %s4616_s15, 1 }
   0xa   : > { %p4681_p6 = por %p112_p3, %p40_p0  ;;  %p119_p7 = scmp.lt.s32.totalorder %s4616_s15, 3 }
   0xb   : > { %s130_s22 = sshll.u32 %s5834_s1, 4  ;;  %s4618_s24 = smov [#allocation5]   ;;  %s131_s22 = int_to_ptr.hbm [resolvable:$true] %s130_s22 }
   0xc   : > { %p4689_p8 = pnand %p3256_p5, %p119_p7  ;;  %s132_s25 = sshll.u32 %s4618_s24, 4  ;;  %s133_s25 = int_to_ptr.vmem [resolvable:$true] %s132_s25 }
   0xd   : > { %s145_s28 = sshll.u32 %s5835_s2, 4  ;;  %s4619_s29 = smov 576   ;;  %s146_s28 = int_to_ptr.hbm [resolvable:$true] %s145_s28 }
   0xe   : > { %p4392_p9 = pneg %p4689_p8  ;;  %s4620_s30 = smov 36  }
   0xf   : > { %s4621_s4 = smov [#allocation7]   ;;  %s4702_s6 = sadd.s32 1, %s4616_s15  }
  0x10   : > { %p4393_p10 = pnand %p4392_p9, %p41_p1  ;;  %s147_s5 = sshll.u32 %s4621_s4, 4  ;;  %s148_s5 = int_to_ptr.vmem [resolvable:$true] %s147_s5 }
  0x11   : > { %s27_s7 = sadd.s32 1, %s4612_s14  ;;  %s24_s8 = ssub.s32 %s4616_s15, %s4702_s6 }
  0x12   : > { %4395 = dma.hbm_to_vmem [thread:$0]  (!%p4393_p10), %s131_s22, 27648, %s133_s25, [#allocation6], %s4619_s29, %s4619_s29, %s4620_s30  }
  0x13   : > { %4398 = dma.hbm_to_vmem [thread:$0]  (!%p4393_p10), %s146_s28, 144, %s148_s5, [#allocation6]  }
  0x14   : > { %p34_p12 = scmp.ne.s32.totalorder %s4612_s14, %s4608_s13  ;;  %p25_p13 = scmp.eq.s32.totalorder %s24_s8, 0 }
  0x15   : > { %p35_p0 = scmp.eq.s32.totalorder %s4616_s15, 0  ;;  %p4409_p5 = scmp.lt.s32.totalorder %s4616_s15, 2 }
  0x16   : > { %p4712_p3 = por %p106_p2, %p34_p12  ;;  %s158_s11 = sand.u32 1, %s4612_s14  }
  0x17   : > { %s4718_s10 = scalar_select %p25_p13, %s4612_s14, %s27_s7  }
  0x18   : > { %p36_p7 = por %p35_p0, %p34_p12  ;;  %s4375_s17 = smul.u32 384, %s158_s11 }
  0x19   : > { %s4376_s20 = smul.u32 384, %s4616_s15  ;;  %s159_s29 = scalar_lea.sflag [#allocation3], %s158_s11 }
  0x1a   : > { %p4722_p9 = pnand %p4409_p5, %p36_p7  ;;  %s162_s26 = scalar_lea.vmem [#allocation2], %s4375_s17 }
  0x1b   : > { %s168_s25 = scalar_lea.hbm %s5833_s0, %s4376_s20  ;;  %s171_s27 = sshll.u32 %s162_s26, 4  ;;  %s172_s27 = int_to_ptr.vmem [resolvable:$true] %s171_s27 }
  0x1c   : > { %s169_s28 = sshll.u32 %s168_s25, 4  ;;  %p4520_p10 = pneg %p4722_p9  ;;  %s170_s28 = int_to_ptr.hbm [resolvable:$true] %s169_s28 }
  0x1d   : > { %s4516_s30 = sshra.s32 %s170_s28, 4  ;;  %s4523_s8 = scalar_lea.hbm %s5833_s0, 768  ;;  %s4517_s30 = int_to_ptr.hbm [resolvable:$true] %s4516_s30 }
  0x1e   : > { %s4518_s4 = scalar_lea.hbm %s4517_s30, 384  ;;  %p4524_p0 = scmp.lt.s32.totalorder %s4517_s30, %s5833_s0 }
  0x1f   : > { %p4519_p2 = scmp.ne.s32.totalorder %s4517_s30, %s4518_s4  ;;  %p4525_p5 = scmp.lt.s32.totalorder %s4523_s8, %s4518_s4 }
  0x21   : > { %p4521_p12 = pnand %p4520_p10, %p4519_p2  ;;  %p4526_p7 = por %p4525_p5, %p4524_p0 }
  0x23   : > { %p4522_p13 = pneg %p4521_p12 }
  0x25   : > { %p4527_p11 = pnand %p4526_p7, %p4522_p13 }
  0x27   : > { %4530 = shalt.err (!%p4527_p11)
}
  0x28   : > { %s4622_s11 = smov 384   ;;  %s4623_s17 = smov 24  }
  0x29   : > { %4402 = dma.hbm_to_vmem [thread:$0]  (!%p4722_p9), %s170_s28, 6144, %s172_s27, %s159_s29, %s4622_s11, %s4622_s11, %s4623_s17  }
  0x2a   : > { %183 = sbr.rel (%p4689_p8) target bundleno = 1086 (0x43e), region = 32 }
  0x2f   : > { %s4742_s24 = sand.u32 1, %s4608_s13  }
  0x30   : > { %s4377_s25 = smul.u32 384, %s4742_s24  ;;  %s186_s26 = scalar_lea.sflag [#allocation3], %s4742_s24 }
  0x32   : > { %s4746_s30 = scalar_lea.vmem [#allocation2], %s4377_s25 }
  0x33   : > { %4591 = dma.done.wait (%p4676_p4), %s186_s26, 6144  }
  0x34   : > { %4593 = vsyncadd (%p4676_p4), %s186_s26, 4294961152 }
  0x35   : > { %4595 = dma.done.wait (%p41_p1), [#allocation6], 27792  }
  0x36   : > { %4597 = vsyncadd (%p41_p1), [#allocation6], 4294939504  ;;  %v3520_v0 = vld [vmem:[#allocation5 + $0x1f8] sm:$0xf]  ;;  %v4202_v1 = vld [vmem:[#allocation5 + $0x218] sm:$0xf0] }
  0x37   : > { %v3808_v2 = vld [vmem:[#allocation5 + $0x438] sm:$0xf]  ;;  %v3521_v3 = vor.u32 %v4202_v1, %v3520_v0  ;;  %v4274_v4 = vld [vmem:[#allocation5 + $0x458] sm:$0xf0]  ;;  %v3484_v9 = vld [vmem:[#allocation5 + $0x1b0] sm:$0xf] }
  0x38   : > { %v4096_v5 = vld [vmem:[#allocation5 + $0x678] sm:$0xf]  ;;  %v4346_v6 = vld [vmem:[#allocation5 + $0x698] sm:$0xf0]  ;;  %v4756_v7 = vor.u32 %v4274_v4, %v3808_v2  ;;  %v4193_v10 = vld [vmem:[#allocation5 + $0x1d0] sm:$0xf0] }
  0x39   : > { %v4758_v8 = vor.u32 %v4346_v6, %v4096_v5  ;;  %v3772_v11 = vld [vmem:[#allocation5 + $0x3f0] sm:$0xf]  ;;  %1663 = vmatpush.bf16.msra.mxu0 %v3521_v3  ;;  %4351 = vmatpush.bf16.msra.mxu3 %v3521_v3  ;;  %v3485_v12 = vor.u32 %v4193_v10, %v3484_v9  ;;  %v4265_v13 = vld [vmem:[#allocation5 + $0x410] sm:$0xf0]  ;;  %v3448_v18 = vld [vmem:[#allocation5 + $0x168] sm:$0xf] }
  0x3a   : > { %v4060_v14 = vld [vmem:[#allocation5 + $0x630] sm:$0xf]  ;;  %v4337_v15 = vld [vmem:[#allocation5 + $0x650] sm:$0xf0]  ;;  %4359 = vmatpush.bf16.msra.mxu1 %v4756_v7  ;;  %v4762_v16 = vor.u32 %v4265_v13, %v3772_v11  ;;  %v4184_v19 = vld [vmem:[#allocation5 + $0x188] sm:$0xf0] }
  0x3b   : > { %4367 = vmatpush.bf16.msra.mxu2 %v4758_v8  ;;  %v4764_v17 = vor.u32 %v4337_v15, %v4060_v14  ;;  %v3736_v20 = vld [vmem:[#allocation5 + $0x3a8] sm:$0xf]  ;;  %v4256_v21 = vld [vmem:[#allocation5 + $0x3c8] sm:$0xf0]  ;;  %v3449_v24 = vor.u32 %v4184_v19, %v3448_v18  ;;  %v3412_v27 = vld [vmem:[#allocation5 + $0x120] sm:$0xf] }
  0x3c   : > { %v4024_v22 = vld [vmem:[#allocation5 + $0x5e8] sm:$0xf]  ;;  %v4328_v23 = vld [vmem:[#allocation5 + $0x608] sm:$0xf0]  ;;  %v4768_v25 = vor.u32 %v4256_v21, %v3736_v20  ;;  %v4175_v28 = vld [vmem:[#allocation5 + $0x140] sm:$0xf0] }
  0x3d   : > { %1664 = vmatpush.bf16.msra.mxu0 %v3485_v12  ;;  %4352 = vmatpush.bf16.msra.mxu3 %v3485_v12  ;;  %v4770_v26 = vor.u32 %v4328_v23, %v4024_v22  ;;  %v3700_v29 = vld [vmem:[#allocation5 + $0x360] sm:$0xf]  ;;  %v4247_v30 = vld [vmem:[#allocation5 + $0x380] sm:$0xf0]  ;;  %v3413_v33 = vor.u32 %v4175_v28, %v3412_v27  ;;  %v3376_v36 = vld [vmem:[#allocation5 + $0xd8] sm:$0xf] }
  0x3e   : > { %4360 = vmatpush.bf16.msra.mxu1 %v4762_v16  ;;  %v3988_v31 = vld [vmem:[#allocation5 + $0x5a0] sm:$0xf]  ;;  %v4319_v32 = vld [vmem:[#allocation5 + $0x5c0] sm:$0xf0]  ;;  %v4774_v34 = vor.u32 %v4247_v30, %v3700_v29  ;;  %v4166_v37 = vld [vmem:[#allocation5 + $0xf8] sm:$0xf0] }
  0x3f   : > { %4368 = vmatpush.bf16.msra.mxu2 %v4764_v17  ;;  %v4776_v35 = vor.u32 %v4319_v32, %v3988_v31  ;;  %v3664_v38 = vld [vmem:[#allocation5 + $0x318] sm:$0xf]  ;;  %v4238_v39 = vld [vmem:[#allocation5 + $0x338] sm:$0xf0]  ;;  %v3377_v42 = vor.u32 %v4166_v37, %v3376_v36  ;;  %v3340_v45 = vld [vmem:[#allocation5 + $0x90] sm:$0xf] }
  0x40   : > { %v3952_v40 = vld [vmem:[#allocation5 + $0x558] sm:$0xf]  ;;  %v4310_v41 = vld [vmem:[#allocation5 + $0x578] sm:$0xf0]  ;;  %v4780_v43 = vor.u32 %v4238_v39, %v3664_v38  ;;  %v4157_v46 = vld [vmem:[#allocation5 + $0xb0] sm:$0xf0] }
  0x41   : > { %1665 = vmatpush.bf16.msra.mxu0 %v3449_v24  ;;  %4353 = vmatpush.bf16.msra.mxu3 %v3449_v24  ;;  %v4782_v44 = vor.u32 %v4310_v41, %v3952_v40  ;;  %v3628_v47 = vld [vmem:[#allocation5 + $0x2d0] sm:$0xf]  ;;  %v4229_v48 = vld [vmem:[#allocation5 + $0x2f0] sm:$0xf0]  ;;  %v3341_v51 = vor.u32 %v4157_v46, %v3340_v45  ;;  %v3304_v54 = vld [vmem:[#allocation5 + $0x48] sm:$0xf] }
  0x42   : > { %4361 = vmatpush.bf16.msra.mxu1 %v4768_v25  ;;  %v3916_v49 = vld [vmem:[#allocation5 + $0x510] sm:$0xf]  ;;  %v4301_v50 = vld [vmem:[#allocation5 + $0x530] sm:$0xf0]  ;;  %v4786_v52 = vor.u32 %v4229_v48, %v3628_v47  ;;  %v4148_v55 = vld [vmem:[#allocation5 + $0x68] sm:$0xf0] }
  0x43   : > { %4369 = vmatpush.bf16.msra.mxu2 %v4770_v26  ;;  %v4788_v53 = vor.u32 %v4301_v50, %v3916_v49  ;;  %v3592_v56 = vld [vmem:[#allocation5 + $0x288] sm:$0xf]  ;;  %v4220_v57 = vld [vmem:[#allocation5 + $0x2a8] sm:$0xf0]  ;;  %v3305_v60 = vor.u32 %v4148_v55, %v3304_v54  ;;  %v3268_v61 = vld [vmem:[#allocation5] sm:$0xf] }
  0x44   : > { %v3880_v58 = vld [vmem:[#allocation5 + $0x4c8] sm:$0xf]  ;;  %v4292_v59 = vld [vmem:[#allocation5 + $0x4e8] sm:$0xf0]  ;;  %v4139_v62 = vld [vmem:[#allocation5 + $0x20] sm:$0xf0]  ;;  %v4792_v0 = vor.u32 %v4220_v57, %v3592_v56 }
  0x45   : > { %1666 = vmatpush.bf16.msra.mxu0 %v3413_v33  ;;  %4354 = vmatpush.bf16.msra.mxu3 %v3413_v33  ;;  %v3556_v63 = vld [vmem:[#allocation5 + $0x240] sm:$0xf]  ;;  %v4794_v1 = vor.u32 %v4292_v59, %v3880_v58  ;;  %v4211_v2 = vld [vmem:[#allocation5 + $0x260] sm:$0xf0]  ;;  %v228_v6 = vld [vmem:[%s4746_s30 + $0x18] sm:$0xff]  ;;  %v3269_v13 = vor.u32 %v4139_v62, %v3268_v61  ;;  %s4378_s18 = smul.u32 576, %s4742_s24 }
  0x46   : > { %4362 = vmatpush.bf16.msra.mxu1 %v4774_v34  ;;  %v3844_v3 = vld [vmem:[#allocation5 + $0x480] sm:$0xf]  ;;  %v4283_v4 = vld [vmem:[#allocation5 + $0x4a0] sm:$0xf0]  ;;  %v4198_v9 = vld [vmem:[#allocation5 + $0x1fc] sm:$0xf]  ;;  %v4803_v19 = vor.u32 %v4211_v2, %v3556_v63 }
  0x47   : > { %4370 = vmatpush.bf16.msra.mxu2 %v4776_v35  ;;  %v225_v5 = vld [vmem:[%s4746_s30] sm:$0xff]  ;;  %v240_v15 = vld [vmem:[%s4746_s30 + $0x78] sm:$0xff]  ;;  %v238_v18 = vld [vmem:[%s4746_s30 + $0x68] sm:$0xff]  ;;  %v4805_v20 = vor.u32 %v4283_v4, %v3844_v3  ;;  %s5058_s23 = scalar_lea.vmem [#allocation8], %s4378_s18  ;;  %s4379_s21 = smul.u32 576, %s4667_s16 }
  0x48   : > { %v3522_v10 = vld [vmem:[#allocation5 + $0x21c] sm:$0xf0]  ;;  %v4203_v12 = vld [vmem:[#allocation5 + $0x220] sm:$0xf0]  ;;  %v239_v22 = vld [vmem:[%s4746_s30 + $0x70] sm:$0xff]  ;;  %v4810_v31 = vpack.c.bf16 %v228_v6, %v225_v5  ;;  %s3160_s16 = sshll.u32 %s5058_s23, 4  ;;  %s3161_s16 = int_to_ptr.vmem [resolvable:$true] %s3160_s16 }
  0x49   : > { %1667 = vmatpush.bf16.msra.mxu0 %v3377_v42  ;;  %4355 = vmatpush.bf16.msra.mxu3 %v3377_v42  ;;  %v3528_v11 = vld [vmem:[#allocation5 + $0x200] sm:$0xf]  ;;  %v242_v23 = vld [vmem:[%s4746_s30 + $0x88] sm:$0xff]  ;;  %v3525_v24 = vor.u32 %v4198_v9, %v3522_v10  ;;  %v4342_v28 = vld [vmem:[#allocation5 + $0x67c] sm:$0xf]  ;;  %s3159_s29 = scalar_lea.hbm %s5836_s3, %s4379_s21  ;;  %s3147_s5 = scalar_lea.sflag [#allocation4], %s4742_s24 }
  0x4a   : > { %4363 = vmatpush.bf16.msra.mxu1 %v4780_v43  ;;  %v237_v14 = vld [vmem:[%s4746_s30 + $0x60] sm:$0xff]  ;;  %v3529_v27 = vor.u32 %v4203_v12, %v3528_v11  ;;  %v4189_v30 = vld [vmem:[#allocation5 + $0x1b4] sm:$0xf]  ;;  %v3486_v33 = vld [vmem:[#allocation5 + $0x1d4] sm:$0xf0]  ;;  %v4816_v39 = vpack.c.bf16 %v242_v23, %v239_v22  ;;  %s3162_s4 = sshll.u32 %s3159_s29, 4  ;;  %s3163_s4 = int_to_ptr.hbm [resolvable:$true] %s3162_s4 }
  0x4b   : > { %4371 = vmatpush.bf16.msra.mxu2 %v4782_v44  ;;  %v241_v21 = vld [vmem:[%s4746_s30 + $0x80] sm:$0xff]  ;;  %v4812_v32 = vpack.c.bf16 %v240_v15, %v237_v14  ;;  %v3492_v36 = vld [vmem:[#allocation5 + $0x1b8] sm:$0xf]  ;;  %v4194_v37 = vld [vmem:[#allocation5 + $0x1d8] sm:$0xf0]  ;;  %v3489_v41 = vor.u32 %v4189_v30, %v3486_v33  ;;  %s4560_s7 = sshra.s32 %s3163_s4, 4  ;;  %s4561_s7 = int_to_ptr.hbm [resolvable:$true] %s4560_s7 }
  0x4c   : > { %v4098_v29 = vld [vmem:[#allocation5 + $0x69c] sm:$0xf0]  ;;  %v4814_v38 = vpack.c.bf16 %v241_v21, %v238_v18  ;;  %5871 = vst [vmem:[#allocation13_spill] sm:$0xff] %v4816_v39  ;;  %v3493_v42 = vor.u32 %v4194_v37, %v3492_v36  ;;  %v4333_v45 = vld [vmem:[#allocation5 + $0x634] sm:$0xf]  ;;  %v234_v5 = vld [vmem:[%s4746_s30 + $0x48] sm:$0xff]  ;;  %p4567_p11 = scmp.lt.s32.totalorder %s4561_s7, %s5836_s3 }
  0x4d   : > { %1668 = vmatpush.bf16.msra.mxu0 %v3341_v51  ;;  %4356 = vmatpush.bf16.msra.mxu3 %v3341_v51  ;;  %v4101_v40 = vor.u32 %v4342_v28, %v4098_v29  ;;  %v4062_v46 = vld [vmem:[#allocation5 + $0x654] sm:$0xf0]  ;;  %v4180_v47 = vld [vmem:[#allocation5 + $0x16c] sm:$0xf]  ;;  %v3450_v48 = vld [vmem:[#allocation5 + $0x18c] sm:$0xf0] }
  0x4e   : > { %4364 = vmatpush.bf16.msra.mxu1 %v4786_v52  ;;  %5870 = vst [vmem:[#allocation12_spill] sm:$0xff] %v4814_v38  ;;  %v3456_v49 = vld [vmem:[#allocation5 + $0x170] sm:$0xf]  ;;  %v4185_v50 = vld [vmem:[#allocation5 + $0x190] sm:$0xf0]  ;;  %v4065_v51 = vor.u32 %v4333_v45, %v4062_v46  ;;  %v3453_v54 = vor.u32 %v4180_v47, %v3450_v48  ;;  %v246_v9 = vld [vmem:[%s4746_s30 + $0xa8] sm:$0xff] }
  0x4f   : > { %4372 = vmatpush.bf16.msra.mxu2 %v4788_v53  ;;  %v3457_v55 = vor.u32 %v4185_v50, %v3456_v49  ;;  %v4324_v56 = vld [vmem:[#allocation5 + $0x5ec] sm:$0xf]  ;;  %v4026_v57 = vld [vmem:[#allocation5 + $0x60c] sm:$0xf0]  ;;  %v4171_v58 = vld [vmem:[#allocation5 + $0x124] sm:$0xf] }
  0x50   : > { %v3414_v59 = vld [vmem:[#allocation5 + $0x144] sm:$0xf0]  ;;  %v4176_v61 = vld [vmem:[#allocation5 + $0x148] sm:$0xf0]  ;;  %v4315_v2 = vld [vmem:[#allocation5 + $0x5a4] sm:$0xf] }
  0x51   : > { %1669 = vmatpush.bf16.msra.mxu0 %v3305_v60  ;;  %4357 = vmatpush.bf16.msra.mxu3 %v3305_v60  ;;  %v3420_v60 = vld [vmem:[#allocation5 + $0x128] sm:$0xf]  ;;  %v3417_v62 = vor.u32 %v4171_v58, %v3414_v59  ;;  %v231_v4 = vld [vmem:[%s4746_s30 + $0x30] sm:$0xff]  ;;  %v244_v10 = vld [vmem:[%s4746_s30 + $0x98] sm:$0xff]  ;;  %s4562_s8 = scalar_lea.hbm %s4561_s7, 576  ;;  %s4566_s11 = scalar_lea.hbm %s5836_s3, 1152 }
  0x52   : > { %4365 = vmatpush.bf16.msra.mxu1 %v4792_v0  ;;  %v3421_v63 = vor.u32 %v4176_v61, %v3420_v60  ;;  %v3990_v3 = vld [vmem:[#allocation5 + $0x5c4] sm:$0xf0]  ;;  %v243_v6 = vld [vmem:[%s4746_s30 + $0x90] sm:$0xff]  ;;  %v245_v12 = vld [vmem:[%s4746_s30 + $0xa0] sm:$0xff]  ;;  %v4835_v14 = vpack.c.bf16 %v234_v5, %v231_v4  ;;  %p4563_p1 = scmp.ne.s32.totalorder %s4561_s7, %s4562_s8  ;;  %p4568_p9 = scmp.lt.s32.totalorder %s4566_s11, %s4562_s8 }
  0x53   : > { %4373 = vmatpush.bf16.msra.mxu2 %v4794_v1  ;;  %v247_v11 = vld [vmem:[%s4746_s30 + $0xb0] sm:$0xff]  ;;  %v4837_v15 = vpack.c.bf16 %v246_v9, %v243_v6  ;;  %v3378_v22 = vld [vmem:[#allocation5 + $0xfc] sm:$0xf0]  ;;  %v3342_v33 = vld [vmem:[#allocation5 + $0xb4] sm:$0xf0] }
  0x54   : > { %v4839_v18 = vpack.c.bf16 %v247_v11, %v244_v10  ;;  %v3384_v23 = vld [vmem:[#allocation5 + $0xe0] sm:$0xf]  ;;  %v3348_v36 = vld [vmem:[#allocation5 + $0x98] sm:$0xf]  ;;  %v226_v45 = vld [vmem:[%s4746_s30 + $0x8] sm:$0xff]  ;;  %p4564_p4 = pnand %p4563_p1, %p4712_p3  ;;  %p4569_p2 = por %p4568_p9, %p4567_p11 }
  0x55   : > { %1670 = vmatpush.bf16.msra.mxu0 %v3269_v13  ;;  %4358 = vmatpush.bf16.msra.mxu3 %v3269_v13  ;;  %v3993_v13 = vor.u32 %v4315_v2, %v3990_v3  ;;  %v3954_v28 = vld [vmem:[#allocation5 + $0x57c] sm:$0xf0]  ;;  %v250_v48 = vld [vmem:[%s4746_s30 + $0xc8] sm:$0xff]  ;;  %v3306_v59 = vld [vmem:[#allocation5 + $0x6c] sm:$0xf0] }
  0x56   : > { %4366 = vmatpush.bf16.msra.mxu1 %v4803_v19  ;;  %5872 = vst [vmem:[#allocation14_spill] sm:$0xff] %v4839_v18  ;;  %v229_v47 = vld [vmem:[%s4746_s30 + $0x20] sm:$0xff]  ;;  %v254_v50 = vld [vmem:[%s4746_s30 + $0xe8] sm:$0xff]  ;;  %v3312_v60 = vld [vmem:[#allocation5 + $0x50] sm:$0xf]  ;;  %p4565_p8 = pneg %p4564_p4 }
  0x57   : > { %4374 = vmatpush.bf16.msra.mxu2 %v4805_v20  ;;  %v253_v49 = vld [vmem:[%s4746_s30 + $0xe0] sm:$0xff]  ;;  %v4149_v61 = vld [vmem:[#allocation5 + $0x70] sm:$0xf0]  ;;  %v258_v3 = vld [vmem:[%s4746_s30 + $0x108] sm:$0xff] }
  0x58   : > { %1671 = vmatmul.bf16.vlgmr.msra.gmra.mxu0 %v4810_v31  ;;  %1681 = vmatmul.bf16.vlgmr.msra.gmra.mxu3 %v4812_v32  ;;  %v232_v4 = vld [vmem:[%s4746_s30 + $0x38] sm:$0xff]  ;;  %v235_v5 = vld [vmem:[%s4746_s30 + $0x50] sm:$0xff]  ;;  %v257_v10 = vld [vmem:[%s4746_s30 + $0x100] sm:$0xff]  ;;  %p4570_p10 = pnand %p4569_p2, %p4565_p8 }
  0x59   : > { %1810 = vmatpush.bf16.msrb.mxu3 %v3525_v24  ;;  %1730 = vmatmul.bf16.vlgmr.msra.gmra.mxu1 %v4814_v38  ;;  %v256_v6 = vld [vmem:[%s4746_s30 + $0xf8] sm:$0xff]  ;;  %v259_v9 = vld [vmem:[%s4746_s30 + $0x110] sm:$0xff] }
  0x5a   : > { %1779 = vmatmul.bf16.vlgmr.msra.gmra.mxu2 %v4816_v39  ;;  %1712 = vmatpush.bf16.msrb.mxu0 %v4756_v7  ;;  %v4029_v7 = vor.u32 %v4324_v56, %v4026_v57  ;;  %v3918_v57 = vld [vmem:[#allocation5 + $0x534] sm:$0xf0] }
  0x5b   : > { %1957 = vmatpush.bf16.msrb.mxu2 %v3529_v27  ;;  %1908 = vmatpush.bf16.msrb.mxu1 %v4101_v40  ;;  %v4167_v27 = vld [vmem:[#allocation5 + $0x100] sm:$0xf0]  ;;  %v4158_v40 = vld [vmem:[#allocation5 + $0xb8] sm:$0xf0] }
  0x5c   : > { %v3385_v29 = vor.u32 %v4167_v27, %v3384_v23  ;;  %v3349_v46 = vor.u32 %v4158_v40, %v3348_v36  ;;  %v260_v11 = vld [vmem:[%s4746_s30 + $0x118] sm:$0xff]  ;;  %v262_v36 = vld [vmem:[%s4746_s30 + $0x128] sm:$0xff] }
  0x5d   : > { %1811 = vmatpush.bf16.msrb.mxu3 %v3489_v41  ;;  %v249_v41 = vld [vmem:[%s4746_s30 + $0xc0] sm:$0xff]  ;;  %v3774_v40 = vld [vmem:[#allocation5 + $0x414] sm:$0xf0] }
  0x5e   : > { %1713 = vmatpush.bf16.msrb.mxu0 %v4762_v16  ;;  %v248_v16 = vld [vmem:[%s4746_s30 + $0xb8] sm:$0xff] }
  0x5f   : > { %1958 = vmatpush.bf16.msrb.mxu2 %v3493_v42  ;;  %1909 = vmatpush.bf16.msrb.mxu1 %v4065_v51  ;;  %v4841_v21 = vpack.c.bf16 %v248_v16, %v245_v12  ;;  %v252_v42 = vld [vmem:[%s4746_s30 + $0xd8] sm:$0xff]  ;;  %v4886_v16 = vpack.c.bf16 %v235_v5, %v232_v4  ;;  %v3666_v4 = vld [vmem:[#allocation5 + $0x33c] sm:$0xf0] }
  0x60   : > { %v4859_v51 = vpack.c.bf16 %v252_v42, %v249_v41  ;;  %v265_v41 = vld [vmem:[%s4746_s30 + $0x140] sm:$0xff]  ;;  %v227_v42 = vld [vmem:[%s4746_s30 + $0x10] sm:$0xff] }
  0x61   : > { %1812 = vmatpush.bf16.msrb.mxu3 %v3453_v54  ;;  %5873 = vst [vmem:[#allocation15_spill] sm:$0xff] %v4841_v21  ;;  %v4861_v54 = vpack.c.bf16 %v229_v47, %v226_v45  ;;  %v230_v45 = vld [vmem:[%s4746_s30 + $0x28] sm:$0xff] }
  0x62   : > { %1714 = vmatpush.bf16.msrb.mxu0 %v4768_v25  ;;  %v4162_v25 = vld [vmem:[#allocation5 + $0xdc] sm:$0xf]  ;;  %5876 = vst [vmem:[#allocation18_spill] sm:$0xff] %v4886_v16  ;;  %v266_v47 = vld [vmem:[%s4746_s30 + $0x148] sm:$0xff] }
  0x63   : > { %1959 = vmatpush.bf16.msrb.mxu2 %v3457_v55  ;;  %1910 = vmatpush.bf16.msrb.mxu1 %v4029_v7  ;;  %v3381_v24 = vor.u32 %v4162_v25, %v3378_v22  ;;  %v4863_v55 = vpack.c.bf16 %v253_v49, %v250_v48  ;;  %v3313_v7 = vor.u32 %v4149_v61, %v3312_v60  ;;  %v3276_v22 = vld [vmem:[#allocation5 + $0x8] sm:$0xf]  ;;  %v4271_v60 = vld [vmem:[#allocation5 + $0x444] sm:$0xf] }
  0x64   : > { %v4890_v25 = vpack.c.bf16 %v260_v11, %v257_v10  ;;  %v268_v11 = vld [vmem:[%s4746_s30 + $0x158] sm:$0xff] }
  0x65   : > { %1813 = vmatpush.bf16.msrb.mxu3 %v3417_v62  ;;  %5874 = vst [vmem:[#allocation16_spill] sm:$0xff] %v4863_v55  ;;  %v4288_v62 = vld [vmem:[#allocation5 + $0x4cc] sm:$0xf] }
  0x66   : > { %1715 = vmatpush.bf16.msrb.mxu0 %v4774_v34  ;;  %v4306_v34 = vld [vmem:[#allocation5 + $0x55c] sm:$0xf]  ;;  %5878 = vst [vmem:[#allocation20_spill] sm:$0xff] %v4890_v25 }
  0x67   : > { %1960 = vmatpush.bf16.msrb.mxu2 %v3421_v63  ;;  %1911 = vmatpush.bf16.msrb.mxu1 %v3993_v13  ;;  %v3957_v30 = vor.u32 %v4306_v34, %v3954_v28  ;;  %v3882_v63 = vld [vmem:[#allocation5 + $0x4ec] sm:$0xf0]  ;;  %v4888_v13 = vpack.c.bf16 %v259_v9, %v256_v6  ;;  %v3846_v34 = vld [vmem:[#allocation5 + $0x4a4] sm:$0xf0]  ;;  %v4270_v28 = vld [vmem:[#allocation5 + $0x43c] sm:$0xf] }
  0x68   : > { %1676 = vmatmul.bf16.gmra.mxu0 %v4835_v14  ;;  %1686 = vmatmul.bf16.gmra.mxu3 %v4837_v15  ;;  %v3885_v2 = vor.u32 %v4288_v62, %v3882_v63  ;;  %v267_v6 = vld [vmem:[%s4746_s30 + $0x150] sm:$0xff]  ;;  %v270_v9 = vld [vmem:[%s4746_s30 + $0x168] sm:$0xff] }
  0x69   : > { %1735 = vmatmul.bf16.gmra.mxu1 %v4839_v18  ;;  %1814 = vmatpush.bf16.msrb.mxu3 %v3381_v24  ;;  %5877 = vst [vmem:[#allocation19_spill] sm:$0xff] %v4888_v13  ;;  %v4140_v24 = vld [vmem:[#allocation5 + $0x28] sm:$0xf0] }
  0x6a   : > { %1784 = vmatmul.bf16.gmra.mxu2 %v4841_v21  ;;  %1716 = vmatpush.bf16.msrb.mxu0 %v4780_v43  ;;  %v4153_v43 = vld [vmem:[#allocation5 + $0x94] sm:$0xf]  ;;  %v3277_v27 = vor.u32 %v4140_v24, %v3276_v22  ;;  %v236_v24 = vld [vmem:[%s4746_s30 + $0x58] sm:$0xff] }
  0x6b   : > { %1961 = vmatpush.bf16.msrb.mxu2 %v3385_v29  ;;  %1912 = vmatpush.bf16.msrb.mxu1 %v3957_v30  ;;  %v3345_v37 = vor.u32 %v4153_v43, %v3342_v33  ;;  %v3810_v29 = vld [vmem:[#allocation5 + $0x45c] sm:$0xf0]  ;;  %v264_v43 = vld [vmem:[%s4746_s30 + $0x138] sm:$0xff]  ;;  %v271_v22 = vld [vmem:[%s4746_s30 + $0x170] sm:$0xff] }
  0x6c   : > { %v3813_v33 = vor.u32 %v4270_v28, %v3810_v29  ;;  %v4930_v29 = vpack.c.bf16 %v271_v22, %v268_v11  ;;  %v3458_v11 = vld [vmem:[#allocation5 + $0x194] sm:$0xf0]  ;;  %v4248_v22 = vld [vmem:[#allocation5 + $0x388] sm:$0xf0] }
  0x6d   : > { %1815 = vmatpush.bf16.msrb.mxu3 %v3345_v37  ;;  %v4261_v37 = vld [vmem:[#allocation5 + $0x3f4] sm:$0xf] }
  0x6e   : > { %1717 = vmatpush.bf16.msrb.mxu0 %v4786_v52  ;;  %v251_v52 = vld [vmem:[%s4746_s30 + $0xd0] sm:$0xff]  ;;  %v3777_v49 = vor.u32 %v4261_v37, %v3774_v40  ;;  %5881 = vst [vmem:[#allocation23_spill] sm:$0xff] %v4930_v29  ;;  %v4207_v37 = vld [vmem:[#allocation5 + $0x244] sm:$0xf]  ;;  %v3558_v40 = vld [vmem:[#allocation5 + $0x264] sm:$0xf0] }
  0x6f   : > { %1962 = vmatpush.bf16.msrb.mxu2 %v3349_v46  ;;  %v4866_v56 = vpack.c.bf16 %v254_v50, %v251_v52  ;;  %v263_v46 = vld [vmem:[%s4746_s30 + $0x130] sm:$0xff]  ;;  %v4910_v52 = vpack.c.bf16 %v265_v41, %v262_v36  ;;  %v4252_v50 = vld [vmem:[#allocation5 + $0x3ac] sm:$0xf]  ;;  %v4104_v41 = vld [vmem:[#allocation5 + $0x680] sm:$0xf] }
  0x71   : > { %5875 = vst [vmem:[#allocation17_spill] sm:$0xff] %v4866_v56 }
  0x72   : > { %1718 = vmatpush.bf16.msrb.mxu0 %v4792_v0  ;;  %v4297_v0 = vld [vmem:[#allocation5 + $0x514] sm:$0xf]  ;;  %5879 = vst [vmem:[#allocation21_spill] sm:$0xff] %v4910_v52 }
  0x73   : > { %v3921_v58 = vor.u32 %v4297_v0, %v3918_v57  ;;  %1963 = vmatpush.bf16.msrb.mxu2 %v3313_v7  ;;  %v3738_v0 = vld [vmem:[#allocation5 + $0x3cc] sm:$0xf0]  ;;  %v4914_v57 = vpack.c.bf16 %v266_v47, %v263_v46  ;;  %v3818_v7 = vld [vmem:[#allocation5 + $0x464] sm:$0xf0]  ;;  %v4266_v46 = vld [vmem:[#allocation5 + $0x418] sm:$0xf0] }
  0x74   : > { %v3821_v63 = vor.u32 %v4271_v60, %v3818_v7  ;;  %v4262_v47 = vld [vmem:[#allocation5 + $0x3fc] sm:$0xf]  ;;  %v4068_v60 = vld [vmem:[#allocation5 + $0x638] sm:$0xf] }
  0x75   : > { %1913 = vmatpush.bf16.msrb.mxu1 %v3921_v58  ;;  %5880 = vst [vmem:[#allocation22_spill] sm:$0xff] %v4914_v57  ;;  %v3741_v58 = vor.u32 %v4252_v50, %v3738_v0  ;;  %v3782_v50 = vld [vmem:[#allocation5 + $0x41c] sm:$0xf0]  ;;  %v3561_v0 = vor.u32 %v4207_v37, %v3558_v40  ;;  %v3422_v37 = vld [vmem:[#allocation5 + $0x14c] sm:$0xf0] }
  0x76   : > { %1719 = vmatpush.bf16.msrb.mxu0 %v4803_v19  ;;  %v4144_v19 = vld [vmem:[#allocation5 + $0x4c] sm:$0xf] }
  0x77   : > { %1964 = vmatpush.bf16.msrb.mxu2 %v3277_v27  ;;  %v269_v27 = vld [vmem:[%s4746_s30 + $0x160] sm:$0xff] }
  0x78   : > { %1691 = vmatmul.bf16.gmra.mxu3 %v4859_v51 }
  0x79   : > { %1720 = vmatmul.bf16.vlgmr.msrb.gmra.mxu0 %v4861_v54  ;;  %1740 = vmatmul.bf16.gmra.mxu1 %v4863_v55 }
  0x7a   : > { %1761 = vmatpush.bf16.msra.mxu0 %v4758_v8  ;;  %1789 = vmatmul.bf16.gmra.mxu2 %v4866_v56  ;;  %v3309_v8 = vor.u32 %v4144_v19, %v3306_v59  ;;  %v3702_v19 = vld [vmem:[#allocation5 + $0x384] sm:$0xf0]  ;;  %v3816_v59 = vld [vmem:[#allocation5 + $0x440] sm:$0xf] }
  0x7b   : > { %1914 = vmatpush.bf16.msrb.mxu1 %v3885_v2  ;;  %v4199_v2 = vld [vmem:[#allocation5 + $0x204] sm:$0xf]  ;;  %2153 = vmatpush.bf16.msra.mxu2 %v3821_v63  ;;  %v4257_v63 = vld [vmem:[#allocation5 + $0x3d0] sm:$0xf0] }
  0x7c   : > { %1816 = vmatpush.bf16.msrb.mxu3 %v3309_v8  ;;  %v4275_v8 = vld [vmem:[#allocation5 + $0x460] sm:$0xf0] }
  0x7d   : > { %v3817_v61 = vor.u32 %v4275_v8, %v3816_v59 }
  0x7e   : > { %1762 = vmatpush.bf16.msra.mxu0 %v4764_v17  ;;  %v255_v17 = vld [vmem:[%s4746_s30 + $0xf0] sm:$0xff] }
  0x7f   : > { %v4884_v12 = vpack.c.bf16 %v258_v3, %v255_v17  ;;  %v3530_v17 = vld [vmem:[#allocation5 + $0x224] sm:$0xf0]  ;;  %v4234_v3 = vld [vmem:[#allocation5 + $0x31c] sm:$0xf] }
  0x80   : > { %v3533_v5 = vor.u32 %v4199_v2, %v3530_v17  ;;  %v3669_v10 = vor.u32 %v4234_v3, %v3666_v4  ;;  %v4253_v2 = vld [vmem:[#allocation5 + $0x3b4] sm:$0xf]  ;;  %v3746_v3 = vld [vmem:[#allocation5 + $0x3d4] sm:$0xf0]  ;;  %v4032_v4 = vld [vmem:[#allocation5 + $0x5f0] sm:$0xf] }
  0x82   : > { %1763 = vmatpush.bf16.msra.mxu0 %v4770_v26  ;;  %v4135_v26 = vld [vmem:[#allocation5 + $0x4] sm:$0xf] }
  0x86   : > { %1764 = vmatpush.bf16.msra.mxu0 %v4776_v35  ;;  %v3270_v35 = vld [vmem:[#allocation5 + $0x24] sm:$0xf0] }
  0x87   : > { %v3273_v23 = vor.u32 %v4135_v26, %v3270_v35  ;;  %v4225_v26 = vld [vmem:[#allocation5 + $0x2d4] sm:$0xf]  ;;  %v3630_v35 = vld [vmem:[#allocation5 + $0x2f4] sm:$0xf0] }
  0x88   : > { %1696 = vmatmul.bf16.gmra.mxu3 %v4884_v12  ;;  %v3633_v28 = vor.u32 %v4225_v26, %v3630_v35  ;;  %v3708_v35 = vld [vmem:[#allocation5 + $0x368] sm:$0xf] }
  0x89   : > { %1725 = vmatmul.bf16.gmra.mxu0 %v4886_v16  ;;  %1745 = vmatmul.bf16.gmra.mxu1 %v4888_v13 }
  0x8a   : > { %1765 = vmatpush.bf16.msra.mxu0 %v4782_v44  ;;  %1794 = vmatmul.bf16.gmra.mxu2 %v4890_v25  ;;  %v4279_v44 = vld [vmem:[#allocation5 + $0x484] sm:$0xf] }
  0x8b   : > { %1817 = vmatpush.bf16.msrb.mxu3 %v3273_v23  ;;  %v3849_v30 = vor.u32 %v4279_v44, %v3846_v34  ;;  %v233_v23 = vld [vmem:[%s4746_s30 + $0x40] sm:$0xff]  ;;  %v272_v44 = vld [vmem:[%s4746_s30 + $0x178] sm:$0xff]  ;;  %v4928_v34 = vpack.c.bf16 %v270_v9, %v267_v6  ;;  %v3749_v6 = vor.u32 %v4253_v2, %v3746_v3 }
  0x8c   : > { %v4163_v3 = vld [vmem:[#allocation5 + $0xe4] sm:$0xf] }
  0x8d   : > { %1915 = vmatpush.bf16.msrb.mxu1 %v3849_v30  ;;  %v4932_v30 = vpack.c.bf16 %v236_v24, %v233_v23  ;;  %v4244_v23 = vld [vmem:[#allocation5 + $0x36c] sm:$0xf]  ;;  %v3709_v24 = vor.u32 %v4248_v22, %v3708_v35 }
  0x8e   : > { %1766 = vmatpush.bf16.msra.mxu0 %v4788_v53  ;;  %v261_v53 = vld [vmem:[%s4746_s30 + $0x120] sm:$0xff] }
  0x8f   : > { %v4908_v48 = vpack.c.bf16 %v264_v43, %v261_v53  ;;  %2006 = vmatpush.bf16.msra.mxu3 %v3817_v61  ;;  %5882 = vst [vmem:[#allocation24_spill] sm:$0xff] %v4932_v30  ;;  %v4216_v53 = vld [vmem:[#allocation5 + $0x28c] sm:$0xf]  ;;  %v3594_v43 = vld [vmem:[#allocation5 + $0x2ac] sm:$0xf0] }
  0x90   : > { %v3597_v36 = vor.u32 %v4216_v53, %v3594_v43  ;;  %v4338_v61 = vld [vmem:[#allocation5 + $0x658] sm:$0xf0] }
  0x91   : > { %2104 = vmatpush.bf16.msra.mxu1 %v3533_v5  ;;  %v4069_v7 = vor.u32 %v4338_v61, %v4068_v60  ;;  %v4329_v5 = vld [vmem:[#allocation5 + $0x610] sm:$0xf0] }
  0x92   : > { %1767 = vmatpush.bf16.msra.mxu0 %v4794_v1  ;;  %v4912_v1 = vpack.c.bf16 %v230_v45, %v227_v42  ;;  %v4347_v42 = vld [vmem:[#allocation5 + $0x6a0] sm:$0xf0]  ;;  %v3780_v45 = vld [vmem:[#allocation5 + $0x3f8] sm:$0xf]  ;;  %v4033_v9 = vor.u32 %v4329_v5, %v4032_v4  ;;  %v3386_v4 = vld [vmem:[#allocation5 + $0x104] sm:$0xf0] }
  0x93   : > { %v4105_v59 = vor.u32 %v4347_v42, %v4104_v41  ;;  %v4950_v42 = vld [vmem:[#allocation7] sm:$0xff]  ;;  %v3389_v5 = vor.u32 %v4163_v3, %v3386_v4 }
  0x96   : > { %1768 = vmatpush.bf16.msra.mxu0 %v4805_v20  ;;  %v4243_v20 = vld [vmem:[#allocation5 + $0x364] sm:$0xf] }
  0x97   : > { %v3705_v62 = vor.u32 %v4243_v20, %v3702_v19  ;;  %v4190_v20 = vld [vmem:[#allocation5 + $0x1bc] sm:$0xf]  ;;  %v3494_v19 = vld [vmem:[#allocation5 + $0x1dc] sm:$0xf0] }
  0x98   : > { %1701 = vmatmul.bf16.gmra.mxu3 %v4908_v48  ;;  %v3497_v8 = vor.u32 %v4190_v20, %v3494_v19  ;;  %v3674_v20 = vld [vmem:[#allocation5 + $0x344] sm:$0xf0]  ;;  %v3960_v19 = vld [vmem:[#allocation5 + $0x560] sm:$0xf] }
  0x99   : > { %1750 = vmatmul.bf16.gmra.mxu1 %v4910_v52  ;;  %1769 = vmatmul.bf16.vlgmr.msra.gmra.mxu0 %v4912_v1 }
  0x9a   : > { %1859 = vmatpush.bf16.msrb.mxu0 %v3813_v33  ;;  %1799 = vmatmul.bf16.gmra.mxu2 %v4914_v57  ;;  %v4934_v33 = vpack.c.bf16 %v272_v44, %v269_v27  ;;  %v3710_v27 = vld [vmem:[#allocation5 + $0x38c] sm:$0xf0]  ;;  %v3996_v44 = vld [vmem:[#allocation5 + $0x5a8] sm:$0xf] }
  0x9b   : > { %2105 = vmatpush.bf16.msra.mxu1 %v3497_v8  ;;  %v3713_v53 = vor.u32 %v4244_v23, %v3710_v27  ;;  %v3636_v23 = vld [vmem:[#allocation5 + $0x2d8] sm:$0xf]  ;;  %v4226_v27 = vld [vmem:[#allocation5 + $0x2dc] sm:$0xf] }
  0x9c   : > { %5883 = vst [vmem:[#allocation25_spill] sm:$0xff] %v4934_v33 }
  0x9e   : > { %1860 = vmatpush.bf16.msrb.mxu0 %v3777_v49  ;;  %v3781_v49 = vor.u32 %v4266_v46, %v3780_v45  ;;  %v4954_v46 = vperm.slane %v4950_v42, 0 }
  0xa0   : > { %2007 = vmatpush.bf16.msra.mxu3 %v3781_v49  ;;  %v4239_v49 = vld [vmem:[#allocation5 + $0x340] sm:$0xf0] }
  0xa2   : > { %1861 = vmatpush.bf16.msrb.mxu0 %v3741_v58  ;;  %v3785_v58 = vor.u32 %v4262_v47, %v3782_v50  ;;  %v3672_v47 = vld [vmem:[#allocation5 + $0x320] sm:$0xf]  ;;  %v4235_v50 = vld [vmem:[#allocation5 + $0x324] sm:$0xf] }
  0xa3   : > { %v3677_v61 = vor.u32 %v4235_v50, %v3674_v20  ;;  %v4154_v20 = vld [vmem:[#allocation5 + $0x9c] sm:$0xf] }
  0xa4   : > { %2154 = vmatpush.bf16.msra.mxu2 %v3785_v58  ;;  %v3673_v58 = vor.u32 %v4239_v49, %v3672_v47 }
  0xa6   : > { %1862 = vmatpush.bf16.msrb.mxu0 %v3705_v62  ;;  %v3744_v62 = vld [vmem:[#allocation5 + $0x3b0] sm:$0xf] }
  0xa7   : > { %v3745_v17 = vor.u32 %v4257_v63, %v3744_v62 }
  0xa8   : > { %1706 = vmatmul.bf16.gmra.mxu3 %v4928_v34  ;;  %2155 = vmatpush.bf16.msra.mxu2 %v3749_v6 }
  0xa9   : > { %1755 = vmatmul.bf16.gmra.mxu1 %v4930_v29  ;;  %1774 = vmatmul.bf16.gmra.mxu0 %v4932_v30 }
  0xaa   : > { %1863 = vmatpush.bf16.msrb.mxu0 %v3669_v10  ;;  %1804 = vmatmul.bf16.gmra.mxu2 %v4934_v33  ;;  %v4181_v10 = vld [vmem:[#allocation5 + $0x174] sm:$0xf] }
  0xab   : > { %2008 = vmatpush.bf16.msra.mxu3 %v3745_v17  ;;  %v3461_v26 = vor.u32 %v4181_v10, %v3458_v11 }
  0xac   : > { %2156 = vmatpush.bf16.msra.mxu2 %v3713_v53  ;;  %v3638_v53 = vld [vmem:[#allocation5 + $0x2fc] sm:$0xf0] }
  0xad   : > { %2106 = vmatpush.bf16.msra.mxu1 %v3461_v26 }
  0xae   : > { %1864 = vmatpush.bf16.msrb.mxu0 %v3633_v28  ;;  %v4320_v28 = vld [vmem:[#allocation5 + $0x5c8] sm:$0xf0] }
  0xaf   : > { %v3997_v43 = vor.u32 %v4320_v28, %v3996_v44  ;;  %2009 = vmatpush.bf16.msra.mxu3 %v3709_v24  ;;  %v4230_v24 = vld [vmem:[#allocation5 + $0x2f8] sm:$0xf0] }
  0xb0   : > { %2157 = vmatpush.bf16.msra.mxu2 %v3677_v61  ;;  %v3637_v28 = vor.u32 %v4230_v24, %v3636_v23  ;;  %v3888_v23 = vld [vmem:[#allocation5 + $0x4d0] sm:$0xf]  ;;  %v4293_v24 = vld [vmem:[#allocation5 + $0x4f0] sm:$0xf0] }
  0xb2   : > { %1865 = vmatpush.bf16.msrb.mxu0 %v3597_v36  ;;  %v4172_v36 = vld [vmem:[#allocation5 + $0x12c] sm:$0xf] }
  0xb3   : > { %v3425_v40 = vor.u32 %v4172_v36, %v3422_v37  ;;  %2010 = vmatpush.bf16.msra.mxu3 %v3673_v58  ;;  %v4302_v36 = vld [vmem:[#allocation5 + $0x538] sm:$0xf0] }
  0xb5   : > { %2107 = vmatpush.bf16.msra.mxu1 %v3425_v40 }
  0xb6   : > { %1866 = vmatpush.bf16.msrb.mxu0 %v3561_v0 }
  0xb7   : > { %2011 = vmatpush.bf16.msra.mxu3 %v3637_v28  ;;  %v3889_v28 = vor.u32 %v4293_v24, %v3888_v23 }
  0xb8   : > { %1818 = vmatmul.bf16.vlgmr.msrb.gmra.mxu3 %v4810_v31 }
  0xb9   : > { %1867 = vmatmul.bf16.vlgmr.msrb.gmra.mxu0 %v4861_v54  ;;  %1916 = vmatmul.bf16.vlgmr.msrb.gmra.mxu1 %v4912_v1 }
  0xba   : > { %2055 = vmatpush.bf16.msra.mxu0 %v4105_v59  ;;  %1965 = vmatmul.bf16.vlgmr.msrb.gmra.mxu2 %v4810_v31  ;;  %v4311_v59 = vld [vmem:[#allocation5 + $0x580] sm:$0xf0] }
  0xbb   : > { %2108 = vmatpush.bf16.msra.mxu1 %v3389_v5 }
  0xbe   : > { %2056 = vmatpush.bf16.msra.mxu0 %v4069_v7  ;;  %v3961_v7 = vor.u32 %v4311_v59, %v3960_v19  ;;  %v3350_v19 = vld [vmem:[#allocation5 + $0xbc] sm:$0xf0] }
  0xbf   : > { %v3353_v59 = vor.u32 %v4154_v20, %v3350_v19 }
  0xc1   : > { %2109 = vmatpush.bf16.msra.mxu1 %v3353_v59 }
  0xc2   : > { %2057 = vmatpush.bf16.msra.mxu0 %v4033_v9 }
  0xc6   : > { %2058 = vmatpush.bf16.msra.mxu0 %v3997_v43  ;;  %v3924_v43 = vld [vmem:[#allocation5 + $0x518] sm:$0xf] }
  0xc7   : > { %v3925_v47 = vor.u32 %v4302_v36, %v3924_v43 }
  0xc8   : > { %1823 = vmatmul.bf16.gmra.mxu3 %v4835_v14 }
  0xc9   : > { %1872 = vmatmul.bf16.gmra.mxu0 %v4886_v16  ;;  %1921 = vmatmul.bf16.gmra.mxu1 %v4932_v30 }
  0xca   : > { %1970 = vmatmul.bf16.gmra.mxu2 %v4835_v14  ;;  %2059 = vmatpush.bf16.msra.mxu0 %v3961_v7 }
  0xce   : > { %2060 = vmatpush.bf16.msra.mxu0 %v3925_v47 }
  0xd2   : > { %2061 = vmatpush.bf16.msra.mxu0 %v3889_v28 }
  0xd5   : > { %v4948_v41 = vpop.f32.mrf.mxu0 }
  0xd6   : > { %v1731_v45 = vpop.f32.mrf.mxu1  ;;  %v1673_v7 = vadd.f32 %v4948_v41, %v4954_v46 }
  0xd8   : > { %1828 = vmatmul.bf16.gmra.mxu3 %v4812_v32 }
  0xd9   : > { %1877 = vmatmul.bf16.gmra.mxu0 %v4814_v38  ;;  %1926 = vmatmul.bf16.gmra.mxu1 %v4816_v39 }
  0xda   : > { %1975 = vmatmul.bf16.gmra.mxu2 %v4812_v32 }
  0xdb   : > { %v1682_v0 = vpop.f32.mrf.mxu3 }
  0xdc   : > { %v1683_v8 = vadd.f32 %v1682_v0, %v4954_v46 }
  0xdd   : > { %v1780_v60 = vpop.f32.mrf.mxu2  ;;  %v4960_v62 = vpop.f32.mrf.mxu0 }
  0xde   : > { %v1732_v63 = vadd.f32 %v1731_v45, %v1683_v8  ;;  %v1733_v2 = vpop.f32.mrf.mxu1  ;;  %v3641_v45 = vor.u32 %v4226_v27, %v3638_v53  ;;  %v1675_v53 = vadd.f32 %v4960_v62, %v4954_v46 }
  0xe0   : > { %v4962_v17 = vadd.f32 %v1780_v60, %v1732_v63  ;;  %2158 = vmatpush.bf16.msra.mxu2 %v3641_v45 }
  0xe3   : > { %v1684_v6 = vpop.f32.mrf.mxu3 }
  0xe4   : > { %v1685_v9 = vadd.f32 %v1684_v6, %v4954_v46  ;;  %v3600_v6 = vld [vmem:[#allocation5 + $0x290] sm:$0xf] }
  0xe5   : > { %v1782_v10 = vpop.f32.mrf.mxu2  ;;  %v4965_v11 = vpop.f32.mrf.mxu0 }
  0xe6   : > { %v1734_v26 = vadd.f32 %v1733_v2, %v1685_v9  ;;  %v1736_v35 = vpop.f32.mrf.mxu1  ;;  %v4221_v9 = vld [vmem:[#allocation5 + $0x2b0] sm:$0xf0]  ;;  %v1678_v62 = vadd.f32 %v4965_v11, %v4954_v46 }
  0xe7   : > { %v3601_v41 = vor.u32 %v4221_v9, %v3600_v6  ;;  %v4212_v6 = vld [vmem:[#allocation5 + $0x268] sm:$0xf0] }
  0xe8   : > { %v4967_v22 = vadd.f32 %v1782_v10, %v1734_v26  ;;  %1833 = vmatmul.bf16.gmra.mxu3 %v4837_v15  ;;  %v4217_v10 = vld [vmem:[#allocation5 + $0x294] sm:$0xf]  ;;  %v4208_v9 = vld [vmem:[#allocation5 + $0x24c] sm:$0xf] }
  0xe9   : > { %1882 = vmatmul.bf16.gmra.mxu0 %v4839_v18  ;;  %1931 = vmatmul.bf16.gmra.mxu1 %v4841_v21 }
  0xea   : > { %1980 = vmatmul.bf16.gmra.mxu2 %v4837_v15  ;;  %2012 = vmatpush.bf16.msra.mxu3 %v3601_v41  ;;  %v3852_v41 = vld [vmem:[#allocation5 + $0x488] sm:$0xf] }
  0xeb   : > { %v1687_v44 = vpop.f32.mrf.mxu3 }
  0xec   : > { %v1688_v37 = vadd.f32 %v1687_v44, %v4954_v46 }
  0xed   : > { %v1785_v40 = vpop.f32.mrf.mxu2  ;;  %v4974_v49 = vpop.f32.mrf.mxu0 }
  0xee   : > { %v1737_v50 = vadd.f32 %v1736_v35, %v1688_v37  ;;  %v1738_v0 = vpop.f32.mrf.mxu1  ;;  %v3602_v35 = vld [vmem:[#allocation5 + $0x2b4] sm:$0xf0] }
  0xef   : > { %v3605_v44 = vor.u32 %v4217_v10, %v3602_v35  ;;  %v4284_v35 = vld [vmem:[#allocation5 + $0x4a8] sm:$0xf0] }
  0xf0   : > { %v4976_v58 = vadd.f32 %v1785_v40, %v1737_v50  ;;  %v4145_v50 = vld [vmem:[#allocation5 + $0x54] sm:$0xf] }
  0xf1   : > { %2159 = vmatpush.bf16.msra.mxu2 %v3605_v44  ;;  %v1680_v44 = vadd.f32 %v4974_v49, %v4954_v46 }
  0xf3   : > { %v1689_v8 = vpop.f32.mrf.mxu3 }
  0xf4   : > { %v1690_v60 = vadd.f32 %v1689_v8, %v4954_v46 }
  0xf5   : > { %v1787_v61 = vpop.f32.mrf.mxu2 }
  0xf6   : > { %v1739_v63 = vadd.f32 %v1738_v0, %v1690_v60  ;;  %v1721_v2 = vpop.f32.mrf.mxu0  ;;  %v1741_v3 = vpop.f32.mrf.mxu1  ;;  %v3314_v0 = vld [vmem:[#allocation5 + $0x74] sm:$0xf0] }
  0xf7   : > { %v4981_v4 = vadd.f32 %v1721_v2, %v1673_v7  ;;  %v3317_v20 = vor.u32 %v4145_v50, %v3314_v0  ;;  %v4136_v50 = vld [vmem:[#allocation5 + $0xc] sm:$0xf]  ;;  %v3278_v0 = vld [vmem:[#allocation5 + $0x2c] sm:$0xf0] }
  0xf8   : > { %v4983_v5 = vadd.f32 %v1787_v61, %v1739_v63  ;;  %1838 = vmatmul.bf16.gmra.mxu3 %v4859_v51 }
  0xf9   : > { %1887 = vmatmul.bf16.gmra.mxu0 %v4863_v55  ;;  %1936 = vmatmul.bf16.gmra.mxu1 %v4866_v56 }
  0xfa   : > { %1985 = vmatmul.bf16.gmra.mxu2 %v4859_v51  ;;  %2110 = vmatpush.bf16.msra.mxu1 %v3317_v20  ;;  %v3281_v20 = vor.u32 %v4136_v50, %v3278_v0  ;;  %v3824_v0 = vld [vmem:[#allocation5 + $0x448] sm:$0xf] }
  0xfb   : > { %v1692_v26 = vpop.f32.mrf.mxu3 }
  0xfc   : > { %v1693_v27 = vadd.f32 %v1692_v26, %v4954_v46  ;;  %v3566_v26 = vld [vmem:[#allocation5 + $0x26c] sm:$0xf0] }
  0xfd   : > { %v1790_v43 = vpop.f32.mrf.mxu2  ;;  %v3569_v24 = vor.u32 %v4208_v9, %v3566_v26  ;;  %v3536_v26 = vld [vmem:[#allocation5 + $0x208] sm:$0xf] }
  0xfe   : > { %v1742_v36 = vadd.f32 %v1741_v3, %v1693_v27  ;;  %v1723_v37 = vpop.f32.mrf.mxu0  ;;  %v1743_v40 = vpop.f32.mrf.mxu1  ;;  %v3564_v3 = vld [vmem:[#allocation5 + $0x248] sm:$0xf]  ;;  %v3853_v27 = vor.u32 %v4284_v35, %v3852_v41  ;;  %2111 = vmatpush.bf16.msra.mxu1 %v3281_v20  ;;  %v4204_v41 = vld [vmem:[#allocation5 + $0x228] sm:$0xf0] }
  0xff   : > { %v4992_v45 = vadd.f32 %v1723_v37, %v1675_v53  ;;  %v3565_v10 = vor.u32 %v4212_v6, %v3564_v3  ;;  %2160 = vmatpush.bf16.msra.mxu2 %v3569_v24  ;;  %v4106_v3 = vld [vmem:[#allocation5 + $0x6a4] sm:$0xf0]  ;;  %v3537_v24 = vor.u32 %v4204_v41, %v3536_v26  ;;  %v4276_v20 = vld [vmem:[#allocation5 + $0x468] sm:$0xf0] }
 0x100   : > { %v4994_v47 = vadd.f32 %v1790_v43, %v1742_v36  ;;  %2062 = vmatpush.bf16.msra.mxu0 %v3853_v27  ;;  %v4112_v6 = vld [vmem:[#allocation5 + $0x688] sm:$0xf] }
 0x101   : > { %2013 = vmatpush.bf16.msra.mxu3 %v3565_v10  ;;  %v4348_v10 = vld [vmem:[#allocation5 + $0x6a8] sm:$0xf0] }
 0x103   : > { %v1694_v19 = vpop.f32.mrf.mxu3 }
 0x104   : > { %v1695_v59 = vadd.f32 %v1694_v19, %v4954_v46  ;;  %2251 = vmatpush.bf16.msrb.mxu0 %v3537_v24  ;;  %v4195_v24 = vld [vmem:[#allocation5 + $0x1e0] sm:$0xf0] }
 0x105   : > { %v1792_v8 = vpop.f32.mrf.mxu2 }
 0x106   : > { %v1744_v60 = vadd.f32 %v1743_v40, %v1695_v59  ;;  %v1726_v61 = vpop.f32.mrf.mxu0  ;;  %v1746_v7 = vpop.f32.mrf.mxu1 }
 0x107   : > { %v4999_v63 = vadd.f32 %v1726_v61, %v1678_v62 }
 0x108   : > { %v5001_v2 = vadd.f32 %v1792_v8, %v1744_v60  ;;  %1843 = vmatmul.bf16.gmra.mxu3 %v4884_v12 }
 0x109   : > { %1892 = vmatmul.bf16.gmra.mxu0 %v4888_v13  ;;  %1941 = vmatmul.bf16.gmra.mxu1 %v4890_v25 }
 0x10a   : > { %1990 = vmatmul.bf16.gmra.mxu2 %v4884_v12 }
 0x10b   : > { %v1697_v11 = vpop.f32.mrf.mxu3 }
 0x10c   : > { %v1698_v23 = vadd.f32 %v1697_v11, %v4954_v46 }
 0x10d   : > { %v1795_v28 = vpop.f32.mrf.mxu2 }
 0x10e   : > { %v1747_v53 = vadd.f32 %v1746_v7, %v1698_v23  ;;  %v1728_v43 = vpop.f32.mrf.mxu0  ;;  %v1748_v36 = vpop.f32.mrf.mxu1  ;;  %v4343_v7 = vld [vmem:[#allocation5 + $0x684] sm:$0xf]  ;;  %v4113_v23 = vor.u32 %v4348_v10, %v4112_v6  ;;  %v4076_v10 = vld [vmem:[#allocation5 + $0x640] sm:$0xf] }
 0x10f   : > { %v5010_v37 = vadd.f32 %v1728_v43, %v1680_v44  ;;  %v4109_v11 = vor.u32 %v4343_v7, %v4106_v3 }
 0x110   : > { %v5012_v40 = vadd.f32 %v1795_v28, %v1747_v53  ;;  %2349 = vmatpush.bf16.msrb.mxu2 %v4113_v23  ;;  %v3500_v23 = vld [vmem:[#allocation5 + $0x1c0] sm:$0xf] }
 0x111   : > { %2202 = vmatpush.bf16.msrb.mxu3 %v4109_v11  ;;  %v4070_v11 = vld [vmem:[#allocation5 + $0x65c] sm:$0xf0] }
 0x113   : > { %v1699_v19 = vpop.f32.mrf.mxu3 }
 0x114   : > { %v1700_v59 = vadd.f32 %v1699_v19, %v4954_v46 }
 0x115   : > { %v1797_v62 = vpop.f32.mrf.mxu2 }
 0x116   : > { %v1749_v49 = vadd.f32 %v1748_v36, %v1700_v59  ;;  %v1751_v8 = vpop.f32.mrf.mxu1  ;;  %v5015_v60 = vpop.f32.mrf.mxu0  ;;  %v3825_v59 = vor.u32 %v4276_v20, %v3824_v0 }
 0x118   : > { %v5017_v61 = vadd.f32 %v1797_v62, %v1749_v49  ;;  %1848 = vmatmul.bf16.gmra.mxu3 %v4908_v48  ;;  %2300 = vmatpush.bf16.msrb.mxu1 %v3825_v59  ;;  %v3788_v59 = vld [vmem:[#allocation5 + $0x400] sm:$0xf] }
 0x119   : > { %1897 = vmatmul.bf16.gmra.mxu0 %v4910_v52  ;;  %1946 = vmatmul.bf16.gmra.mxu1 %v4914_v57 }
 0x11a   : > { %1995 = vmatmul.bf16.gmra.mxu2 %v4908_v48 }
 0x11b   : > { %v1702_v9 = vpop.f32.mrf.mxu3 }
 0x11c   : > { %v1703_v35 = vadd.f32 %v1702_v9, %v4954_v46  ;;  %v4334_v9 = vld [vmem:[#allocation5 + $0x63c] sm:$0xf] }
 0x11d   : > { %v1800_v27 = vpop.f32.mrf.mxu2  ;;  %v4073_v41 = vor.u32 %v4334_v9, %v4070_v11 }
 0x11e   : > { %v1752_v44 = vadd.f32 %v1751_v8, %v1703_v35  ;;  %v1753_v28 = vpop.f32.mrf.mxu1  ;;  %v5024_v53 = vpop.f32.mrf.mxu0  ;;  %v4339_v35 = vld [vmem:[#allocation5 + $0x660] sm:$0xf0] }
 0x11f   : > { %2203 = vmatpush.bf16.msrb.mxu3 %v4073_v41  ;;  %v4325_v41 = vld [vmem:[#allocation5 + $0x5f4] sm:$0xf] }
 0x120   : > { %v5026_v43 = vadd.f32 %v1800_v27, %v1752_v44 }
 0x123   : > { %v1704_v36 = vpop.f32.mrf.mxu3 }
 0x124   : > { %v1705_v50 = vadd.f32 %v1704_v36, %v4954_v46  ;;  %v4077_v36 = vor.u32 %v4339_v35, %v4076_v10  ;;  %v5047_v10 = vperm.slane %v4950_v42, 1  ;;  %v4034_v35 = vld [vmem:[#allocation5 + $0x614] sm:$0xf0]  ;;  %v4186_v42 = vld [vmem:[#allocation5 + $0x198] sm:$0xf0] }
 0x125   : > { %v1802_v19 = vpop.f32.mrf.mxu2 }
 0x126   : > { %v1754_v62 = vadd.f32 %v1753_v28, %v1705_v50  ;;  %v1756_v49 = vpop.f32.mrf.mxu1  ;;  %v5029_v7 = vpop.f32.mrf.mxu0  ;;  %v3501_v50 = vor.u32 %v4195_v24, %v3500_v23  ;;  %2350 = vmatpush.bf16.msrb.mxu2 %v4077_v36  ;;  %v4040_v23 = vld [vmem:[#allocation5 + $0x5f8] sm:$0xf] }
 0x127   : > { %v3464_v36 = vld [vmem:[#allocation5 + $0x178] sm:$0xf] }
 0x128   : > { %v5031_v8 = vadd.f32 %v1802_v19, %v1754_v62  ;;  %1853 = vmatmul.bf16.gmra.mxu3 %v4928_v34  ;;  %2252 = vmatpush.bf16.msrb.mxu0 %v3501_v50  ;;  %v4267_v62 = vld [vmem:[#allocation5 + $0x420] sm:$0xf0] }
 0x129   : > { %1902 = vmatmul.bf16.gmra.mxu0 %v4930_v29  ;;  %1951 = vmatmul.bf16.gmra.mxu1 %v4934_v33  ;;  %v3789_v9 = vor.u32 %v4267_v62, %v3788_v59  ;;  %v3465_v62 = vor.u32 %v4186_v42, %v3464_v36 }
 0x12a   : > { %5884 = vst [vmem:[#allocation26_spill] sm:$0xff] %v5031_v8  ;;  %2000 = vmatmul.bf16.gmra.mxu2 %v4928_v34 }
 0x12b   : > { %v1707_v3 = vpop.f32.mrf.mxu3  ;;  %2301 = vmatpush.bf16.msrb.mxu1 %v3789_v9 }
 0x12c   : > { %v1708_v6 = vadd.f32 %v1707_v3, %v4954_v46  ;;  %2253 = vmatpush.bf16.msrb.mxu0 %v3465_v62 }
 0x12d   : > { %v1805_v26 = vpop.f32.mrf.mxu2 }
 0x12e   : > { %v1757_v27 = vadd.f32 %v1756_v49, %v1708_v6  ;;  %v1758_v44 = vpop.f32.mrf.mxu1  ;;  %v5038_v28 = vpop.f32.mrf.mxu0 }
 0x130   : > { %v5040_v0 = vadd.f32 %v1805_v26, %v1757_v27  ;;  %v4037_v27 = vor.u32 %v4325_v41, %v4034_v35 }
 0x132   : > { %2204 = vmatpush.bf16.msrb.mxu3 %v4037_v27 }
 0x133   : > { %v1709_v20 = vpop.f32.mrf.mxu3 }
 0x134   : > { %v1710_v19 = vadd.f32 %v1709_v20, %v4954_v46 }
 0x135   : > { %v1807_v3 = vpop.f32.mrf.mxu2 }
 0x136   : > { %v1759_v11 = vadd.f32 %v1758_v44, %v1710_v19  ;;  %v1868_v49 = vpop.f32.mrf.mxu0  ;;  %v1917_v6 = vpop.f32.mrf.mxu1  ;;  %v4330_v44 = vld [vmem:[#allocation5 + $0x618] sm:$0xf0] }
 0x137   : > { %v4041_v59 = vor.u32 %v4330_v44, %v4040_v23 }
 0x138   : > { %v5043_v8 = vadd.f32 %v1807_v3, %v1759_v11  ;;  %2014 = vmatmul.bf16.vlgmr.msra.gmra.mxu3 %v4861_v54  ;;  %v1771_v3 = vadd.f32 %v5015_v60, %v4981_v4  ;;  %v1773_v60 = vadd.f32 %v5024_v53, %v4992_v45  ;;  %v4004_v45 = vld [vmem:[#allocation5 + $0x5b0] sm:$0xf]  ;;  %v4321_v53 = vld [vmem:[#allocation5 + $0x5d0] sm:$0xf0] }
 0x139   : > { %2063 = vmatmul.bf16.vlgmr.msra.gmra.mxu0 %v4912_v1  ;;  %2112 = vmatmul.bf16.vlgmr.msra.gmra.mxu1 %v4810_v31 }
 0x13a   : > { %2161 = vmatmul.bf16.vlgmr.msra.gmra.mxu2 %v4861_v54 }
 0x13b   : > { %v1819_v46 = vpop.f32.mrf.mxu3  ;;  %2351 = vmatpush.bf16.msrb.mxu2 %v4041_v59  ;;  %v3998_v59 = vld [vmem:[#allocation5 + $0x5cc] sm:$0xf0] }
 0x13c   : > { %v1820_v26 = vadd.f32 %v1819_v46, %v5047_v10 }
 0x13d   : > { %v5054_v24 = vpop.f32.mrf.mxu2 }
 0x13e   : > { %v1869_v50 = vadd.f32 %v1868_v49, %v1820_v26  ;;  %v1870_v20 = vpop.f32.mrf.mxu0  ;;  %v1919_v19 = vpop.f32.mrf.mxu1  ;;  %v3752_v49 = vld [vmem:[#allocation5 + $0x3b8] sm:$0xf]  ;;  %v4258_v26 = vld [vmem:[#allocation5 + $0x3d8] sm:$0xf0] }
 0x13f   : > { %v3753_v23 = vor.u32 %v4258_v26, %v3752_v49  ;;  %v4177_v49 = vld [vmem:[#allocation5 + $0x150] sm:$0xf0] }
 0x140   : > { %v1918_v9 = vadd.f32 %v1917_v6, %v1869_v50 }
 0x141   : > { %2302 = vmatpush.bf16.msrb.mxu1 %v3753_v23  ;;  %v1776_v23 = vadd.f32 %v5029_v7, %v4999_v63  ;;  %v1778_v63 = vadd.f32 %v5038_v28, %v5010_v37  ;;  %v3968_v37 = vld [vmem:[#allocation5 + $0x568] sm:$0xf]  ;;  %v4312_v28 = vld [vmem:[#allocation5 + $0x588] sm:$0xf0] }
 0x142   : > { %v2986_v11 = vpack.c.bf16 %v1918_v9, %v1771_v3 }
 0x143   : > { %v1821_v46 = vpop.f32.mrf.mxu3 }
 0x144   : > { %3066 = vst [vmem:[%s5058_s23] sm:$0xff] %v2986_v11  ;;  %v1822_v41 = vadd.f32 %v1821_v46, %v5047_v10 }
 0x145   : > { %v5062_v35 = vpop.f32.mrf.mxu2 }
 0x146   : > { %v1871_v27 = vadd.f32 %v1870_v20, %v1822_v41  ;;  %v1873_v44 = vpop.f32.mrf.mxu0  ;;  %v1922_v4 = vpop.f32.mrf.mxu1  ;;  %v4316_v20 = vld [vmem:[#allocation5 + $0x5ac] sm:$0xf]  ;;  %v4005_v41 = vor.u32 %v4321_v53, %v4004_v45 }
 0x147   : > { %v4001_v3 = vor.u32 %v4316_v20, %v3998_v59 }
 0x148   : > { %v1920_v6 = vadd.f32 %v1919_v19, %v1871_v27  ;;  %2019 = vmatmul.bf16.gmra.mxu3 %v4886_v16  ;;  %v3428_v19 = vld [vmem:[#allocation5 + $0x130] sm:$0xf]  ;;  %2352 = vmatpush.bf16.msrb.mxu2 %v4005_v41 }
 0x149   : > { %2068 = vmatmul.bf16.gmra.mxu0 %v4932_v30  ;;  %2117 = vmatmul.bf16.gmra.mxu1 %v4835_v14  ;;  %v3429_v26 = vor.u32 %v4177_v49, %v3428_v19 }
 0x14a   : > { %v2991_v36 = vpack.c.bf16 %v1920_v6, %v1773_v60  ;;  %2166 = vmatmul.bf16.gmra.mxu2 %v4886_v16  ;;  %2205 = vmatpush.bf16.msrb.mxu3 %v4001_v3 }
 0x14b   : > { %v1824_v42 = vpop.f32.mrf.mxu3  ;;  %2254 = vmatpush.bf16.msrb.mxu0 %v3429_v26 }
 0x14c   : > { %3071 = vst [vmem:[%s5058_s23 + $0x24] sm:$0xff] %v2991_v36  ;;  %v1825_v50 = vadd.f32 %v1824_v42, %v5047_v10  ;;  %v3716_v42 = vld [vmem:[#allocation5 + $0x370] sm:$0xf] }
 0x14d   : > { %v5072_v62 = vpop.f32.mrf.mxu2 }
 0x14e   : > { %v1874_v9 = vadd.f32 %v1873_v44, %v1825_v50  ;;  %v1875_v11 = vpop.f32.mrf.mxu0  ;;  %v1924_v46 = vpop.f32.mrf.mxu1  ;;  %v4249_v44 = vld [vmem:[#allocation5 + $0x390] sm:$0xf0] }
 0x14f   : > { %v3717_v20 = vor.u32 %v4249_v44, %v3716_v42 }
 0x150   : > { %v1923_v27 = vadd.f32 %v1922_v4, %v1874_v9  ;;  %v4307_v9 = vld [vmem:[#allocation5 + $0x564] sm:$0xf] }
 0x151   : > { %2303 = vmatpush.bf16.msrb.mxu1 %v3717_v20 }
 0x152   : > { %v2996_v60 = vpack.c.bf16 %v1923_v27, %v1776_v23 }
 0x153   : > { %v1826_v6 = vpop.f32.mrf.mxu3 }
 0x154   : > { %3076 = vst [vmem:[%s5058_s23 + $0x48] sm:$0xff] %v2996_v60  ;;  %v1827_v36 = vadd.f32 %v1826_v6, %v5047_v10  ;;  %v3969_v60 = vor.u32 %v4312_v28, %v3968_v37  ;;  %v4168_v6 = vld [vmem:[#allocation5 + $0x108] sm:$0xf0]  ;;  %v4298_v37 = vld [vmem:[#allocation5 + $0x51c] sm:$0xf] }
 0x155   : > { %v5078_v50 = vpop.f32.mrf.mxu2  ;;  %v3926_v28 = vld [vmem:[#allocation5 + $0x53c] sm:$0xf0] }
 0x156   : > { %v1876_v59 = vadd.f32 %v1875_v11, %v1827_v36  ;;  %v1878_v3 = vpop.f32.mrf.mxu0  ;;  %v1927_v45 = vpop.f32.mrf.mxu1  ;;  %v3962_v11 = vld [vmem:[#allocation5 + $0x584] sm:$0xf0]  ;;  %2353 = vmatpush.bf16.msrb.mxu2 %v3969_v60  ;;  %v3356_v60 = vld [vmem:[#allocation5 + $0xa0] sm:$0xf] }
 0x157   : > { %v3965_v49 = vor.u32 %v4307_v9, %v3962_v11 }
 0x158   : > { %v1925_v7 = vadd.f32 %v1924_v46, %v1876_v59  ;;  %2024 = vmatmul.bf16.gmra.mxu3 %v4814_v38  ;;  %v3392_v46 = vld [vmem:[#allocation5 + $0xe8] sm:$0xf] }
 0x159   : > { %2073 = vmatmul.bf16.gmra.mxu0 %v4816_v39  ;;  %2122 = vmatmul.bf16.gmra.mxu1 %v4812_v32  ;;  %v3393_v36 = vor.u32 %v4168_v6, %v3392_v46 }
 0x15a   : > { %v3001_v4 = vpack.c.bf16 %v1925_v7, %v1778_v63  ;;  %2171 = vmatmul.bf16.gmra.mxu2 %v4814_v38  ;;  %2206 = vmatpush.bf16.msrb.mxu3 %v3965_v49  ;;  %v3680_v63 = vld [vmem:[#allocation5 + $0x328] sm:$0xf]  ;;  %v4240_v7 = vld [vmem:[#allocation5 + $0x348] sm:$0xf0] }
 0x15b   : > { %v1829_v53 = vpop.f32.mrf.mxu3  ;;  %2255 = vmatpush.bf16.msrb.mxu0 %v3393_v36 }
 0x15c   : > { %3081 = vst [vmem:[%s5058_s23 + $0x6c] sm:$0xff] %v3001_v4  ;;  %v1830_v19 = vadd.f32 %v1829_v53, %v5047_v10 }
 0x15d   : > { %v5088_v41 = vpop.f32.mrf.mxu2 }
 0x15e   : > { %v1879_v26 = vadd.f32 %v1878_v3, %v1830_v19  ;;  %v1880_v23 = vpop.f32.mrf.mxu0  ;;  %v1929_v27 = vpop.f32.mrf.mxu1  ;;  %v3681_v3 = vor.u32 %v4240_v7, %v3680_v63 }
 0x160   : > { %v1928_v42 = vadd.f32 %v1927_v45, %v1879_v26  ;;  %2304 = vmatpush.bf16.msrb.mxu1 %v3681_v3  ;;  %v3929_v26 = vor.u32 %v4298_v37, %v3926_v28 }
 0x162   : > { %v3006_v44 = vpack.c.bf16 %v1928_v42, %v4962_v17  ;;  %2207 = vmatpush.bf16.msrb.mxu3 %v3929_v26 }
 0x163   : > { %v1831_v20 = vpop.f32.mrf.mxu3 }
 0x164   : > { %3086 = vst [vmem:[%s5058_s23 + $0x90] sm:$0xff] %v3006_v44  ;;  %v1832_v59 = vadd.f32 %v1831_v20, %v5047_v10 }
 0x165   : > { %v5093_v4 = vpop.f32.mrf.mxu2 }
 0x166   : > { %v1881_v53 = vadd.f32 %v1880_v23, %v1832_v59  ;;  %v1883_v19 = vpop.f32.mrf.mxu0  ;;  %v1932_v9 = vpop.f32.mrf.mxu1  ;;  %v3932_v23 = vld [vmem:[#allocation5 + $0x520] sm:$0xf] }
 0x168   : > { %v1930_v11 = vadd.f32 %v1929_v27, %v1881_v53  ;;  %2029 = vmatmul.bf16.gmra.mxu3 %v4839_v18  ;;  %v4303_v27 = vld [vmem:[#allocation5 + $0x540] sm:$0xf0]  ;;  %v3644_v53 = vld [vmem:[#allocation5 + $0x2e0] sm:$0xf] }
 0x169   : > { %2078 = vmatmul.bf16.gmra.mxu0 %v4841_v21  ;;  %2127 = vmatmul.bf16.gmra.mxu1 %v4837_v15  ;;  %v3933_v44 = vor.u32 %v4303_v27, %v3932_v23  ;;  %v4289_v23 = vld [vmem:[#allocation5 + $0x4d4] sm:$0xf]  ;;  %v3890_v27 = vld [vmem:[#allocation5 + $0x4f4] sm:$0xf0] }
 0x16a   : > { %v3011_v17 = vpack.c.bf16 %v1930_v11, %v4967_v22  ;;  %2176 = vmatmul.bf16.gmra.mxu2 %v4839_v18  ;;  %v4159_v22 = vld [vmem:[#allocation5 + $0xc0] sm:$0xf0] }
 0x16b   : > { %v1834_v45 = vpop.f32.mrf.mxu3  ;;  %v3357_v20 = vor.u32 %v4159_v22, %v3356_v60  ;;  %2354 = vmatpush.bf16.msrb.mxu2 %v3933_v44  ;;  %v4231_v11 = vld [vmem:[#allocation5 + $0x300] sm:$0xf0]  ;;  %v3320_v44 = vld [vmem:[#allocation5 + $0x58] sm:$0xf] }
 0x16c   : > { %3091 = vst [vmem:[%s5058_s23 + $0xb4] sm:$0xff] %v3011_v17  ;;  %v1835_v49 = vadd.f32 %v1834_v45, %v5047_v10 }
 0x16d   : > { %v5102_v46 = vpop.f32.mrf.mxu2  ;;  %2256 = vmatpush.bf16.msrb.mxu0 %v3357_v20 }
 0x16e   : > { %v1884_v6 = vadd.f32 %v1883_v19, %v1835_v49  ;;  %v1885_v36 = vpop.f32.mrf.mxu0  ;;  %v1934_v42 = vpop.f32.mrf.mxu1  ;;  %v3645_v19 = vor.u32 %v4231_v11, %v3644_v53 }
 0x170   : > { %v1933_v59 = vadd.f32 %v1932_v9, %v1884_v6  ;;  %2305 = vmatpush.bf16.msrb.mxu1 %v3645_v19  ;;  %v3893_v6 = vor.u32 %v4289_v23, %v3890_v27 }
 0x172   : > { %v3016_v63 = vpack.c.bf16 %v1933_v59, %v4976_v58  ;;  %2208 = vmatpush.bf16.msrb.mxu3 %v3893_v6 }
 0x173   : > { %v1836_v7 = vpop.f32.mrf.mxu3 }
 0x174   : > { %3096 = vst [vmem:[%s5058_s23 + $0xd8] sm:$0xff] %v3016_v63  ;;  %v1837_v3 = vadd.f32 %v1836_v7, %v5047_v10 }
 0x175   : > { %v5107_v17 = vpop.f32.mrf.mxu2 }
 0x176   : > { %v1886_v45 = vadd.f32 %v1885_v36, %v1837_v3  ;;  %v1888_v49 = vpop.f32.mrf.mxu0  ;;  %v1937_v37 = vpop.f32.mrf.mxu1  ;;  %v3896_v36 = vld [vmem:[#allocation5 + $0x4d8] sm:$0xf] }
 0x178   : > { %v1935_v28 = vadd.f32 %v1934_v42, %v1886_v45  ;;  %2034 = vmatmul.bf16.gmra.mxu3 %v4863_v55  ;;  %v4294_v42 = vld [vmem:[#allocation5 + $0x4f8] sm:$0xf0]  ;;  %v3608_v45 = vld [vmem:[#allocation5 + $0x298] sm:$0xf] }
 0x179   : > { %2083 = vmatmul.bf16.gmra.mxu0 %v4866_v56  ;;  %2132 = vmatmul.bf16.gmra.mxu1 %v4859_v51  ;;  %v3897_v63 = vor.u32 %v4294_v42, %v3896_v36  ;;  %v4280_v36 = vld [vmem:[#allocation5 + $0x48c] sm:$0xf]  ;;  %v3854_v42 = vld [vmem:[#allocation5 + $0x4ac] sm:$0xf0] }
 0x17a   : > { %v3021_v58 = vpack.c.bf16 %v1935_v28, %v4983_v5  ;;  %2181 = vmatmul.bf16.gmra.mxu2 %v4863_v55  ;;  %v4150_v5 = vld [vmem:[#allocation5 + $0x78] sm:$0xf0] }
 0x17b   : > { %v1839_v9 = vpop.f32.mrf.mxu3  ;;  %v3321_v7 = vor.u32 %v4150_v5, %v3320_v44  ;;  %2355 = vmatpush.bf16.msrb.mxu2 %v3897_v63  ;;  %v4222_v28 = vld [vmem:[#allocation5 + $0x2b8] sm:$0xf0]  ;;  %v3284_v63 = vld [vmem:[#allocation5 + $0x10] sm:$0xf] }
 0x17c   : > { %3101 = vst [vmem:[%s5058_s23 + $0xfc] sm:$0xff] %v3021_v58  ;;  %v1840_v26 = vadd.f32 %v1839_v9, %v5047_v10 }
 0x17d   : > { %v5116_v60 = vpop.f32.mrf.mxu2  ;;  %2257 = vmatpush.bf16.msrb.mxu0 %v3321_v7 }
 0x17e   : > { %v1889_v22 = vadd.f32 %v1888_v49, %v1840_v26  ;;  %v1890_v20 = vpop.f32.mrf.mxu0  ;;  %v1939_v59 = vpop.f32.mrf.mxu1  ;;  %v3609_v49 = vor.u32 %v4222_v28, %v3608_v45 }
 0x180   : > { %v1938_v3 = vadd.f32 %v1937_v37, %v1889_v22  ;;  %2306 = vmatpush.bf16.msrb.mxu1 %v3609_v49  ;;  %v3857_v22 = vor.u32 %v4280_v36, %v3854_v42 }
 0x182   : > { %v3026_v53 = vpack.c.bf16 %v1938_v3, %v4994_v47  ;;  %2209 = vmatpush.bf16.msrb.mxu3 %v3857_v22 }
 0x183   : > { %v1841_v11 = vpop.f32.mrf.mxu3 }
 0x184   : > { %3106 = vst [vmem:[%s5058_s23 + $0x120] sm:$0xff] %v3026_v53  ;;  %v1842_v19 = vadd.f32 %v1841_v11, %v5047_v10 }
 0x185   : > { %v5121_v58 = vpop.f32.mrf.mxu2 }
 0x186   : > { %v1891_v9 = vadd.f32 %v1890_v20, %v1842_v19  ;;  %v1893_v26 = vpop.f32.mrf.mxu0  ;;  %v1942_v23 = vpop.f32.mrf.mxu1  ;;  %v3860_v20 = vld [vmem:[#allocation5 + $0x490] sm:$0xf] }
 0x188   : > { %v1940_v27 = vadd.f32 %v1939_v59, %v1891_v9  ;;  %2039 = vmatmul.bf16.gmra.mxu3 %v4888_v13  ;;  %v4285_v59 = vld [vmem:[#allocation5 + $0x4b0] sm:$0xf0]  ;;  %v3572_v9 = vld [vmem:[#allocation5 + $0x250] sm:$0xf] }
 0x189   : > { %2088 = vmatmul.bf16.gmra.mxu0 %v4890_v25  ;;  %2137 = vmatmul.bf16.gmra.mxu1 %v4884_v12  ;;  %v3861_v53 = vor.u32 %v4285_v59, %v3860_v20  ;;  %v4200_v20 = vld [vmem:[#allocation5 + $0x20c] sm:$0xf]  ;;  %v3538_v59 = vld [vmem:[#allocation5 + $0x22c] sm:$0xf0] }
 0x18a   : > { %v3031_v47 = vpack.c.bf16 %v1940_v27, %v5001_v2  ;;  %2186 = vmatmul.bf16.gmra.mxu2 %v4888_v13  ;;  %v4141_v2 = vld [vmem:[#allocation5 + $0x30] sm:$0xf0] }
 0x18b   : > { %v1844_v37 = vpop.f32.mrf.mxu3  ;;  %v3285_v11 = vor.u32 %v4141_v2, %v3284_v63  ;;  %2356 = vmatpush.bf16.msrb.mxu2 %v3861_v53  ;;  %v4213_v27 = vld [vmem:[#allocation5 + $0x270] sm:$0xf0]  ;;  %v4272_v53 = vld [vmem:[#allocation5 + $0x44c] sm:$0xf] }
 0x18c   : > { %3111 = vst [vmem:[%s5058_s23 + $0x144] sm:$0xff] %v3031_v47  ;;  %v1845_v6 = vadd.f32 %v1844_v37, %v5047_v10 }
 0x18d   : > { %v5130_v44 = vpop.f32.mrf.mxu2  ;;  %2258 = vmatpush.bf16.msrb.mxu0 %v3285_v11 }
 0x18e   : > { %v1894_v5 = vadd.f32 %v1893_v26, %v1845_v6  ;;  %v1895_v7 = vpop.f32.mrf.mxu0  ;;  %v1944_v3 = vpop.f32.mrf.mxu1  ;;  %v3573_v26 = vor.u32 %v4213_v27, %v3572_v9 }
 0x190   : > { %v1943_v19 = vadd.f32 %v1942_v23, %v1894_v5  ;;  %2307 = vmatpush.bf16.msrb.mxu1 %v3573_v26  ;;  %v3541_v5 = vor.u32 %v4200_v20, %v3538_v59 }
 0x192   : > { %v3036_v45 = vpack.c.bf16 %v1943_v19, %v5012_v40  ;;  %2398 = vmatpush.bf16.msra.mxu3 %v3541_v5 }
 0x193   : > { %v1846_v28 = vpop.f32.mrf.mxu3 }
 0x194   : > { %3116 = vst [vmem:[%s5058_s23 + $0x168] sm:$0xff] %v3036_v45  ;;  %v1847_v49 = vadd.f32 %v1846_v28, %v5047_v10  ;;  %v4344_v28 = vld [vmem:[#allocation5 + $0x68c] sm:$0xf] }
 0x195   : > { %v5135_v47 = vpop.f32.mrf.mxu2 }
 0x196   : > { %v1896_v37 = vadd.f32 %v1895_v7, %v1847_v49  ;;  %v1898_v6 = vpop.f32.mrf.mxu0  ;;  %v1947_v36 = vpop.f32.mrf.mxu1  ;;  %v3544_v7 = vld [vmem:[#allocation5 + $0x210] sm:$0xf] }
 0x197   : > { %v4114_v49 = vld [vmem:[#allocation5 + $0x6ac] sm:$0xf0] }
 0x198   : > { %v1945_v42 = vadd.f32 %v1944_v3, %v1896_v37  ;;  %2044 = vmatmul.bf16.gmra.mxu3 %v4910_v52  ;;  %v4205_v3 = vld [vmem:[#allocation5 + $0x230] sm:$0xf0]  ;;  %v4117_v27 = vor.u32 %v4344_v28, %v4114_v49 }
 0x199   : > { %2093 = vmatmul.bf16.gmra.mxu0 %v4914_v57  ;;  %2142 = vmatmul.bf16.gmra.mxu1 %v4908_v48  ;;  %v3545_v45 = vor.u32 %v4205_v3, %v3544_v7  ;;  %v3502_v7 = vld [vmem:[#allocation5 + $0x1e4] sm:$0xf0] }
 0x19a   : > { %v3041_v40 = vpack.c.bf16 %v1945_v42, %v5017_v61  ;;  %2191 = vmatmul.bf16.gmra.mxu2 %v4910_v52  ;;  %v3826_v61 = vld [vmem:[#allocation5 + $0x46c] sm:$0xf0]  ;;  %2496 = vmatpush.bf16.msra.mxu1 %v4117_v27  ;;  %v3508_v3 = vld [vmem:[#allocation5 + $0x1c8] sm:$0xf] }
 0x19b   : > { %v1849_v23 = vpop.f32.mrf.mxu3  ;;  %v3829_v9 = vor.u32 %v4272_v53, %v3826_v61  ;;  %2545 = vmatpush.bf16.msra.mxu2 %v3545_v45  ;;  %v4263_v45 = vld [vmem:[#allocation5 + $0x404] sm:$0xf]  ;;  %v3790_v61 = vld [vmem:[#allocation5 + $0x424] sm:$0xf0] }
 0x19c   : > { %3121 = vst [vmem:[%s5058_s23 + $0x18c] sm:$0xff] %v3041_v40  ;;  %v1850_v22 = vadd.f32 %v1849_v23, %v5047_v10  ;;  %v3793_v49 = vor.u32 %v4263_v45, %v3790_v61 }
 0x19d   : > { %v5144_v63 = vpop.f32.mrf.mxu2  ;;  %2447 = vmatpush.bf16.msra.mxu0 %v3829_v9 }
 0x19e   : > { %v1899_v2 = vadd.f32 %v1898_v6, %v1850_v22  ;;  %v1900_v11 = vpop.f32.mrf.mxu0  ;;  %v1949_v19 = vpop.f32.mrf.mxu1 }
 0x1a0   : > { %v1948_v26 = vadd.f32 %v1947_v36, %v1899_v2  ;;  %v5885_v36 = vld [vmem:[#allocation26_spill] sm:$0xff] }
 0x1a1   : > { %2448 = vmatpush.bf16.msra.mxu0 %v3793_v49  ;;  %v3472_v49 = vld [vmem:[#allocation5 + $0x180] sm:$0xf] }
 0x1a2   : > { %v3046_v37 = vpack.c.bf16 %v1948_v26, %v5026_v43  ;;  %v4191_v43 = vld [vmem:[#allocation5 + $0x1c4] sm:$0xf] }
 0x1a3   : > { %v1851_v42 = vpop.f32.mrf.mxu3  ;;  %v3505_v2 = vor.u32 %v4191_v43, %v3502_v7 }
 0x1a4   : > { %3126 = vst [vmem:[%s5058_s23 + $0x1b0] sm:$0xff] %v3046_v37  ;;  %v1852_v6 = vadd.f32 %v1851_v42, %v5047_v10  ;;  %v4335_v42 = vld [vmem:[#allocation5 + $0x644] sm:$0xf] }
 0x1a5   : > { %v5149_v40 = vpop.f32.mrf.mxu2  ;;  %2399 = vmatpush.bf16.msra.mxu3 %v3505_v2 }
 0x1a6   : > { %v1901_v23 = vadd.f32 %v1900_v11, %v1852_v6  ;;  %v1903_v22 = vpop.f32.mrf.mxu0  ;;  %v1952_v20 = vpop.f32.mrf.mxu1  ;;  %v4196_v11 = vld [vmem:[#allocation5 + $0x1e8] sm:$0xf0]  ;;  %v4078_v6 = vld [vmem:[#allocation5 + $0x664] sm:$0xf0] }
 0x1a7   : > { %v3509_v28 = vor.u32 %v4196_v11, %v3508_v3  ;;  %v5165_v3 = vld [vmem:[#allocation7] sm:$0xff] }
 0x1a8   : > { %v1950_v59 = vadd.f32 %v1949_v19, %v1901_v23  ;;  %2049 = vmatmul.bf16.gmra.mxu3 %v4930_v29  ;;  %v4081_v23 = vor.u32 %v4335_v42, %v4078_v6  ;;  %v5171_v11 = vperm.slane %v5165_v3, 3  ;;  %v4254_v42 = vld [vmem:[#allocation5 + $0x3bc] sm:$0xf]  ;;  %v3754_v6 = vld [vmem:[#allocation5 + $0x3dc] sm:$0xf0] }
 0x1a9   : > { %2098 = vmatmul.bf16.gmra.mxu0 %v4934_v33  ;;  %2147 = vmatmul.bf16.gmra.mxu1 %v4928_v34 }
 0x1aa   : > { %v3051_v5 = vpack.c.bf16 %v1950_v59, %v5885_v36  ;;  %2196 = vmatmul.bf16.gmra.mxu2 %v4930_v29  ;;  %2497 = vmatpush.bf16.msra.mxu1 %v4081_v23 }
 0x1ab   : > { %v1854_v53 = vpop.f32.mrf.mxu3  ;;  %2546 = vmatpush.bf16.msra.mxu2 %v3509_v28  ;;  %v3466_v28 = vld [vmem:[#allocation5 + $0x19c] sm:$0xf0] }
 0x1ac   : > { %3131 = vst [vmem:[%s5058_s23 + $0x1d4] sm:$0xff] %v3051_v5  ;;  %v1855_v19 = vadd.f32 %v1854_v53, %v5047_v10 }
 0x1ad   : > { %v5158_v9 = vpop.f32.mrf.mxu2 }
 0x1ae   : > { %v1904_v27 = vadd.f32 %v1903_v22, %v1855_v19  ;;  %v1905_v26 = vpop.f32.mrf.mxu0  ;;  %v1954_v37 = vpop.f32.mrf.mxu1  ;;  %v5168_v22 = vperm.slane %v5165_v3, 2  ;;  %v4182_v19 = vld [vmem:[#allocation5 + $0x17c] sm:$0xf] }
 0x1b0   : > { %v1953_v59 = vadd.f32 %v1952_v20, %v1904_v27 }
 0x1b2   : > { %v3056_v36 = vpack.c.bf16 %v1953_v59, %v5040_v0  ;;  %v1967_v0 = vadd.f32 %v5054_v24, %v5168_v22 }
 0x1b3   : > { %v1856_v5 = vpop.f32.mrf.mxu3 }
 0x1b4   : > { %3136 = vst [vmem:[%s5058_s23 + $0x1f8] sm:$0xff] %v3056_v36  ;;  %v1857_v43 = vadd.f32 %v1856_v5, %v5047_v10  ;;  %v3757_v36 = vor.u32 %v4254_v42, %v3754_v6  ;;  %v4173_v6 = vld [vmem:[#allocation5 + $0x134] sm:$0xf] }
 0x1b5   : > { %v5163_v7 = vpop.f32.mrf.mxu2 }
 0x1b6   : > { %v1906_v53 = vadd.f32 %v1905_v26, %v1857_v43  ;;  %v2064_v2 = vpop.f32.mrf.mxu0  ;;  %v2113_v20 = vpop.f32.mrf.mxu1  ;;  %v3469_v26 = vor.u32 %v4182_v19, %v3466_v28  ;;  %2449 = vmatpush.bf16.msra.mxu0 %v3757_v36 }
 0x1b7   : > { %v2114_v61 = vadd.f32 %v2113_v20, %v5171_v11  ;;  %v4326_v20 = vld [vmem:[#allocation5 + $0x5fc] sm:$0xf] }
 0x1b8   : > { %v1955_v45 = vadd.f32 %v1954_v37, %v1906_v53  ;;  %2210 = vmatmul.bf16.vlgmr.msrb.gmra.mxu3 %v4912_v1  ;;  %v4187_v37 = vld [vmem:[#allocation5 + $0x1a0] sm:$0xf0] }
 0x1b9   : > { %2259 = vmatmul.bf16.vlgmr.msrb.gmra.mxu0 %v4810_v31  ;;  %2308 = vmatmul.bf16.vlgmr.msrb.gmra.mxu1 %v4861_v54  ;;  %v3473_v59 = vor.u32 %v4187_v37, %v3472_v49 }
 0x1ba   : > { %v3061_v10 = vpack.c.bf16 %v1955_v45, %v5043_v8  ;;  %2357 = vmatmul.bf16.vlgmr.msrb.gmra.mxu2 %v4912_v1  ;;  %2400 = vmatpush.bf16.msra.mxu3 %v3469_v26  ;;  %v4042_v45 = vld [vmem:[#allocation5 + $0x61c] sm:$0xf0] }
 0x1bb   : > { %v2015_v27 = vpop.f32.mrf.mxu3  ;;  %2547 = vmatpush.bf16.msra.mxu2 %v3473_v59  ;;  %v4045_v19 = vor.u32 %v4326_v20, %v4042_v45  ;;  %v3436_v59 = vld [vmem:[#allocation5 + $0x138] sm:$0xf] }
 0x1bc   : > { %3141 = vst [vmem:[%s5058_s23 + $0x21c] sm:$0xff] %v3061_v10  ;;  %v2016_v23 = vadd.f32 %v2015_v27, %v1967_v0  ;;  %v1969_v10 = vadd.f32 %v5062_v35, %v5168_v22  ;;  %v1972_v35 = vadd.f32 %v5072_v62, %v5168_v22  ;;  %v3718_v20 = vld [vmem:[#allocation5 + $0x394] sm:$0xf0] }
 0x1bd   : > { %v2162_v5 = vpop.f32.mrf.mxu2  ;;  %2498 = vmatpush.bf16.msra.mxu1 %v4045_v19 }
 0x1be   : > { %v5182_v24 = vadd.f32 %v2064_v2, %v2016_v23  ;;  %v5184_v8 = vadd.f32 %v2162_v5, %v2114_v61  ;;  %v2066_v43 = vpop.f32.mrf.mxu0  ;;  %v2115_v53 = vpop.f32.mrf.mxu1  ;;  %v3430_v23 = vld [vmem:[#allocation5 + $0x154] sm:$0xf0] }
 0x1bf   : > { %v2116_v28 = vadd.f32 %v2115_v53, %v5171_v11  ;;  %v3433_v5 = vor.u32 %v4173_v6, %v3430_v23  ;;  %v4245_v53 = vld [vmem:[#allocation5 + $0x374] sm:$0xf]  ;;  %v1974_v6 = vadd.f32 %v5078_v50, %v5168_v22  ;;  %v4164_v50 = vld [vmem:[#allocation5 + $0xec] sm:$0xf] }
 0x1c1   : > { %2401 = vmatpush.bf16.msra.mxu3 %v3433_v5 }
 0x1c3   : > { %v2017_v0 = vpop.f32.mrf.mxu3 }
 0x1c4   : > { %v2018_v49 = vadd.f32 %v2017_v0, %v1969_v10  ;;  %v3721_v10 = vor.u32 %v4245_v53, %v3718_v20  ;;  %v3394_v53 = vld [vmem:[#allocation5 + $0x10c] sm:$0xf0] }
 0x1c5   : > { %v2164_v27 = vpop.f32.mrf.mxu2  ;;  %v3400_v20 = vld [vmem:[#allocation5 + $0xf0] sm:$0xf] }
 0x1c6   : > { %v5189_v2 = vadd.f32 %v2066_v43, %v2018_v49  ;;  %v5191_v61 = vadd.f32 %v2164_v27, %v2116_v28  ;;  %v2069_v26 = vpop.f32.mrf.mxu0  ;;  %v2118_v37 = vpop.f32.mrf.mxu1  ;;  %v4178_v43 = vld [vmem:[#allocation5 + $0x158] sm:$0xf0]  ;;  %2450 = vmatpush.bf16.msra.mxu0 %v3721_v10  ;;  %v4169_v10 = vld [vmem:[#allocation5 + $0x110] sm:$0xf0] }
 0x1c7   : > { %v2119_v42 = vadd.f32 %v2118_v37, %v5171_v11  ;;  %v3437_v19 = vor.u32 %v4178_v43, %v3436_v59  ;;  %v4317_v37 = vld [vmem:[#allocation5 + $0x5b4] sm:$0xf] }
 0x1c8   : > { %2215 = vmatmul.bf16.gmra.mxu3 %v4932_v30 }
 0x1c9   : > { %2264 = vmatmul.bf16.gmra.mxu0 %v4835_v14  ;;  %2313 = vmatmul.bf16.gmra.mxu1 %v4886_v16 }
 0x1ca   : > { %2362 = vmatmul.bf16.gmra.mxu2 %v4932_v30  ;;  %v4006_v30 = vld [vmem:[#allocation5 + $0x5d4] sm:$0xf0] }
 0x1cb   : > { %v2020_v36 = vpop.f32.mrf.mxu3  ;;  %2548 = vmatpush.bf16.msra.mxu2 %v3437_v19  ;;  %v4009_v16 = vor.u32 %v4317_v37, %v4006_v30  ;;  %v3397_v19 = vor.u32 %v4164_v50, %v3394_v53  ;;  %v3401_v37 = vor.u32 %v4169_v10, %v3400_v20  ;;  %v1979_v50 = vadd.f32 %v5093_v4, %v5168_v22  ;;  %v4155_v4 = vld [vmem:[#allocation5 + $0xa4] sm:$0xf] }
 0x1cc   : > { %v2021_v45 = vadd.f32 %v2020_v36, %v1972_v35 }
 0x1cd   : > { %v2167_v0 = vpop.f32.mrf.mxu2  ;;  %2499 = vmatpush.bf16.msra.mxu1 %v4009_v16  ;;  %v1977_v16 = vadd.f32 %v5088_v41, %v5168_v22  ;;  %2402 = vmatpush.bf16.msra.mxu3 %v3397_v19 }
 0x1ce   : > { %v5200_v28 = vadd.f32 %v2069_v26, %v2021_v45  ;;  %v5202_v62 = vadd.f32 %v2167_v0, %v2119_v42  ;;  %v2071_v49 = vpop.f32.mrf.mxu0  ;;  %v2120_v27 = vpop.f32.mrf.mxu1  ;;  %v4236_v0 = vld [vmem:[#allocation5 + $0x32c] sm:$0xf] }
 0x1cf   : > { %v2121_v23 = vadd.f32 %v2120_v27, %v5171_v11  ;;  %2549 = vmatpush.bf16.msra.mxu2 %v3401_v37 }
 0x1d3   : > { %v2022_v35 = vpop.f32.mrf.mxu3 }
 0x1d4   : > { %v2023_v59 = vadd.f32 %v2022_v35, %v1974_v6 }
 0x1d5   : > { %v2169_v36 = vpop.f32.mrf.mxu2 }
 0x1d6   : > { %v5207_v26 = vadd.f32 %v2071_v49, %v2023_v59  ;;  %v5209_v42 = vadd.f32 %v2169_v36, %v2121_v23  ;;  %v2074_v5 = vpop.f32.mrf.mxu0  ;;  %v2123_v43 = vpop.f32.mrf.mxu1  ;;  %v3682_v49 = vld [vmem:[#allocation5 + $0x34c] sm:$0xf0] }
 0x1d7   : > { %v2124_v30 = vadd.f32 %v2123_v43, %v5171_v11  ;;  %v3685_v6 = vor.u32 %v4236_v0, %v3682_v49  ;;  %v4308_v43 = vld [vmem:[#allocation5 + $0x56c] sm:$0xf]  ;;  %v3358_v0 = vld [vmem:[#allocation5 + $0xc4] sm:$0xf0] }
 0x1d8   : > { %2220 = vmatmul.bf16.gmra.mxu3 %v4816_v39  ;;  %v3364_v49 = vld [vmem:[#allocation5 + $0xa8] sm:$0xf]  ;;  %v3361_v37 = vor.u32 %v4155_v4, %v3358_v0  ;;  %v1984_v4 = vadd.f32 %v5107_v17, %v5168_v22  ;;  %v4146_v17 = vld [vmem:[#allocation5 + $0x5c] sm:$0xf] }
 0x1d9   : > { %2269 = vmatmul.bf16.gmra.mxu0 %v4812_v32  ;;  %2318 = vmatmul.bf16.gmra.mxu1 %v4814_v38 }
 0x1da   : > { %2367 = vmatmul.bf16.gmra.mxu2 %v4816_v39  ;;  %2451 = vmatpush.bf16.msra.mxu0 %v3685_v6  ;;  %v3970_v39 = vld [vmem:[#allocation5 + $0x58c] sm:$0xf0]  ;;  %v4160_v6 = vld [vmem:[#allocation5 + $0xc8] sm:$0xf0] }
 0x1db   : > { %v2025_v45 = vpop.f32.mrf.mxu3  ;;  %v3973_v38 = vor.u32 %v4308_v43, %v3970_v39  ;;  %v3365_v43 = vor.u32 %v4160_v6, %v3364_v49  ;;  %2403 = vmatpush.bf16.msra.mxu3 %v3361_v37 }
 0x1dc   : > { %v2026_v27 = vadd.f32 %v2025_v45, %v1977_v16 }
 0x1dd   : > { %v2172_v35 = vpop.f32.mrf.mxu2  ;;  %2500 = vmatpush.bf16.msra.mxu1 %v3973_v38  ;;  %v1982_v38 = vadd.f32 %v5102_v46, %v5168_v22  ;;  %2550 = vmatpush.bf16.msra.mxu2 %v3365_v43 }
 0x1de   : > { %v5218_v23 = vadd.f32 %v2074_v5, %v2026_v27  ;;  %v5220_v41 = vadd.f32 %v2172_v35, %v2124_v30  ;;  %v2076_v59 = vpop.f32.mrf.mxu0  ;;  %v2125_v36 = vpop.f32.mrf.mxu1  ;;  %v4227_v35 = vld [vmem:[#allocation5 + $0x2e4] sm:$0xf] }
 0x1df   : > { %v2126_v53 = vadd.f32 %v2125_v36, %v5171_v11 }
 0x1e3   : > { %v2027_v16 = vpop.f32.mrf.mxu3 }
 0x1e4   : > { %v2028_v20 = vadd.f32 %v2027_v16, %v1979_v50 }
 0x1e5   : > { %v2174_v45 = vpop.f32.mrf.mxu2 }
 0x1e6   : > { %v5225_v5 = vadd.f32 %v2076_v59, %v2028_v20  ;;  %v5227_v30 = vadd.f32 %v2174_v45, %v2126_v53  ;;  %v2079_v19 = vpop.f32.mrf.mxu0  ;;  %v2128_v10 = vpop.f32.mrf.mxu1  ;;  %v3646_v59 = vld [vmem:[#allocation5 + $0x304] sm:$0xf0] }
 0x1e7   : > { %v2129_v39 = vadd.f32 %v2128_v10, %v5171_v11  ;;  %v3649_v50 = vor.u32 %v4227_v35, %v3646_v59  ;;  %v4299_v10 = vld [vmem:[#allocation5 + $0x524] sm:$0xf]  ;;  %v3322_v35 = vld [vmem:[#allocation5 + $0x7c] sm:$0xf0] }
 0x1e8   : > { %2225 = vmatmul.bf16.gmra.mxu3 %v4841_v21  ;;  %v3328_v59 = vld [vmem:[#allocation5 + $0x60] sm:$0xf]  ;;  %v3325_v43 = vor.u32 %v4146_v17, %v3322_v35  ;;  %v1989_v17 = vadd.f32 %v5121_v58, %v5168_v22  ;;  %v4137_v58 = vld [vmem:[#allocation5 + $0x14] sm:$0xf] }
 0x1e9   : > { %2274 = vmatmul.bf16.gmra.mxu0 %v4837_v15  ;;  %2323 = vmatmul.bf16.gmra.mxu1 %v4839_v18 }
 0x1ea   : > { %2372 = vmatmul.bf16.gmra.mxu2 %v4841_v21  ;;  %2452 = vmatpush.bf16.msra.mxu0 %v3649_v50  ;;  %v3934_v21 = vld [vmem:[#allocation5 + $0x544] sm:$0xf0]  ;;  %v4151_v50 = vld [vmem:[#allocation5 + $0x80] sm:$0xf0] }
 0x1eb   : > { %v2030_v27 = vpop.f32.mrf.mxu3  ;;  %v3937_v18 = vor.u32 %v4299_v10, %v3934_v21  ;;  %v3329_v10 = vor.u32 %v4151_v50, %v3328_v59  ;;  %2404 = vmatpush.bf16.msra.mxu3 %v3325_v43 }
 0x1ec   : > { %v2031_v36 = vadd.f32 %v2030_v27, %v1982_v38 }
 0x1ed   : > { %v2177_v16 = vpop.f32.mrf.mxu2  ;;  %2501 = vmatpush.bf16.msra.mxu1 %v3937_v18  ;;  %v1987_v18 = vadd.f32 %v5116_v60, %v5168_v22  ;;  %2551 = vmatpush.bf16.msra.mxu2 %v3329_v10 }
 0x1ee   : > { %v5236_v53 = vadd.f32 %v2079_v19, %v2031_v36  ;;  %v5238_v46 = vadd.f32 %v2177_v16, %v2129_v39  ;;  %v2081_v20 = vpop.f32.mrf.mxu0  ;;  %v2130_v45 = vpop.f32.mrf.mxu1  ;;  %v4218_v16 = vld [vmem:[#allocation5 + $0x29c] sm:$0xf] }
 0x1ef   : > { %v2131_v0 = vadd.f32 %v2130_v45, %v5171_v11 }
 0x1f3   : > { %v2032_v38 = vpop.f32.mrf.mxu3 }
 0x1f4   : > { %v2033_v49 = vadd.f32 %v2032_v38, %v1984_v4 }
 0x1f5   : > { %v2179_v27 = vpop.f32.mrf.mxu2 }
 0x1f6   : > { %v5243_v19 = vadd.f32 %v2081_v20, %v2033_v49  ;;  %v5245_v39 = vadd.f32 %v2179_v27, %v2131_v0  ;;  %v2084_v37 = vpop.f32.mrf.mxu0  ;;  %v2133_v6 = vpop.f32.mrf.mxu1  ;;  %v3610_v20 = vld [vmem:[#allocation5 + $0x2bc] sm:$0xf0] }
 0x1f7   : > { %v2134_v21 = vadd.f32 %v2133_v6, %v5171_v11  ;;  %v3613_v4 = vor.u32 %v4218_v16, %v3610_v20  ;;  %v4290_v6 = vld [vmem:[#allocation5 + $0x4dc] sm:$0xf]  ;;  %v3286_v16 = vld [vmem:[#allocation5 + $0x34] sm:$0xf0] }
 0x1f8   : > { %2230 = vmatmul.bf16.gmra.mxu3 %v4866_v56  ;;  %v3292_v20 = vld [vmem:[#allocation5 + $0x18] sm:$0xf]  ;;  %v3289_v10 = vor.u32 %v4137_v58, %v3286_v16  ;;  %v1994_v58 = vadd.f32 %v5135_v47, %v5168_v22  ;;  %v3832_v47 = vld [vmem:[#allocation5 + $0x450] sm:$0xf] }
 0x1f9   : > { %2279 = vmatmul.bf16.gmra.mxu0 %v4859_v51  ;;  %2328 = vmatmul.bf16.gmra.mxu1 %v4863_v55 }
 0x1fa   : > { %2377 = vmatmul.bf16.gmra.mxu2 %v4866_v56  ;;  %2453 = vmatpush.bf16.msra.mxu0 %v3613_v4  ;;  %v3898_v56 = vld [vmem:[#allocation5 + $0x4fc] sm:$0xf0]  ;;  %v4142_v4 = vld [vmem:[#allocation5 + $0x38] sm:$0xf0] }
 0x1fb   : > { %v2035_v36 = vpop.f32.mrf.mxu3  ;;  %v3901_v55 = vor.u32 %v4290_v6, %v3898_v56  ;;  %v3293_v6 = vor.u32 %v4142_v4, %v3292_v20  ;;  %2405 = vmatpush.bf16.msra.mxu3 %v3289_v10 }
 0x1fc   : > { %v2036_v45 = vadd.f32 %v2035_v36, %v1987_v18 }
 0x1fd   : > { %v2182_v38 = vpop.f32.mrf.mxu2  ;;  %2502 = vmatpush.bf16.msra.mxu1 %v3901_v55  ;;  %v1992_v55 = vadd.f32 %v5130_v44, %v5168_v22  ;;  %2552 = vmatpush.bf16.msra.mxu2 %v3293_v6 }
 0x1fe   : > { %v5254_v0 = vadd.f32 %v2084_v37, %v2036_v45  ;;  %v5256_v60 = vadd.f32 %v2182_v38, %v2134_v21  ;;  %v2086_v49 = vpop.f32.mrf.mxu0  ;;  %v2135_v27 = vpop.f32.mrf.mxu1  ;;  %v4209_v38 = vld [vmem:[#allocation5 + $0x254] sm:$0xf] }
 0x1ff   : > { %v2136_v35 = vadd.f32 %v2135_v27, %v5171_v11 }
 0x203   : > { %v2037_v18 = vpop.f32.mrf.mxu3 }
 0x204   : > { %v2038_v59 = vadd.f32 %v2037_v18, %v1989_v17 }
 0x205   : > { %v2184_v36 = vpop.f32.mrf.mxu2 }
 0x206   : > { %v5261_v37 = vadd.f32 %v2086_v49, %v2038_v59  ;;  %v5263_v21 = vadd.f32 %v2184_v36, %v2136_v35  ;;  %v2089_v43 = vpop.f32.mrf.mxu0  ;;  %v2138_v50 = vpop.f32.mrf.mxu1  ;;  %v3574_v49 = vld [vmem:[#allocation5 + $0x274] sm:$0xf0] }
 0x207   : > { %v2139_v56 = vadd.f32 %v2138_v50, %v5171_v11  ;;  %v3577_v17 = vor.u32 %v4209_v38, %v3574_v49  ;;  %v4281_v50 = vld [vmem:[#allocation5 + $0x494] sm:$0xf] }
 0x208   : > { %2235 = vmatmul.bf16.gmra.mxu3 %v4890_v25  ;;  %v4277_v38 = vld [vmem:[#allocation5 + $0x470] sm:$0xf0] }
 0x209   : > { %2284 = vmatmul.bf16.gmra.mxu0 %v4884_v12  ;;  %2333 = vmatmul.bf16.gmra.mxu1 %v4888_v13  ;;  %v4273_v49 = vld [vmem:[#allocation5 + $0x454] sm:$0xf]  ;;  %v3833_v6 = vor.u32 %v4277_v38, %v3832_v47  ;;  %v1999_v47 = vadd.f32 %v5149_v40, %v5168_v22  ;;  %v3796_v40 = vld [vmem:[#allocation5 + $0x408] sm:$0xf] }
 0x20a   : > { %2382 = vmatmul.bf16.gmra.mxu2 %v4890_v25  ;;  %2454 = vmatpush.bf16.msra.mxu0 %v3577_v17  ;;  %v3862_v25 = vld [vmem:[#allocation5 + $0x4b4] sm:$0xf0] }
 0x20b   : > { %v2040_v45 = vpop.f32.mrf.mxu3  ;;  %v3865_v13 = vor.u32 %v4281_v50, %v3862_v25  ;;  %v3834_v17 = vld [vmem:[#allocation5 + $0x474] sm:$0xf0]  ;;  %2594 = vmatpush.bf16.msrb.mxu3 %v3833_v6 }
 0x20c   : > { %v2041_v27 = vadd.f32 %v2040_v45, %v1992_v55  ;;  %v3837_v50 = vor.u32 %v4273_v49, %v3834_v17 }
 0x20d   : > { %v2187_v18 = vpop.f32.mrf.mxu2  ;;  %2503 = vmatpush.bf16.msra.mxu1 %v3865_v13  ;;  %v1997_v13 = vadd.f32 %v5144_v63, %v5168_v22 }
 0x20e   : > { %v5272_v35 = vadd.f32 %v2089_v43, %v2041_v27  ;;  %v5274_v44 = vadd.f32 %v2187_v18, %v2139_v56  ;;  %v2091_v59 = vpop.f32.mrf.mxu0  ;;  %v2140_v36 = vpop.f32.mrf.mxu1  ;;  %v4120_v18 = vld [vmem:[#allocation5 + $0x690] sm:$0xf]  ;;  %2741 = vmatpush.bf16.msrb.mxu2 %v3837_v50 }
 0x20f   : > { %v2141_v16 = vadd.f32 %v2140_v36, %v5171_v11 }
 0x213   : > { %v2042_v55 = vpop.f32.mrf.mxu3 }
 0x214   : > { %v2043_v20 = vadd.f32 %v2042_v55, %v1994_v58 }
 0x215   : > { %v2189_v45 = vpop.f32.mrf.mxu2 }
 0x216   : > { %v5279_v43 = vadd.f32 %v2091_v59, %v2043_v20  ;;  %v5281_v56 = vadd.f32 %v2189_v45, %v2141_v16  ;;  %v2094_v10 = vpop.f32.mrf.mxu0  ;;  %v2143_v4 = vpop.f32.mrf.mxu1  ;;  %v4349_v59 = vld [vmem:[#allocation5 + $0x6b0] sm:$0xf0] }
 0x217   : > { %v2144_v25 = vadd.f32 %v2143_v4, %v5171_v11  ;;  %v4121_v58 = vor.u32 %v4349_v59, %v4120_v18  ;;  %v4201_v4 = vld [vmem:[#allocation5 + $0x214] sm:$0xf]  ;;  %v4268_v18 = vld [vmem:[#allocation5 + $0x428] sm:$0xf0] }
 0x218   : > { %2240 = vmatmul.bf16.gmra.mxu3 %v4914_v57  ;;  %v4264_v59 = vld [vmem:[#allocation5 + $0x40c] sm:$0xf]  ;;  %v3797_v50 = vor.u32 %v4268_v18, %v3796_v40  ;;  %v2004_v40 = vadd.f32 %v5163_v7, %v5168_v22 }
 0x219   : > { %2289 = vmatmul.bf16.gmra.mxu0 %v4908_v48  ;;  %2338 = vmatmul.bf16.gmra.mxu1 %v4910_v52 }
 0x21a   : > { %2387 = vmatmul.bf16.gmra.mxu2 %v4914_v57  ;;  %2643 = vmatpush.bf16.msrb.mxu0 %v4121_v58  ;;  %v3546_v57 = vld [vmem:[#allocation5 + $0x234] sm:$0xf0]  ;;  %v3798_v58 = vld [vmem:[#allocation5 + $0x42c] sm:$0xf0] }
 0x21b   : > { %v2045_v27 = vpop.f32.mrf.mxu3  ;;  %v3549_v52 = vor.u32 %v4201_v4, %v3546_v57  ;;  %v2002_v57 = vadd.f32 %v5158_v9, %v5168_v22  ;;  %v3801_v4 = vor.u32 %v4264_v59, %v3798_v58  ;;  %2595 = vmatpush.bf16.msrb.mxu3 %v3797_v50  ;;  %v4255_v22 = vld [vmem:[#allocation5 + $0x3c4] sm:$0xf] }
 0x21c   : > { %v2046_v36 = vadd.f32 %v2045_v27, %v1997_v13 }
 0x21d   : > { %v2192_v55 = vpop.f32.mrf.mxu2  ;;  %2692 = vmatpush.bf16.msrb.mxu1 %v3549_v52  ;;  %2742 = vmatpush.bf16.msrb.mxu2 %v3801_v4  ;;  %v4048_v4 = vld [vmem:[#allocation5 + $0x600] sm:$0xf] }
 0x21e   : > { %v5290_v16 = vadd.f32 %v2094_v10, %v2046_v36  ;;  %v5292_v63 = vadd.f32 %v2192_v55, %v2144_v25  ;;  %v2096_v20 = vpop.f32.mrf.mxu0  ;;  %v2145_v45 = vpop.f32.mrf.mxu1  ;;  %v4084_v55 = vld [vmem:[#allocation5 + $0x648] sm:$0xf] }
 0x21f   : > { %v2146_v13 = vadd.f32 %v2145_v45, %v5171_v11 }
 0x223   : > { %v2047_v38 = vpop.f32.mrf.mxu3 }
 0x224   : > { %v2048_v49 = vadd.f32 %v2047_v38, %v1999_v47 }
 0x225   : > { %v2194_v27 = vpop.f32.mrf.mxu2 }
 0x226   : > { %v5297_v10 = vadd.f32 %v2096_v20, %v2048_v49  ;;  %v5299_v25 = vadd.f32 %v2194_v27, %v2146_v13  ;;  %v2099_v6 = vpop.f32.mrf.mxu0  ;;  %v2148_v17 = vpop.f32.mrf.mxu1  ;;  %v4340_v20 = vld [vmem:[#allocation5 + $0x668] sm:$0xf0] }
 0x227   : > { %v2149_v52 = vadd.f32 %v2148_v17, %v5171_v11  ;;  %v4085_v47 = vor.u32 %v4340_v20, %v4084_v55  ;;  %v4192_v17 = vld [vmem:[#allocation5 + $0x1cc] sm:$0xf] }
 0x228   : > { %2245 = vmatmul.bf16.gmra.mxu3 %v4934_v33 }
 0x229   : > { %2294 = vmatmul.bf16.gmra.mxu0 %v4928_v34  ;;  %2343 = vmatmul.bf16.gmra.mxu1 %v4930_v29 }
 0x22a   : > { %2392 = vmatmul.bf16.gmra.mxu2 %v4934_v33  ;;  %2644 = vmatpush.bf16.msrb.mxu0 %v4085_v47  ;;  %v3510_v33 = vld [vmem:[#allocation5 + $0x1ec] sm:$0xf0]  ;;  %v4331_v47 = vld [vmem:[#allocation5 + $0x620] sm:$0xf0] }
 0x22b   : > { %v2050_v36 = vpop.f32.mrf.mxu3  ;;  %v3513_v29 = vor.u32 %v4192_v17, %v3510_v33 }
 0x22c   : > { %v2051_v45 = vadd.f32 %v2050_v36, %v2002_v57  ;;  %v5315_v57 = vperm.slane %v5165_v3, 4  ;;  %v4259_v3 = vld [vmem:[#allocation5 + $0x3e0] sm:$0xf0] }
 0x22d   : > { %v2197_v38 = vpop.f32.mrf.mxu2  ;;  %2693 = vmatpush.bf16.msrb.mxu1 %v3513_v29  ;;  %v3760_v29 = vld [vmem:[#allocation5 + $0x3c0] sm:$0xf] }
 0x22e   : > { %v5308_v13 = vadd.f32 %v2099_v6, %v2051_v45  ;;  %v5310_v9 = vadd.f32 %v2197_v38, %v2149_v52  ;;  %v2101_v49 = vpop.f32.mrf.mxu0  ;;  %v2150_v27 = vpop.f32.mrf.mxu1  ;;  %v3761_v20 = vor.u32 %v4259_v3, %v3760_v29  ;;  %v3762_v45 = vld [vmem:[#allocation5 + $0x3e4] sm:$0xf0] }
 0x22f   : > { %v2151_v6 = vadd.f32 %v2150_v27, %v5171_v11  ;;  %v4049_v27 = vor.u32 %v4331_v47, %v4048_v4  ;;  %v5886_v47 = vld [vmem:[#allocation18_spill] sm:$0xff] }
 0x230   : > { %2596 = vmatpush.bf16.msrb.mxu3 %v3761_v20 }
 0x231   : > { %2645 = vmatpush.bf16.msrb.mxu0 %v4049_v27  ;;  %v4246_v27 = vld [vmem:[#allocation5 + $0x37c] sm:$0xf] }
 0x233   : > { %v2052_v18 = vpop.f32.mrf.mxu3 }
 0x234   : > { %v2053_v59 = vadd.f32 %v2052_v18, %v2004_v40 }
 0x235   : > { %v2199_v52 = vpop.f32.mrf.mxu2 }
 0x236   : > { %v5318_v36 = vadd.f32 %v2101_v49, %v2053_v59  ;;  %v5320_v50 = vadd.f32 %v2199_v52, %v2151_v6  ;;  %v2260_v58 = vpop.f32.mrf.mxu0  ;;  %v2309_v55 = vpop.f32.mrf.mxu1  ;;  %v3765_v49 = vor.u32 %v4255_v22, %v3762_v45 }
 0x237   : > { %v2261_v33 = vadd.f32 %v2260_v58, %v5315_v57  ;;  %v4183_v58 = vld [vmem:[#allocation5 + $0x184] sm:$0xf] }
 0x238   : > { %2406 = vmatmul.bf16.vlgmr.msra.gmra.mxu3 %v4810_v31  ;;  %2743 = vmatpush.bf16.msrb.mxu2 %v3765_v49  ;;  %v4250_v49 = vld [vmem:[#allocation5 + $0x398] sm:$0xf0] }
 0x239   : > { %v2310_v7 = vadd.f32 %v2309_v55, %v2261_v33  ;;  %2455 = vmatmul.bf16.vlgmr.msra.gmra.mxu0 %v4861_v54  ;;  %2504 = vmatmul.bf16.vlgmr.msra.gmra.mxu1 %v4912_v1  ;;  %v3474_v55 = vld [vmem:[#allocation5 + $0x1a4] sm:$0xf0] }
 0x23a   : > { %2553 = vmatmul.bf16.vlgmr.msra.gmra.mxu2 %v4810_v31 }
 0x23b   : > { %v2211_v11 = vpop.f32.mrf.mxu3 }
 0x23c   : > { %v2212_v38 = vadd.f32 %v2211_v11, %v5184_v8  ;;  %v3477_v8 = vor.u32 %v4183_v58, %v3474_v55 }
 0x23d   : > { %v2358_v17 = vpop.f32.mrf.mxu2 }
 0x23e   : > { %v2987_v40 = vpack.c.bf16 %v2212_v38, %v5182_v24  ;;  %v5329_v18 = vadd.f32 %v2358_v17, %v2310_v7  ;;  %v2262_v6 = vpop.f32.mrf.mxu0  ;;  %v2311_v59 = vpop.f32.mrf.mxu1  ;;  %2694 = vmatpush.bf16.msrb.mxu1 %v3477_v8  ;;  %v5887_v38 = vld [vmem:[#allocation24_spill] sm:$0xff] }
 0x23f   : > { %v2263_v52 = vadd.f32 %v2262_v6, %v5315_v57  ;;  %v4012_v6 = vld [vmem:[#allocation5 + $0x5b8] sm:$0xf] }
 0x240   : > { %3067 = vst [vmem:[%s5058_s23 + $0x8] sm:$0xff] %v2987_v40  ;;  %v3726_v40 = vld [vmem:[#allocation5 + $0x39c] sm:$0xf0] }
 0x241   : > { %v2312_v33 = vadd.f32 %v2311_v59, %v2263_v52  ;;  %v4322_v59 = vld [vmem:[#allocation5 + $0x5d8] sm:$0xf0]  ;;  %v3729_v58 = vor.u32 %v4246_v27, %v3726_v40 }
 0x242   : > { %v4013_v55 = vor.u32 %v4322_v59, %v4012_v6  ;;  %v5888_v59 = vld [vmem:[#allocation12_spill] sm:$0xff] }
 0x243   : > { %v2213_v29 = vpop.f32.mrf.mxu3  ;;  %2744 = vmatpush.bf16.msrb.mxu2 %v3729_v58  ;;  %v4241_v58 = vld [vmem:[#allocation5 + $0x350] sm:$0xf0] }
 0x244   : > { %v2214_v3 = vadd.f32 %v2213_v29, %v5191_v61  ;;  %v3724_v61 = vld [vmem:[#allocation5 + $0x378] sm:$0xf]  ;;  %2646 = vmatpush.bf16.msrb.mxu0 %v4013_v55  ;;  %v4237_v55 = vld [vmem:[#allocation5 + $0x334] sm:$0xf] }
 0x245   : > { %v2360_v22 = vpop.f32.mrf.mxu2  ;;  %v3725_v17 = vor.u32 %v4250_v49, %v3724_v61 }
 0x246   : > { %v2992_v24 = vpack.c.bf16 %v2214_v3, %v5189_v2  ;;  %v5335_v7 = vadd.f32 %v2360_v22, %v2312_v33  ;;  %v2265_v11 = vpop.f32.mrf.mxu0  ;;  %v2314_v20 = vpop.f32.mrf.mxu1 }
 0x247   : > { %v2266_v45 = vadd.f32 %v2265_v11, %v5315_v57  ;;  %2597 = vmatpush.bf16.msrb.mxu3 %v3725_v17  ;;  %v4174_v11 = vld [vmem:[#allocation5 + $0x13c] sm:$0xf] }
 0x248   : > { %3072 = vst [vmem:[%s5058_s23 + $0x2c] sm:$0xff] %v2992_v24  ;;  %2411 = vmatmul.bf16.gmra.mxu3 %v4835_v14 }
 0x249   : > { %v2315_v4 = vadd.f32 %v2314_v20, %v2266_v45  ;;  %2460 = vmatmul.bf16.gmra.mxu0 %v5886_v47  ;;  %2509 = vmatmul.bf16.gmra.mxu1 %v5887_v38  ;;  %v3438_v20 = vld [vmem:[#allocation5 + $0x15c] sm:$0xf0] }
 0x24a   : > { %2558 = vmatmul.bf16.gmra.mxu2 %v4835_v14 }
 0x24b   : > { %v2216_v2 = vpop.f32.mrf.mxu3 }
 0x24c   : > { %v2217_v52 = vadd.f32 %v2216_v2, %v5202_v62  ;;  %v3441_v62 = vor.u32 %v4174_v11, %v3438_v20 }
 0x24d   : > { %v2363_v33 = vpop.f32.mrf.mxu2 }
 0x24e   : > { %v2997_v8 = vpack.c.bf16 %v2217_v52, %v5200_v28  ;;  %v5345_v29 = vadd.f32 %v2363_v33, %v2315_v4  ;;  %v2267_v3 = vpop.f32.mrf.mxu0  ;;  %v2316_v22 = vpop.f32.mrf.mxu1  ;;  %2695 = vmatpush.bf16.msrb.mxu1 %v3441_v62  ;;  %v5889_v52 = vld [vmem:[#allocation13_spill] sm:$0xff] }
 0x24f   : > { %v2268_v24 = vadd.f32 %v2267_v3, %v5315_v57  ;;  %v3976_v3 = vld [vmem:[#allocation5 + $0x570] sm:$0xf] }
 0x250   : > { %3077 = vst [vmem:[%s5058_s23 + $0x50] sm:$0xff] %v2997_v8  ;;  %v3690_v8 = vld [vmem:[#allocation5 + $0x354] sm:$0xf0] }
 0x251   : > { %v2317_v45 = vadd.f32 %v2316_v22, %v2268_v24  ;;  %v4313_v22 = vld [vmem:[#allocation5 + $0x590] sm:$0xf0]  ;;  %v3693_v11 = vor.u32 %v4237_v55, %v3690_v8 }
 0x252   : > { %v3977_v20 = vor.u32 %v4313_v22, %v3976_v3  ;;  %v5890_v22 = vld [vmem:[#allocation14_spill] sm:$0xff] }
 0x253   : > { %v2218_v61 = vpop.f32.mrf.mxu3  ;;  %2745 = vmatpush.bf16.msrb.mxu2 %v3693_v11  ;;  %v4232_v11 = vld [vmem:[#allocation5 + $0x308] sm:$0xf0] }
 0x254   : > { %v2219_v49 = vadd.f32 %v2218_v61, %v5209_v42  ;;  %v3688_v42 = vld [vmem:[#allocation5 + $0x330] sm:$0xf]  ;;  %2647 = vmatpush.bf16.msrb.mxu0 %v3977_v20  ;;  %v4228_v20 = vld [vmem:[#allocation5 + $0x2ec] sm:$0xf] }
 0x255   : > { %v2365_v27 = vpop.f32.mrf.mxu2  ;;  %v3689_v33 = vor.u32 %v4241_v58, %v3688_v42 }
 0x256   : > { %v3002_v28 = vpack.c.bf16 %v2219_v49, %v5207_v26  ;;  %v5351_v4 = vadd.f32 %v2365_v27, %v2317_v45  ;;  %v2270_v2 = vpop.f32.mrf.mxu0  ;;  %v2319_v17 = vpop.f32.mrf.mxu1 }
 0x257   : > { %v2271_v40 = vadd.f32 %v2270_v2, %v5315_v57  ;;  %2598 = vmatpush.bf16.msrb.mxu3 %v3689_v33  ;;  %v4165_v2 = vld [vmem:[#allocation5 + $0xf4] sm:$0xf] }
 0x258   : > { %3082 = vst [vmem:[%s5058_s23 + $0x74] sm:$0xff] %v3002_v28  ;;  %2416 = vmatmul.bf16.gmra.mxu3 %v4812_v32 }
 0x259   : > { %v2320_v6 = vadd.f32 %v2319_v17, %v2271_v40  ;;  %2465 = vmatmul.bf16.gmra.mxu0 %v5888_v59  ;;  %2514 = vmatmul.bf16.gmra.mxu1 %v5889_v52  ;;  %v3402_v17 = vld [vmem:[#allocation5 + $0x114] sm:$0xf0] }
 0x25a   : > { %2563 = vmatmul.bf16.gmra.mxu2 %v4812_v32 }
 0x25b   : > { %v2221_v26 = vpop.f32.mrf.mxu3 }
 0x25c   : > { %v2222_v24 = vadd.f32 %v2221_v26, %v5220_v41  ;;  %v3405_v41 = vor.u32 %v4165_v2, %v3402_v17 }
 0x25d   : > { %v2368_v45 = vpop.f32.mrf.mxu2 }
 0x25e   : > { %v3007_v62 = vpack.c.bf16 %v2222_v24, %v5218_v23  ;;  %v5361_v61 = vadd.f32 %v2368_v45, %v2320_v6  ;;  %v2272_v49 = vpop.f32.mrf.mxu0  ;;  %v2321_v27 = vpop.f32.mrf.mxu1  ;;  %2696 = vmatpush.bf16.msrb.mxu1 %v3405_v41  ;;  %v5891_v24 = vld [vmem:[#allocation15_spill] sm:$0xff] }
 0x25f   : > { %v2273_v28 = vadd.f32 %v2272_v49, %v5315_v57  ;;  %v3940_v49 = vld [vmem:[#allocation5 + $0x528] sm:$0xf] }
 0x260   : > { %3087 = vst [vmem:[%s5058_s23 + $0x98] sm:$0xff] %v3007_v62  ;;  %v3654_v62 = vld [vmem:[#allocation5 + $0x30c] sm:$0xf0] }
 0x261   : > { %v2322_v40 = vadd.f32 %v2321_v27, %v2273_v28  ;;  %v4304_v27 = vld [vmem:[#allocation5 + $0x548] sm:$0xf0]  ;;  %v3657_v2 = vor.u32 %v4228_v20, %v3654_v62 }
 0x262   : > { %v3941_v17 = vor.u32 %v4304_v27, %v3940_v49  ;;  %v5892_v27 = vld [vmem:[#allocation16_spill] sm:$0xff] }
 0x263   : > { %v2223_v42 = vpop.f32.mrf.mxu3  ;;  %2746 = vmatpush.bf16.msrb.mxu2 %v3657_v2  ;;  %v4223_v2 = vld [vmem:[#allocation5 + $0x2c0] sm:$0xf0] }
 0x264   : > { %v2224_v58 = vadd.f32 %v2223_v42, %v5227_v30  ;;  %v3652_v30 = vld [vmem:[#allocation5 + $0x2e8] sm:$0xf]  ;;  %2648 = vmatpush.bf16.msrb.mxu0 %v3941_v17  ;;  %v4219_v17 = vld [vmem:[#allocation5 + $0x2a4] sm:$0xf] }
 0x265   : > { %v2370_v55 = vpop.f32.mrf.mxu2  ;;  %v3653_v45 = vor.u32 %v4232_v11, %v3652_v30 }
 0x266   : > { %v3012_v23 = vpack.c.bf16 %v2224_v58, %v5225_v5  ;;  %v5367_v6 = vadd.f32 %v2370_v55, %v2322_v40  ;;  %v2275_v26 = vpop.f32.mrf.mxu0  ;;  %v2324_v33 = vpop.f32.mrf.mxu1 }
 0x267   : > { %v2276_v8 = vadd.f32 %v2275_v26, %v5315_v57  ;;  %2599 = vmatpush.bf16.msrb.mxu3 %v3653_v45  ;;  %v4156_v26 = vld [vmem:[#allocation5 + $0xac] sm:$0xf] }
 0x268   : > { %3092 = vst [vmem:[%s5058_s23 + $0xbc] sm:$0xff] %v3012_v23  ;;  %2421 = vmatmul.bf16.gmra.mxu3 %v4837_v15 }
 0x269   : > { %v2325_v3 = vadd.f32 %v2324_v33, %v2276_v8  ;;  %2470 = vmatmul.bf16.gmra.mxu0 %v5890_v22  ;;  %2519 = vmatmul.bf16.gmra.mxu1 %v5891_v24  ;;  %v3366_v33 = vld [vmem:[#allocation5 + $0xcc] sm:$0xf0] }
 0x26a   : > { %2568 = vmatmul.bf16.gmra.mxu2 %v4837_v15 }
 0x26b   : > { %v2226_v5 = vpop.f32.mrf.mxu3 }
 0x26c   : > { %v2227_v28 = vadd.f32 %v2226_v5, %v5238_v46  ;;  %v3369_v46 = vor.u32 %v4156_v26, %v3366_v33 }
 0x26d   : > { %v2373_v40 = vpop.f32.mrf.mxu2 }
 0x26e   : > { %v3017_v41 = vpack.c.bf16 %v2227_v28, %v5236_v53  ;;  %v5377_v42 = vadd.f32 %v2373_v40, %v2325_v3  ;;  %v2277_v58 = vpop.f32.mrf.mxu0  ;;  %v2326_v55 = vpop.f32.mrf.mxu1  ;;  %2697 = vmatpush.bf16.msrb.mxu1 %v3369_v46  ;;  %v5893_v28 = vld [vmem:[#allocation17_spill] sm:$0xff] }
 0x26f   : > { %v2278_v23 = vadd.f32 %v2277_v58, %v5315_v57  ;;  %v3904_v58 = vld [vmem:[#allocation5 + $0x4e0] sm:$0xf] }
 0x270   : > { %3097 = vst [vmem:[%s5058_s23 + $0xe0] sm:$0xff] %v3017_v41  ;;  %v3618_v41 = vld [vmem:[#allocation5 + $0x2c4] sm:$0xf0] }
 0x271   : > { %v2327_v8 = vadd.f32 %v2326_v55, %v2278_v23  ;;  %v4295_v55 = vld [vmem:[#allocation5 + $0x500] sm:$0xf0]  ;;  %v3621_v26 = vor.u32 %v4219_v17, %v3618_v41 }
 0x272   : > { %v3905_v33 = vor.u32 %v4295_v55, %v3904_v58  ;;  %v5894_v55 = vld [vmem:[#allocation19_spill] sm:$0xff] }
 0x273   : > { %v2228_v30 = vpop.f32.mrf.mxu3  ;;  %2747 = vmatpush.bf16.msrb.mxu2 %v3621_v26  ;;  %v4214_v26 = vld [vmem:[#allocation5 + $0x278] sm:$0xf0] }
 0x274   : > { %v2229_v11 = vadd.f32 %v2228_v30, %v5245_v39  ;;  %v3616_v39 = vld [vmem:[#allocation5 + $0x2a0] sm:$0xf]  ;;  %2649 = vmatpush.bf16.msrb.mxu0 %v3905_v33  ;;  %v4210_v33 = vld [vmem:[#allocation5 + $0x25c] sm:$0xf] }
 0x275   : > { %v2375_v20 = vpop.f32.mrf.mxu2  ;;  %v3617_v40 = vor.u32 %v4223_v2, %v3616_v39 }
 0x276   : > { %v3022_v53 = vpack.c.bf16 %v2229_v11, %v5243_v19  ;;  %v5383_v3 = vadd.f32 %v2375_v20, %v2327_v8  ;;  %v2280_v5 = vpop.f32.mrf.mxu0  ;;  %v2329_v45 = vpop.f32.mrf.mxu1 }
 0x277   : > { %v2281_v62 = vadd.f32 %v2280_v5, %v5315_v57  ;;  %2600 = vmatpush.bf16.msrb.mxu3 %v3617_v40  ;;  %v4147_v5 = vld [vmem:[#allocation5 + $0x64] sm:$0xf] }
 0x278   : > { %3102 = vst [vmem:[%s5058_s23 + $0x104] sm:$0xff] %v3022_v53  ;;  %2426 = vmatmul.bf16.gmra.mxu3 %v4859_v51 }
 0x279   : > { %v2330_v49 = vadd.f32 %v2329_v45, %v2281_v62  ;;  %2475 = vmatmul.bf16.gmra.mxu0 %v5892_v27  ;;  %2524 = vmatmul.bf16.gmra.mxu1 %v5893_v28  ;;  %v3330_v45 = vld [vmem:[#allocation5 + $0x84] sm:$0xf0] }
 0x27a   : > { %2573 = vmatmul.bf16.gmra.mxu2 %v4859_v51 }
 0x27b   : > { %v2231_v19 = vpop.f32.mrf.mxu3 }
 0x27c   : > { %v2232_v23 = vadd.f32 %v2231_v19, %v5256_v60  ;;  %v3333_v60 = vor.u32 %v4147_v5, %v3330_v45 }
 0x27d   : > { %v2378_v8 = vpop.f32.mrf.mxu2 }
 0x27e   : > { %v3027_v46 = vpack.c.bf16 %v2232_v23, %v5254_v0  ;;  %v5393_v30 = vadd.f32 %v2378_v8, %v2330_v49  ;;  %v2282_v11 = vpop.f32.mrf.mxu0  ;;  %v2331_v20 = vpop.f32.mrf.mxu1  ;;  %2698 = vmatpush.bf16.msrb.mxu1 %v3333_v60  ;;  %v5895_v23 = vld [vmem:[#allocation20_spill] sm:$0xff] }
 0x27f   : > { %v2283_v53 = vadd.f32 %v2282_v11, %v5315_v57  ;;  %v3868_v11 = vld [vmem:[#allocation5 + $0x498] sm:$0xf] }
 0x280   : > { %3107 = vst [vmem:[%s5058_s23 + $0x128] sm:$0xff] %v3027_v46  ;;  %v3582_v46 = vld [vmem:[#allocation5 + $0x27c] sm:$0xf0] }
 0x281   : > { %v2332_v62 = vadd.f32 %v2331_v20, %v2283_v53  ;;  %v4286_v20 = vld [vmem:[#allocation5 + $0x4b8] sm:$0xf0]  ;;  %v3585_v5 = vor.u32 %v4210_v33, %v3582_v46 }
 0x282   : > { %v3869_v45 = vor.u32 %v4286_v20, %v3868_v11  ;;  %v5896_v20 = vld [vmem:[#allocation21_spill] sm:$0xff] }
 0x283   : > { %v2233_v39 = vpop.f32.mrf.mxu3  ;;  %2748 = vmatpush.bf16.msrb.mxu2 %v3585_v5  ;;  %v4122_v5 = vld [vmem:[#allocation5 + $0x6b4] sm:$0xf0] }
 0x284   : > { %v2234_v2 = vadd.f32 %v2233_v39, %v5263_v21  ;;  %v3580_v21 = vld [vmem:[#allocation5 + $0x258] sm:$0xf]  ;;  %2650 = vmatpush.bf16.msrb.mxu0 %v3869_v45 }
 0x285   : > { %v2380_v17 = vpop.f32.mrf.mxu2  ;;  %v3581_v8 = vor.u32 %v4214_v26, %v3580_v21  ;;  %v4128_v45 = vld [vmem:[#allocation5 + $0x698] sm:$0xf] }
 0x286   : > { %v3032_v0 = vpack.c.bf16 %v2234_v2, %v5261_v37  ;;  %v5399_v49 = vadd.f32 %v2380_v17, %v2332_v62  ;;  %v2285_v19 = vpop.f32.mrf.mxu0  ;;  %v2334_v40 = vpop.f32.mrf.mxu1 }
 0x287   : > { %v2286_v41 = vadd.f32 %v2285_v19, %v5315_v57  ;;  %2601 = vmatpush.bf16.msrb.mxu3 %v3581_v8  ;;  %v4138_v19 = vld [vmem:[#allocation5 + $0x1c] sm:$0xf] }
 0x288   : > { %3112 = vst [vmem:[%s5058_s23 + $0x14c] sm:$0xff] %v3032_v0  ;;  %2431 = vmatmul.bf16.gmra.mxu3 %v4884_v12 }
 0x289   : > { %v2335_v58 = vadd.f32 %v2334_v40, %v2286_v41  ;;  %2480 = vmatmul.bf16.gmra.mxu0 %v5894_v55  ;;  %2529 = vmatmul.bf16.gmra.mxu1 %v5895_v23  ;;  %v3294_v40 = vld [vmem:[#allocation5 + $0x3c] sm:$0xf0] }
 0x28a   : > { %2578 = vmatmul.bf16.gmra.mxu2 %v4884_v12 }
 0x28b   : > { %v2236_v37 = vpop.f32.mrf.mxu3 }
 0x28c   : > { %v2237_v53 = vadd.f32 %v2236_v37, %v5274_v44  ;;  %v3297_v44 = vor.u32 %v4138_v19, %v3294_v40 }
 0x28d   : > { %v2383_v62 = vpop.f32.mrf.mxu2 }
 0x28e   : > { %v3037_v60 = vpack.c.bf16 %v2237_v53, %v5272_v35  ;;  %v5409_v39 = vadd.f32 %v2383_v62, %v2335_v58  ;;  %v2287_v2 = vpop.f32.mrf.mxu0  ;;  %v2336_v17 = vpop.f32.mrf.mxu1  ;;  %2699 = vmatpush.bf16.msrb.mxu1 %v3297_v44  ;;  %v5897_v53 = vld [vmem:[#allocation22_spill] sm:$0xff] }
 0x28f   : > { %v2288_v0 = vadd.f32 %v2287_v2, %v5315_v57  ;;  %v3552_v2 = vld [vmem:[#allocation5 + $0x218] sm:$0xf] }
 0x290   : > { %3117 = vst [vmem:[%s5058_s23 + $0x170] sm:$0xff] %v3037_v60  ;;  %v4350_v60 = vld [vmem:[#allocation5 + $0x6b8] sm:$0xf0] }
 0x291   : > { %v2337_v41 = vadd.f32 %v2336_v17, %v2288_v0  ;;  %v4206_v17 = vld [vmem:[#allocation5 + $0x238] sm:$0xf0]  ;;  %v4129_v19 = vor.u32 %v4350_v60, %v4128_v45 }
 0x292   : > { %v3553_v40 = vor.u32 %v4206_v17, %v3552_v2  ;;  %v5898_v17 = vld [vmem:[#allocation23_spill] sm:$0xff] }
 0x293   : > { %v2238_v21 = vpop.f32.mrf.mxu3  ;;  %2937 = vmatpush.bf16.msra.mxu2 %v4129_v19  ;;  %v4336_v19 = vld [vmem:[#allocation5 + $0x64c] sm:$0xf] }
 0x294   : > { %v2239_v26 = vadd.f32 %v2238_v21, %v5281_v56  ;;  %v4345_v56 = vld [vmem:[#allocation5 + $0x694] sm:$0xf]  ;;  %2839 = vmatpush.bf16.msra.mxu0 %v3553_v40  ;;  %v4086_v40 = vld [vmem:[#allocation5 + $0x66c] sm:$0xf0] }
 0x295   : > { %v2385_v33 = vpop.f32.mrf.mxu2  ;;  %v4125_v62 = vor.u32 %v4345_v56, %v4122_v5  ;;  %v4278_v56 = vld [vmem:[#allocation5 + $0x478] sm:$0xf0] }
 0x296   : > { %v3042_v35 = vpack.c.bf16 %v2239_v26, %v5279_v43  ;;  %v5415_v58 = vadd.f32 %v2385_v33, %v2337_v41  ;;  %v2290_v37 = vpop.f32.mrf.mxu0  ;;  %v2339_v8 = vpop.f32.mrf.mxu1 }
 0x297   : > { %v2291_v46 = vadd.f32 %v2290_v37, %v5315_v57  ;;  %2790 = vmatpush.bf16.msra.mxu3 %v4125_v62 }
 0x298   : > { %3122 = vst [vmem:[%s5058_s23 + $0x194] sm:$0xff] %v3042_v35  ;;  %2436 = vmatmul.bf16.gmra.mxu3 %v4908_v48 }
 0x299   : > { %v2340_v11 = vadd.f32 %v2339_v8, %v2291_v46  ;;  %2485 = vmatmul.bf16.gmra.mxu0 %v5896_v20  ;;  %2534 = vmatmul.bf16.gmra.mxu1 %v5897_v53  ;;  %v3840_v46 = vld [vmem:[#allocation5 + $0x458] sm:$0xf] }
 0x29a   : > { %2583 = vmatmul.bf16.gmra.mxu2 %v4908_v48  ;;  %v3841_v45 = vor.u32 %v4278_v56, %v3840_v46 }
 0x29b   : > { %v2241_v43 = vpop.f32.mrf.mxu3 }
 0x29c   : > { %v2242_v0 = vadd.f32 %v2241_v43, %v5292_v63  ;;  %2888 = vmatpush.bf16.msra.mxu1 %v3841_v45 }
 0x29d   : > { %v2388_v41 = vpop.f32.mrf.mxu2 }
 0x29e   : > { %v3047_v44 = vpack.c.bf16 %v2242_v0, %v5290_v16  ;;  %v5425_v21 = vadd.f32 %v2388_v41, %v2340_v11  ;;  %v2292_v26 = vpop.f32.mrf.mxu0  ;;  %v2341_v33 = vpop.f32.mrf.mxu1  ;;  %v4092_v41 = vld [vmem:[#allocation5 + $0x650] sm:$0xf] }
 0x29f   : > { %v2293_v35 = vadd.f32 %v2292_v26, %v5315_v57  ;;  %v4089_v26 = vor.u32 %v4336_v19, %v4086_v40 }
 0x2a0   : > { %3127 = vst [vmem:[%s5058_s23 + $0x1b8] sm:$0xff] %v3047_v44 }
 0x2a1   : > { %v2342_v37 = vadd.f32 %v2341_v33, %v2293_v35  ;;  %v4341_v33 = vld [vmem:[#allocation5 + $0x670] sm:$0xf0]  ;;  %v3516_v35 = vld [vmem:[#allocation5 + $0x1d0] sm:$0xf]  ;;  %2791 = vmatpush.bf16.msra.mxu3 %v4089_v26  ;;  %v4327_v26 = vld [vmem:[#allocation5 + $0x604] sm:$0xf] }
 0x2a3   : > { %v2243_v8 = vpop.f32.mrf.mxu3 }
 0x2a4   : > { %v2244_v63 = vadd.f32 %v2243_v8, %v5299_v25  ;;  %v5899_v25 = vld [vmem:[#allocation25_spill] sm:$0xff] }
 0x2a5   : > { %v2390_v5 = vpop.f32.mrf.mxu2 }
 0x2a6   : > { %v3052_v16 = vpack.c.bf16 %v2244_v63, %v5297_v10  ;;  %v5431_v11 = vadd.f32 %v2390_v5, %v2342_v37  ;;  %v2295_v43 = vpop.f32.mrf.mxu0  ;;  %v2344_v62 = vpop.f32.mrf.mxu1  ;;  %v4197_v37 = vld [vmem:[#allocation5 + $0x1f0] sm:$0xf0]  ;;  %v4093_v5 = vor.u32 %v4341_v33, %v4092_v41  ;;  %v4050_v33 = vld [vmem:[#allocation5 + $0x624] sm:$0xf0] }
 0x2a7   : > { %v2296_v60 = vadd.f32 %v2295_v43, %v5315_v57  ;;  %v3517_v45 = vor.u32 %v4197_v37, %v3516_v35  ;;  %v4056_v35 = vld [vmem:[#allocation5 + $0x608] sm:$0xf] }
 0x2a8   : > { %3132 = vst [vmem:[%s5058_s23 + $0x1dc] sm:$0xff] %v3052_v16  ;;  %2441 = vmatmul.bf16.gmra.mxu3 %v4928_v34  ;;  %2938 = vmatpush.bf16.msra.mxu2 %v4093_v5  ;;  %v4188_v5 = vld [vmem:[#allocation5 + $0x1a8] sm:$0xf0] }
 0x2a9   : > { %v2345_v2 = vadd.f32 %v2344_v62, %v2296_v60  ;;  %2490 = vmatmul.bf16.gmra.mxu0 %v5898_v17  ;;  %2539 = vmatmul.bf16.gmra.mxu1 %v5899_v25  ;;  %v3804_v60 = vld [vmem:[#allocation5 + $0x410] sm:$0xf] }
 0x2aa   : > { %2588 = vmatmul.bf16.gmra.mxu2 %v4928_v34  ;;  %2840 = vmatpush.bf16.msra.mxu0 %v3517_v45 }
 0x2ab   : > { %v2246_v0 = vpop.f32.mrf.mxu3 }
 0x2ac   : > { %v2247_v10 = vadd.f32 %v2246_v0, %v5310_v9  ;;  %v4269_v0 = vld [vmem:[#allocation5 + $0x430] sm:$0xf0] }
 0x2ad   : > { %v2393_v44 = vpop.f32.mrf.mxu2 }
 0x2ae   : > { %v3057_v8 = vpack.c.bf16 %v2247_v10, %v5308_v13  ;;  %v5441_v63 = vadd.f32 %v2393_v44, %v2345_v2  ;;  %v2297_v46 = vpop.f32.mrf.mxu0  ;;  %v2346_v56 = vpop.f32.mrf.mxu1  ;;  %v3805_v2 = vor.u32 %v4269_v0, %v3804_v60 }
 0x2af   : > { %v2298_v16 = vadd.f32 %v2297_v46, %v5315_v57  ;;  %v5451_v57 = vld [vmem:[#allocation7] sm:$0xff]  ;;  %v4332_v46 = vld [vmem:[#allocation5 + $0x628] sm:$0xf0] }
 0x2b0   : > { %3137 = vst [vmem:[%s5058_s23 + $0x200] sm:$0xff] %v3057_v8  ;;  %2889 = vmatpush.bf16.msra.mxu1 %v3805_v2  ;;  %v5454_v44 = vperm.slane %v5451_v57, 5  ;;  %v4053_v8 = vor.u32 %v4327_v26, %v4050_v33 }
 0x2b1   : > { %v2347_v9 = vadd.f32 %v2346_v56, %v2298_v16  ;;  %v3480_v56 = vld [vmem:[#allocation5 + $0x188] sm:$0xf] }
 0x2b2   : > { %2792 = vmatpush.bf16.msra.mxu3 %v4053_v8 }
 0x2b3   : > { %v2248_v43 = vpop.f32.mrf.mxu3 }
 0x2b4   : > { %v2249_v62 = vadd.f32 %v2248_v43, %v5320_v50  ;;  %v4057_v43 = vor.u32 %v4332_v46, %v4056_v35 }
 0x2b5   : > { %v2395_v13 = vpop.f32.mrf.mxu2 }
 0x2b6   : > { %v3062_v10 = vpack.c.bf16 %v2249_v62, %v5318_v36  ;;  %v5447_v19 = vadd.f32 %v2395_v13, %v2347_v9  ;;  %v2456_v40 = vpop.f32.mrf.mxu0  ;;  %v2505_v41 = vpop.f32.mrf.mxu1  ;;  %v3481_v62 = vor.u32 %v4188_v5, %v3480_v56  ;;  %2939 = vmatpush.bf16.msra.mxu2 %v4057_v43  ;;  %v4318_v56 = vld [vmem:[#allocation5 + $0x5bc] sm:$0xf]  ;;  %v4014_v5 = vld [vmem:[#allocation5 + $0x5dc] sm:$0xf0]  ;;  %v4323_v43 = vld [vmem:[#allocation5 + $0x5e0] sm:$0xf0] }
 0x2b8   : > { %3142 = vst [vmem:[%s5058_s23 + $0x224] sm:$0xff] %v3062_v10  ;;  %2602 = vmatmul.bf16.vlgmr.msrb.gmra.mxu3 %v4861_v54  ;;  %2841 = vmatpush.bf16.msra.mxu0 %v3481_v62  ;;  %v3768_v10 = vld [vmem:[#allocation5 + $0x3c8] sm:$0xf]  ;;  %v3444_v62 = vld [vmem:[#allocation5 + $0x140] sm:$0xf] }
 0x2b9   : > { %2651 = vmatmul.bf16.vlgmr.msrb.gmra.mxu0 %v4912_v1  ;;  %2700 = vmatmul.bf16.vlgmr.msrb.gmra.mxu1 %v4810_v31 }
 0x2ba   : > { %2749 = vmatmul.bf16.vlgmr.msrb.gmra.mxu2 %v4861_v54 }
 0x2bb   : > { %v2407_v36 = vpop.f32.mrf.mxu3 }
 0x2bc   : > { %v2408_v50 = vadd.f32 %v2407_v36, %v5454_v44  ;;  %v4260_v36 = vld [vmem:[#allocation5 + $0x3e8] sm:$0xf0] }
 0x2bd   : > { %v5460_v37 = vpop.f32.mrf.mxu2 }
 0x2be   : > { %v2457_v45 = vadd.f32 %v2456_v40, %v2408_v50  ;;  %v2458_v16 = vpop.f32.mrf.mxu0  ;;  %v2507_v9 = vpop.f32.mrf.mxu1  ;;  %v3769_v40 = vor.u32 %v4260_v36, %v3768_v10 }
 0x2c0   : > { %v2506_v60 = vadd.f32 %v2505_v41, %v2457_v45  ;;  %2890 = vmatpush.bf16.msra.mxu1 %v3769_v40 }
 0x2c2   : > { %v2988_v0 = vpack.c.bf16 %v2506_v60, %v5329_v18 }
 0x2c3   : > { %v2409_v13 = vpop.f32.mrf.mxu3 }
 0x2c4   : > { %3068 = vst [vmem:[%s5058_s23 + $0x10] sm:$0xff] %v2988_v0  ;;  %v2410_v2 = vadd.f32 %v2409_v13, %v5454_v44 }
 0x2c5   : > { %v5465_v26 = vpop.f32.mrf.mxu2 }
 0x2c6   : > { %v2459_v50 = vadd.f32 %v2458_v16, %v2410_v2  ;;  %v2461_v33 = vpop.f32.mrf.mxu0  ;;  %v2510_v35 = vpop.f32.mrf.mxu1  ;;  %v4017_v16 = vor.u32 %v4318_v56, %v4014_v5 }
 0x2c8   : > { %v2508_v8 = vadd.f32 %v2507_v9, %v2459_v50  ;;  %2607 = vmatmul.bf16.gmra.mxu3 %v5886_v47  ;;  %v4020_v9 = vld [vmem:[#allocation5 + $0x5c0] sm:$0xf] }
 0x2c9   : > { %2656 = vmatmul.bf16.gmra.mxu0 %v5887_v38  ;;  %2705 = vmatmul.bf16.gmra.mxu1 %v4835_v14  ;;  %v4021_v2 = vor.u32 %v4323_v43, %v4020_v9 }
 0x2ca   : > { %v2993_v18 = vpack.c.bf16 %v2508_v8, %v5335_v7  ;;  %2754 = vmatmul.bf16.gmra.mxu2 %v5886_v47  ;;  %v4179_v7 = vld [vmem:[#allocation5 + $0x160] sm:$0xf0]  ;;  %2793 = vmatpush.bf16.msra.mxu3 %v4017_v16 }
 0x2cb   : > { %v2412_v41 = vpop.f32.mrf.mxu3  ;;  %v3445_v10 = vor.u32 %v4179_v7, %v3444_v62  ;;  %2940 = vmatpush.bf16.msra.mxu2 %v4021_v2  ;;  %v4309_v62 = vld [vmem:[#allocation5 + $0x574] sm:$0xf]  ;;  %v4314_v7 = vld [vmem:[#allocation5 + $0x598] sm:$0xf0] }
 0x2cc   : > { %3073 = vst [vmem:[%s5058_s23 + $0x34] sm:$0xff] %v2993_v18  ;;  %v2413_v46 = vadd.f32 %v2412_v41, %v5454_v44  ;;  %v3732_v18 = vld [vmem:[#allocation5 + $0x380] sm:$0xf]  ;;  %v4251_v41 = vld [vmem:[#allocation5 + $0x3a0] sm:$0xf0] }
 0x2cd   : > { %v5474_v45 = vpop.f32.mrf.mxu2  ;;  %2842 = vmatpush.bf16.msra.mxu0 %v3445_v10  ;;  %v3408_v10 = vld [vmem:[#allocation5 + $0xf8] sm:$0xf] }
 0x2ce   : > { %v2462_v60 = vadd.f32 %v2461_v33, %v2413_v46  ;;  %v2463_v0 = vpop.f32.mrf.mxu0  ;;  %v2512_v13 = vpop.f32.mrf.mxu1  ;;  %v3733_v33 = vor.u32 %v4251_v41, %v3732_v18 }
 0x2d0   : > { %v2511_v36 = vadd.f32 %v2510_v35, %v2462_v60  ;;  %2891 = vmatpush.bf16.msra.mxu1 %v3733_v33  ;;  %v3978_v60 = vld [vmem:[#allocation5 + $0x594] sm:$0xf0] }
 0x2d1   : > { %v3981_v2 = vor.u32 %v4309_v62, %v3978_v60 }
 0x2d2   : > { %v2998_v40 = vpack.c.bf16 %v2511_v36, %v5345_v29 }
 0x2d3   : > { %v2414_v50 = vpop.f32.mrf.mxu3  ;;  %2794 = vmatpush.bf16.msra.mxu3 %v3981_v2 }
 0x2d4   : > { %3078 = vst [vmem:[%s5058_s23 + $0x58] sm:$0xff] %v2998_v40  ;;  %v2415_v8 = vadd.f32 %v2414_v50, %v5454_v44 }
 0x2d5   : > { %v5479_v56 = vpop.f32.mrf.mxu2 }
 0x2d6   : > { %v2464_v46 = vadd.f32 %v2463_v0, %v2415_v8  ;;  %v2466_v5 = vpop.f32.mrf.mxu0  ;;  %v2515_v9 = vpop.f32.mrf.mxu1 }
 0x2d8   : > { %v2513_v16 = vadd.f32 %v2512_v13, %v2464_v46  ;;  %2612 = vmatmul.bf16.gmra.mxu3 %v5888_v59  ;;  %v3984_v13 = vld [vmem:[#allocation5 + $0x578] sm:$0xf] }
 0x2d9   : > { %2661 = vmatmul.bf16.gmra.mxu0 %v5889_v52  ;;  %2710 = vmatmul.bf16.gmra.mxu1 %v4812_v32  ;;  %v3985_v8 = vor.u32 %v4314_v7, %v3984_v13 }
 0x2da   : > { %v3003_v29 = vpack.c.bf16 %v2513_v16, %v5351_v4  ;;  %2759 = vmatmul.bf16.gmra.mxu2 %v5888_v59  ;;  %v4170_v4 = vld [vmem:[#allocation5 + $0x118] sm:$0xf0] }
 0x2db   : > { %v2417_v35 = vpop.f32.mrf.mxu3  ;;  %v3409_v18 = vor.u32 %v4170_v4, %v3408_v10  ;;  %2941 = vmatpush.bf16.msra.mxu2 %v3985_v8  ;;  %v4300_v10 = vld [vmem:[#allocation5 + $0x52c] sm:$0xf]  ;;  %v4305_v4 = vld [vmem:[#allocation5 + $0x550] sm:$0xf0] }
 0x2dc   : > { %3083 = vst [vmem:[%s5058_s23 + $0x7c] sm:$0xff] %v3003_v29  ;;  %v2418_v43 = vadd.f32 %v2417_v35, %v5454_v44  ;;  %v3696_v29 = vld [vmem:[#allocation5 + $0x338] sm:$0xf]  ;;  %v4242_v35 = vld [vmem:[#allocation5 + $0x358] sm:$0xf0] }
 0x2dd   : > { %v5488_v0 = vpop.f32.mrf.mxu2  ;;  %2843 = vmatpush.bf16.msra.mxu0 %v3409_v18  ;;  %v3372_v18 = vld [vmem:[#allocation5 + $0xb0] sm:$0xf] }
 0x2de   : > { %v2467_v36 = vadd.f32 %v2466_v5, %v2418_v43  ;;  %v2468_v40 = vpop.f32.mrf.mxu0  ;;  %v2517_v50 = vpop.f32.mrf.mxu1  ;;  %v3697_v5 = vor.u32 %v4242_v35, %v3696_v29 }
 0x2e0   : > { %v2516_v41 = vadd.f32 %v2515_v9, %v2467_v36  ;;  %2892 = vmatpush.bf16.msra.mxu1 %v3697_v5  ;;  %v3942_v36 = vld [vmem:[#allocation5 + $0x54c] sm:$0xf0] }
 0x2e1   : > { %v3945_v8 = vor.u32 %v4300_v10, %v3942_v36 }
 0x2e2   : > { %v3008_v33 = vpack.c.bf16 %v2516_v41, %v5361_v61 }
 0x2e3   : > { %v2419_v46 = vpop.f32.mrf.mxu3  ;;  %2795 = vmatpush.bf16.msra.mxu3 %v3945_v8 }
 0x2e4   : > { %3088 = vst [vmem:[%s5058_s23 + $0xa0] sm:$0xff] %v3008_v33  ;;  %v2420_v16 = vadd.f32 %v2419_v46, %v5454_v44 }
 0x2e5   : > { %v5493_v62 = vpop.f32.mrf.mxu2 }
 0x2e6   : > { %v2469_v43 = vadd.f32 %v2468_v40, %v2420_v16  ;;  %v2471_v60 = vpop.f32.mrf.mxu0  ;;  %v2520_v13 = vpop.f32.mrf.mxu1 }
 0x2e8   : > { %v2518_v2 = vadd.f32 %v2517_v50, %v2469_v43  ;;  %2617 = vmatmul.bf16.gmra.mxu3 %v5890_v22  ;;  %v3948_v50 = vld [vmem:[#allocation5 + $0x530] sm:$0xf] }
 0x2e9   : > { %2666 = vmatmul.bf16.gmra.mxu0 %v5891_v24  ;;  %2715 = vmatmul.bf16.gmra.mxu1 %v4837_v15  ;;  %v3949_v16 = vor.u32 %v4305_v4, %v3948_v50 }
 0x2ea   : > { %v3013_v61 = vpack.c.bf16 %v2518_v2, %v5367_v6  ;;  %2764 = vmatmul.bf16.gmra.mxu2 %v5890_v22  ;;  %v4161_v6 = vld [vmem:[#allocation5 + $0xd0] sm:$0xf0] }
 0x2eb   : > { %v2422_v9 = vpop.f32.mrf.mxu3  ;;  %v3373_v29 = vor.u32 %v4161_v6, %v3372_v18  ;;  %2942 = vmatpush.bf16.msra.mxu2 %v3949_v16  ;;  %v4291_v18 = vld [vmem:[#allocation5 + $0x4e4] sm:$0xf]  ;;  %v4296_v6 = vld [vmem:[#allocation5 + $0x508] sm:$0xf0] }
 0x2ec   : > { %3093 = vst [vmem:[%s5058_s23 + $0xc4] sm:$0xff] %v3013_v61  ;;  %v2423_v7 = vadd.f32 %v2422_v9, %v5454_v44  ;;  %v3660_v61 = vld [vmem:[#allocation5 + $0x2f0] sm:$0xf]  ;;  %v4233_v9 = vld [vmem:[#allocation5 + $0x310] sm:$0xf0] }
 0x2ed   : > { %v5502_v40 = vpop.f32.mrf.mxu2  ;;  %2844 = vmatpush.bf16.msra.mxu0 %v3373_v29  ;;  %v3336_v29 = vld [vmem:[#allocation5 + $0x68] sm:$0xf] }
 0x2ee   : > { %v2472_v41 = vadd.f32 %v2471_v60, %v2423_v7  ;;  %v2473_v33 = vpop.f32.mrf.mxu0  ;;  %v2522_v46 = vpop.f32.mrf.mxu1  ;;  %v3661_v60 = vor.u32 %v4233_v9, %v3660_v61 }
 0x2f0   : > { %v2521_v35 = vadd.f32 %v2520_v13, %v2472_v41  ;;  %2893 = vmatpush.bf16.msra.mxu1 %v3661_v60  ;;  %v3906_v41 = vld [vmem:[#allocation5 + $0x504] sm:$0xf0] }
 0x2f1   : > { %v3909_v16 = vor.u32 %v4291_v18, %v3906_v41 }
 0x2f2   : > { %v3018_v5 = vpack.c.bf16 %v2521_v35, %v5377_v42 }
 0x2f3   : > { %v2424_v43 = vpop.f32.mrf.mxu3  ;;  %2796 = vmatpush.bf16.msra.mxu3 %v3909_v16 }
 0x2f4   : > { %3098 = vst [vmem:[%s5058_s23 + $0xe8] sm:$0xff] %v3018_v5  ;;  %v2425_v2 = vadd.f32 %v2424_v43, %v5454_v44 }
 0x2f5   : > { %v5507_v10 = vpop.f32.mrf.mxu2 }
 0x2f6   : > { %v2474_v7 = vadd.f32 %v2473_v33, %v2425_v2  ;;  %v2476_v36 = vpop.f32.mrf.mxu0  ;;  %v2525_v50 = vpop.f32.mrf.mxu1 }
 0x2f8   : > { %v2523_v8 = vadd.f32 %v2522_v46, %v2474_v7  ;;  %2622 = vmatmul.bf16.gmra.mxu3 %v5892_v27  ;;  %v3912_v46 = vld [vmem:[#allocation5 + $0x4e8] sm:$0xf] }
 0x2f9   : > { %2671 = vmatmul.bf16.gmra.mxu0 %v5893_v28  ;;  %2720 = vmatmul.bf16.gmra.mxu1 %v4859_v51  ;;  %v3913_v2 = vor.u32 %v4296_v6, %v3912_v46 }
 0x2fa   : > { %v3023_v42 = vpack.c.bf16 %v2523_v8, %v5383_v3  ;;  %2769 = vmatmul.bf16.gmra.mxu2 %v5892_v27  ;;  %v4152_v3 = vld [vmem:[#allocation5 + $0x88] sm:$0xf0] }
 0x2fb   : > { %v2427_v13 = vpop.f32.mrf.mxu3  ;;  %v3337_v61 = vor.u32 %v4152_v3, %v3336_v29  ;;  %2943 = vmatpush.bf16.msra.mxu2 %v3913_v2  ;;  %v4282_v29 = vld [vmem:[#allocation5 + $0x49c] sm:$0xf]  ;;  %v4287_v3 = vld [vmem:[#allocation5 + $0x4c0] sm:$0xf0] }
 0x2fc   : > { %3103 = vst [vmem:[%s5058_s23 + $0x10c] sm:$0xff] %v3023_v42  ;;  %v2428_v4 = vadd.f32 %v2427_v13, %v5454_v44  ;;  %v3624_v42 = vld [vmem:[#allocation5 + $0x2a8] sm:$0xf]  ;;  %v4224_v13 = vld [vmem:[#allocation5 + $0x2c8] sm:$0xf0] }
 0x2fd   : > { %v5516_v33 = vpop.f32.mrf.mxu2  ;;  %2845 = vmatpush.bf16.msra.mxu0 %v3337_v61  ;;  %v3300_v61 = vld [vmem:[#allocation5 + $0x20] sm:$0xf] }
 0x2fe   : > { %v2477_v35 = vadd.f32 %v2476_v36, %v2428_v4  ;;  %v2478_v5 = vpop.f32.mrf.mxu0  ;;  %v2527_v43 = vpop.f32.mrf.mxu1  ;;  %v3625_v36 = vor.u32 %v4224_v13, %v3624_v42 }
 0x300   : > { %v2526_v9 = vadd.f32 %v2525_v50, %v2477_v35  ;;  %2894 = vmatpush.bf16.msra.mxu1 %v3625_v36  ;;  %v3870_v35 = vld [vmem:[#allocation5 + $0x4bc] sm:$0xf0] }
 0x301   : > { %v3873_v2 = vor.u32 %v4282_v29, %v3870_v35 }
 0x302   : > { %v3028_v60 = vpack.c.bf16 %v2526_v9, %v5393_v30 }
 0x303   : > { %v2429_v7 = vpop.f32.mrf.mxu3  ;;  %2797 = vmatpush.bf16.msra.mxu3 %v3873_v2 }
 0x304   : > { %3108 = vst [vmem:[%s5058_s23 + $0x130] sm:$0xff] %v3028_v60  ;;  %v2430_v8 = vadd.f32 %v2429_v7, %v5454_v44 }
 0x305   : > { %v5521_v18 = vpop.f32.mrf.mxu2 }
 0x306   : > { %v2479_v4 = vadd.f32 %v2478_v5, %v2430_v8  ;;  %v2481_v41 = vpop.f32.mrf.mxu0  ;;  %v2530_v46 = vpop.f32.mrf.mxu1 }
 0x308   : > { %v2528_v16 = vadd.f32 %v2527_v43, %v2479_v4  ;;  %2627 = vmatmul.bf16.gmra.mxu3 %v5894_v55  ;;  %v3876_v43 = vld [vmem:[#allocation5 + $0x4a0] sm:$0xf] }
 0x309   : > { %2676 = vmatmul.bf16.gmra.mxu0 %v5895_v23  ;;  %2725 = vmatmul.bf16.gmra.mxu1 %v4884_v12  ;;  %v3877_v8 = vor.u32 %v4287_v3, %v3876_v43 }
 0x30a   : > { %v3033_v30 = vpack.c.bf16 %v2528_v16, %v5399_v49  ;;  %2774 = vmatmul.bf16.gmra.mxu2 %v5894_v55  ;;  %v4143_v49 = vld [vmem:[#allocation5 + $0x40] sm:$0xf0] }
 0x30b   : > { %v2432_v50 = vpop.f32.mrf.mxu3  ;;  %v3301_v42 = vor.u32 %v4143_v49, %v3300_v61  ;;  %2944 = vmatpush.bf16.msra.mxu2 %v3877_v8 }
 0x30c   : > { %3113 = vst [vmem:[%s5058_s23 + $0x154] sm:$0xff] %v3033_v30  ;;  %v2433_v6 = vadd.f32 %v2432_v50, %v5454_v44  ;;  %v3588_v30 = vld [vmem:[#allocation5 + $0x260] sm:$0xf]  ;;  %v4215_v50 = vld [vmem:[#allocation5 + $0x280] sm:$0xf0] }
 0x30d   : > { %v5530_v5 = vpop.f32.mrf.mxu2  ;;  %2846 = vmatpush.bf16.msra.mxu0 %v3301_v42 }
 0x30e   : > { %v2482_v9 = vadd.f32 %v2481_v41, %v2433_v6  ;;  %v2483_v60 = vpop.f32.mrf.mxu0  ;;  %v2532_v7 = vpop.f32.mrf.mxu1  ;;  %v3589_v41 = vor.u32 %v4215_v50, %v3588_v30 }
 0x310   : > { %v2531_v13 = vadd.f32 %v2530_v46, %v2482_v9  ;;  %2895 = vmatpush.bf16.msra.mxu1 %v3589_v41 }
 0x312   : > { %v3038_v36 = vpack.c.bf16 %v2531_v13, %v5409_v39 }
 0x313   : > { %v2434_v4 = vpop.f32.mrf.mxu3 }
 0x314   : > { %3118 = vst [vmem:[%s5058_s23 + $0x178] sm:$0xff] %v3038_v36  ;;  %v2435_v16 = vadd.f32 %v2434_v4, %v5454_v44 }
 0x315   : > { %v5535_v29 = vpop.f32.mrf.mxu2 }
 0x316   : > { %v2484_v6 = vadd.f32 %v2483_v60, %v2435_v16  ;;  %v2486_v35 = vpop.f32.mrf.mxu0  ;;  %v2535_v43 = vpop.f32.mrf.mxu1 }
 0x318   : > { %v2533_v2 = vadd.f32 %v2532_v7, %v2484_v6  ;;  %2632 = vmatmul.bf16.gmra.mxu3 %v5896_v20 }
 0x319   : > { %2681 = vmatmul.bf16.gmra.mxu0 %v5897_v53  ;;  %2730 = vmatmul.bf16.gmra.mxu1 %v4908_v48 }
 0x31a   : > { %v3043_v39 = vpack.c.bf16 %v2533_v2, %v5415_v58  ;;  %2779 = vmatmul.bf16.gmra.mxu2 %v5896_v20 }
 0x31b   : > { %v2437_v46 = vpop.f32.mrf.mxu3 }
 0x31c   : > { %3123 = vst [vmem:[%s5058_s23 + $0x19c] sm:$0xff] %v3043_v39  ;;  %v2438_v3 = vadd.f32 %v2437_v46, %v5454_v44 }
 0x31d   : > { %v5544_v61 = vpop.f32.mrf.mxu2 }
 0x31e   : > { %v2487_v9 = vadd.f32 %v2486_v35, %v2438_v3  ;;  %v2488_v60 = vpop.f32.mrf.mxu0  ;;  %v2537_v7 = vpop.f32.mrf.mxu1 }
 0x320   : > { %v2536_v8 = vadd.f32 %v2535_v43, %v2487_v9 }
 0x322   : > { %v3048_v49 = vpack.c.bf16 %v2536_v8, %v5425_v21 }
 0x323   : > { %v2439_v42 = vpop.f32.mrf.mxu3 }
 0x324   : > { %3128 = vst [vmem:[%s5058_s23 + $0x1c0] sm:$0xff] %v3048_v49  ;;  %v2440_v13 = vadd.f32 %v2439_v42, %v5454_v44  ;;  %v5569_v49 = vperm.slane %v5451_v57, 7 }
 0x325   : > { %v5549_v58 = vpop.f32.mrf.mxu2 }
 0x326   : > { %v2489_v36 = vadd.f32 %v2488_v60, %v2440_v13  ;;  %v2491_v4 = vpop.f32.mrf.mxu0  ;;  %v2540_v16 = vpop.f32.mrf.mxu1  ;;  %v5566_v60 = vperm.slane %v5451_v57, 6 }
 0x328   : > { %v2538_v30 = vadd.f32 %v2537_v7, %v2489_v36  ;;  %2637 = vmatmul.bf16.gmra.mxu3 %v5898_v17 }
 0x329   : > { %2686 = vmatmul.bf16.gmra.mxu0 %v5899_v25  ;;  %2735 = vmatmul.bf16.gmra.mxu1 %v4928_v34 }
 0x32a   : > { %v3053_v50 = vpack.c.bf16 %v2538_v30, %v5431_v11  ;;  %2784 = vmatmul.bf16.gmra.mxu2 %v5898_v17 }
 0x32b   : > { %v2442_v21 = vpop.f32.mrf.mxu3 }
 0x32c   : > { %3133 = vst [vmem:[%s5058_s23 + $0x1e4] sm:$0xff] %v3053_v50  ;;  %v2443_v41 = vadd.f32 %v2442_v21, %v5454_v44 }
 0x32d   : > { %v5558_v6 = vpop.f32.mrf.mxu2 }
 0x32e   : > { %v2492_v35 = vadd.f32 %v2491_v4, %v2443_v41  ;;  %v2493_v43 = vpop.f32.mrf.mxu0  ;;  %v2542_v2 = vpop.f32.mrf.mxu1 }
 0x330   : > { %v2541_v39 = vadd.f32 %v2540_v16, %v2492_v35 }
 0x332   : > { %v3058_v46 = vpack.c.bf16 %v2541_v39, %v5441_v63  ;;  %v2555_v63 = vadd.f32 %v5460_v37, %v5566_v60 }
 0x333   : > { %v2444_v3 = vpop.f32.mrf.mxu3 }
 0x334   : > { %3138 = vst [vmem:[%s5058_s23 + $0x208] sm:$0xff] %v3058_v46  ;;  %v2445_v9 = vadd.f32 %v2444_v3, %v5454_v44 }
 0x335   : > { %v5563_v11 = vpop.f32.mrf.mxu2 }
 0x336   : > { %v2494_v7 = vadd.f32 %v2493_v43, %v2445_v9  ;;  %v2652_v8 = vpop.f32.mrf.mxu0  ;;  %v2701_v42 = vpop.f32.mrf.mxu1 }
 0x337   : > { %v2702_v36 = vadd.f32 %v2701_v42, %v5569_v49 }
 0x338   : > { %v2543_v13 = vadd.f32 %v2542_v2, %v2494_v7  ;;  %2798 = vmatmul.bf16.vlgmr.msra.gmra.mxu3 %v4912_v1 }
 0x339   : > { %2847 = vmatmul.bf16.vlgmr.msra.gmra.mxu0 %v4810_v31  ;;  %2896 = vmatmul.bf16.vlgmr.msra.gmra.mxu1 %v4861_v54  ;;  %v2557_v54 = vadd.f32 %v5465_v26, %v5566_v60  ;;  %v2560_v26 = vadd.f32 %v5474_v45, %v5566_v60 }
 0x33a   : > { %v3063_v44 = vpack.c.bf16 %v2543_v13, %v5447_v19  ;;  %2945 = vmatmul.bf16.vlgmr.msra.gmra.mxu2 %v4912_v1 }
 0x33b   : > { %v2603_v4 = vpop.f32.mrf.mxu3 }
 0x33c   : > { %3143 = vst [vmem:[%s5058_s23 + $0x22c] sm:$0xff] %v3063_v44  ;;  %v2604_v57 = vadd.f32 %v2603_v4, %v2555_v63 }
 0x33d   : > { %v2750_v16 = vpop.f32.mrf.mxu2 }
 0x33e   : > { %v5580_v30 = vadd.f32 %v2652_v8, %v2604_v57  ;;  %v5582_v50 = vadd.f32 %v2750_v16, %v2702_v36  ;;  %v2654_v31 = vpop.f32.mrf.mxu0  ;;  %v2703_v21 = vpop.f32.mrf.mxu1 }
 0x33f   : > { %v2704_v19 = vadd.f32 %v2703_v21, %v5569_v49 }
 0x343   : > { %v2605_v37 = vpop.f32.mrf.mxu3 }
 0x344   : > { %v2606_v41 = vadd.f32 %v2605_v37, %v2557_v54 }
 0x345   : > { %v2752_v35 = vpop.f32.mrf.mxu2 }
 0x346   : > { %v5587_v43 = vadd.f32 %v2654_v31, %v2606_v41  ;;  %v5589_v1 = vadd.f32 %v2752_v35, %v2704_v19  ;;  %v2657_v2 = vpop.f32.mrf.mxu0  ;;  %v2706_v39 = vpop.f32.mrf.mxu1 }
 0x347   : > { %v2707_v46 = vadd.f32 %v2706_v39, %v5569_v49 }
 0x348   : > { %2803 = vmatmul.bf16.gmra.mxu3 %v5887_v38 }
 0x349   : > { %2852 = vmatmul.bf16.gmra.mxu0 %v4835_v14  ;;  %2901 = vmatmul.bf16.gmra.mxu1 %v5886_v47  ;;  %v2562_v14 = vadd.f32 %v5479_v56, %v5566_v60  ;;  %v2565_v56 = vadd.f32 %v5488_v0, %v5566_v60 }
 0x34a   : > { %2950 = vmatmul.bf16.gmra.mxu2 %v5887_v38 }
 0x34b   : > { %v2608_v3 = vpop.f32.mrf.mxu3 }
 0x34c   : > { %v2609_v9 = vadd.f32 %v2608_v3, %v2560_v26 }
 0x34d   : > { %v2755_v7 = vpop.f32.mrf.mxu2 }
 0x34e   : > { %v5598_v8 = vadd.f32 %v2657_v2, %v2609_v9  ;;  %v5600_v42 = vadd.f32 %v2755_v7, %v2707_v46  ;;  %v2659_v13 = vpop.f32.mrf.mxu0  ;;  %v2708_v63 = vpop.f32.mrf.mxu1 }
 0x34f   : > { %v2709_v44 = vadd.f32 %v2708_v63, %v5569_v49 }
 0x353   : > { %v2610_v47 = vpop.f32.mrf.mxu3 }
 0x354   : > { %v2611_v45 = vadd.f32 %v2610_v47, %v2562_v14 }
 0x355   : > { %v2757_v36 = vpop.f32.mrf.mxu2 }
 0x356   : > { %v5605_v4 = vadd.f32 %v2659_v13, %v2611_v45  ;;  %v5607_v38 = vadd.f32 %v2757_v36, %v2709_v44  ;;  %v2662_v57 = vpop.f32.mrf.mxu0  ;;  %v2711_v16 = vpop.f32.mrf.mxu1 }
 0x357   : > { %v2712_v31 = vadd.f32 %v2711_v16, %v5569_v49 }
 0x358   : > { %2808 = vmatmul.bf16.gmra.mxu3 %v5889_v52 }
 0x359   : > { %2857 = vmatmul.bf16.gmra.mxu0 %v4812_v32  ;;  %2906 = vmatmul.bf16.gmra.mxu1 %v5888_v59  ;;  %v2567_v32 = vadd.f32 %v5493_v62, %v5566_v60  ;;  %v2570_v62 = vadd.f32 %v5502_v40, %v5566_v60 }
 0x35a   : > { %2955 = vmatmul.bf16.gmra.mxu2 %v5889_v52 }
 0x35b   : > { %v2613_v21 = vpop.f32.mrf.mxu3 }
 0x35c   : > { %v2614_v54 = vadd.f32 %v2613_v21, %v2565_v56 }
 0x35d   : > { %v2760_v37 = vpop.f32.mrf.mxu2 }
 0x35e   : > { %v5616_v19 = vadd.f32 %v2662_v57, %v2614_v54  ;;  %v5618_v41 = vadd.f32 %v2760_v37, %v2712_v31  ;;  %v2664_v35 = vpop.f32.mrf.mxu0  ;;  %v2713_v2 = vpop.f32.mrf.mxu1 }
 0x35f   : > { %v2714_v39 = vadd.f32 %v2713_v2, %v5569_v49 }
 0x363   : > { %v2615_v59 = vpop.f32.mrf.mxu3 }
 0x364   : > { %v2616_v0 = vadd.f32 %v2615_v59, %v2567_v32 }
 0x365   : > { %v2762_v26 = vpop.f32.mrf.mxu2 }
 0x366   : > { %v5623_v46 = vadd.f32 %v2664_v35, %v2616_v0  ;;  %v5625_v52 = vadd.f32 %v2762_v26, %v2714_v39  ;;  %v2667_v3 = vpop.f32.mrf.mxu0  ;;  %v2716_v9 = vpop.f32.mrf.mxu1 }
 0x367   : > { %v2717_v7 = vadd.f32 %v2716_v9, %v5569_v49 }
 0x368   : > { %2813 = vmatmul.bf16.gmra.mxu3 %v5891_v24 }
 0x369   : > { %2862 = vmatmul.bf16.gmra.mxu0 %v4837_v15  ;;  %2911 = vmatmul.bf16.gmra.mxu1 %v5890_v22  ;;  %v2572_v15 = vadd.f32 %v5507_v10, %v5566_v60  ;;  %v2575_v10 = vadd.f32 %v5516_v33, %v5566_v60 }
 0x36a   : > { %2960 = vmatmul.bf16.gmra.mxu2 %v5891_v24 }
 0x36b   : > { %v2618_v13 = vpop.f32.mrf.mxu3 }
 0x36c   : > { %v2619_v63 = vadd.f32 %v2618_v13, %v2570_v62 }
 0x36d   : > { %v2765_v14 = vpop.f32.mrf.mxu2 }
 0x36e   : > { %v5634_v47 = vadd.f32 %v2667_v3, %v2619_v63  ;;  %v5636_v44 = vadd.f32 %v2765_v14, %v2717_v7  ;;  %v2669_v45 = vpop.f32.mrf.mxu0  ;;  %v2718_v36 = vpop.f32.mrf.mxu1 }
 0x36f   : > { %v2719_v57 = vadd.f32 %v2718_v36, %v5569_v49 }
 0x373   : > { %v2620_v22 = vpop.f32.mrf.mxu3 }
 0x374   : > { %v2621_v40 = vadd.f32 %v2620_v22, %v2572_v15 }
 0x375   : > { %v2767_v16 = vpop.f32.mrf.mxu2 }
 0x376   : > { %v5641_v56 = vadd.f32 %v2669_v45, %v2621_v40  ;;  %v5643_v24 = vadd.f32 %v2767_v16, %v2719_v57  ;;  %v2672_v31 = vpop.f32.mrf.mxu0  ;;  %v2721_v21 = vpop.f32.mrf.mxu1 }
 0x377   : > { %v2722_v54 = vadd.f32 %v2721_v21, %v5569_v49 }
 0x378   : > { %2818 = vmatmul.bf16.gmra.mxu3 %v5893_v28 }
 0x379   : > { %2867 = vmatmul.bf16.gmra.mxu0 %v4859_v51  ;;  %2916 = vmatmul.bf16.gmra.mxu1 %v5892_v27  ;;  %v2577_v51 = vadd.f32 %v5521_v18, %v5566_v60  ;;  %v2580_v18 = vadd.f32 %v5530_v5, %v5566_v60 }
 0x37a   : > { %2965 = vmatmul.bf16.gmra.mxu2 %v5893_v28 }
 0x37b   : > { %v2623_v37 = vpop.f32.mrf.mxu3 }
 0x37c   : > { %v2624_v35 = vadd.f32 %v2623_v37, %v2575_v10 }
 0x37d   : > { %v2770_v2 = vpop.f32.mrf.mxu2 }
 0x37e   : > { %v5652_v32 = vadd.f32 %v2672_v31, %v2624_v35  ;;  %v5654_v59 = vadd.f32 %v2770_v2, %v2722_v54  ;;  %v2674_v39 = vpop.f32.mrf.mxu0  ;;  %v2723_v0 = vpop.f32.mrf.mxu1 }
 0x37f   : > { %v2724_v26 = vadd.f32 %v2723_v0, %v5569_v49 }
 0x383   : > { %v2625_v27 = vpop.f32.mrf.mxu3 }
 0x384   : > { %v2626_v33 = vadd.f32 %v2625_v27, %v2577_v51 }
 0x385   : > { %v2772_v3 = vpop.f32.mrf.mxu2 }
 0x386   : > { %v5659_v9 = vadd.f32 %v2674_v39, %v2626_v33  ;;  %v5661_v28 = vadd.f32 %v2772_v3, %v2724_v26  ;;  %v2677_v62 = vpop.f32.mrf.mxu0  ;;  %v2726_v7 = vpop.f32.mrf.mxu1 }
 0x387   : > { %v2727_v13 = vadd.f32 %v2726_v7, %v5569_v49 }
 0x388   : > { %2823 = vmatmul.bf16.gmra.mxu3 %v5895_v23 }
 0x389   : > { %2872 = vmatmul.bf16.gmra.mxu0 %v4884_v12  ;;  %2921 = vmatmul.bf16.gmra.mxu1 %v5894_v55  ;;  %v2582_v12 = vadd.f32 %v5535_v29, %v5566_v60  ;;  %v2585_v29 = vadd.f32 %v5544_v61, %v5566_v60 }
 0x38a   : > { %2970 = vmatmul.bf16.gmra.mxu2 %v5895_v23 }
 0x38b   : > { %v2628_v63 = vpop.f32.mrf.mxu3 }
 0x38c   : > { %v2629_v14 = vadd.f32 %v2628_v63, %v2580_v18 }
 0x38d   : > { %v2775_v45 = vpop.f32.mrf.mxu2 }
 0x38e   : > { %v5670_v36 = vadd.f32 %v2677_v62, %v2629_v14  ;;  %v5672_v15 = vadd.f32 %v2775_v45, %v2727_v13  ;;  %v2679_v22 = vpop.f32.mrf.mxu0  ;;  %v2728_v57 = vpop.f32.mrf.mxu1 }
 0x38f   : > { %v2729_v40 = vadd.f32 %v2728_v57, %v5569_v49 }
 0x393   : > { %v2630_v55 = vpop.f32.mrf.mxu3 }
 0x394   : > { %v2631_v5 = vadd.f32 %v2630_v55, %v2582_v12  ;;  %v5712_v55 = vld [vmem:[#allocation7 + $0x8] ss:$0 sm:$0xff] }
 0x395   : > { %v2777_v16 = vpop.f32.mrf.mxu2 }
 0x396   : > { %v5677_v31 = vadd.f32 %v2679_v22, %v2631_v5  ;;  %v5679_v23 = vadd.f32 %v2777_v16, %v2729_v40  ;;  %v2682_v21 = vpop.f32.mrf.mxu0  ;;  %v2731_v10 = vpop.f32.mrf.mxu1 }
 0x397   : > { %v2732_v54 = vadd.f32 %v2731_v10, %v5569_v49 }
 0x398   : > { %2828 = vmatmul.bf16.gmra.mxu3 %v5897_v53 }
 0x399   : > { %2877 = vmatmul.bf16.gmra.mxu0 %v4908_v48  ;;  %2926 = vmatmul.bf16.gmra.mxu1 %v5896_v20  ;;  %v2587_v48 = vadd.f32 %v5549_v58, %v5566_v60  ;;  %v2590_v58 = vadd.f32 %v5558_v6, %v5566_v60 }
 0x39a   : > { %2975 = vmatmul.bf16.gmra.mxu2 %v5897_v53 }
 0x39b   : > { %v2633_v37 = vpop.f32.mrf.mxu3 }
 0x39c   : > { %v2634_v35 = vadd.f32 %v2633_v37, %v2585_v29 }
 0x39d   : > { %v2780_v2 = vpop.f32.mrf.mxu2 }
 0x39e   : > { %v5688_v39 = vadd.f32 %v2682_v21, %v2634_v35  ;;  %v5690_v0 = vadd.f32 %v2780_v2, %v2732_v54  ;;  %v2684_v51 = vpop.f32.mrf.mxu0  ;;  %v2733_v27 = vpop.f32.mrf.mxu1 }
 0x39f   : > { %v2734_v26 = vadd.f32 %v2733_v27, %v5569_v49 }
 0x3a3   : > { %v2635_v20 = vpop.f32.mrf.mxu3 }
 0x3a4   : > { %v2636_v61 = vadd.f32 %v2635_v20, %v2587_v48 }
 0x3a5   : > { %v2782_v33 = vpop.f32.mrf.mxu2 }
 0x3a6   : > { %v5695_v3 = vadd.f32 %v2684_v51, %v2636_v61  ;;  %v5697_v53 = vadd.f32 %v2782_v33, %v2734_v26  ;;  %v2687_v62 = vpop.f32.mrf.mxu0  ;;  %v2736_v7 = vpop.f32.mrf.mxu1 }
 0x3a7   : > { %v2737_v18 = vadd.f32 %v2736_v7, %v5569_v49 }
 0x3a8   : > { %2833 = vmatmul.bf16.gmra.mxu3 %v5899_v25 }
 0x3a9   : > { %2882 = vmatmul.bf16.gmra.mxu0 %v4928_v34  ;;  %2931 = vmatmul.bf16.gmra.mxu1 %v5898_v17  ;;  %v2592_v34 = vadd.f32 %v5563_v11, %v5566_v60 }
 0x3aa   : > { %2980 = vmatmul.bf16.gmra.mxu2 %v5899_v25 }
 0x3ab   : > { %v2638_v13 = vpop.f32.mrf.mxu3 }
 0x3ac   : > { %v2639_v63 = vadd.f32 %v2638_v13, %v2590_v58 }
 0x3ad   : > { %v2785_v14 = vpop.f32.mrf.mxu2 }
 0x3ae   : > { %v5706_v45 = vadd.f32 %v2687_v62, %v2639_v63  ;;  %v5708_v22 = vadd.f32 %v2785_v14, %v2737_v18  ;;  %v2689_v57 = vpop.f32.mrf.mxu0  ;;  %v2738_v12 = vpop.f32.mrf.mxu1 }
 0x3af   : > { %v2739_v6 = vadd.f32 %v2738_v12, %v5569_v49 }
 0x3b3   : > { %v2640_v17 = vpop.f32.mrf.mxu3 }
 0x3b4   : > { %v2641_v40 = vadd.f32 %v2640_v17, %v2592_v34 }
 0x3b5   : > { %v2787_v25 = vpop.f32.mrf.mxu2 }
 0x3b6   : > { %v5715_v5 = vadd.f32 %v2689_v57, %v2641_v40  ;;  %v5717_v16 = vadd.f32 %v2787_v25, %v2739_v6  ;;  %v2848_v21 = vpop.f32.mrf.mxu0  ;;  %v2897_v10 = vpop.f32.mrf.mxu1 }
 0x3b7   : > { %v2849_v29 = vadd.f32 %v5712_v55, %v2848_v21 }
 0x3b9   : > { %v2898_v54 = vadd.f32 %v2897_v10, %v2849_v29 }
 0x3bb   : > { %v2799_v37 = vpop.f32.mrf.mxu3 }
 0x3bc   : > { %v2800_v11 = vadd.f32 %v2799_v37, %v5582_v50 }
 0x3bd   : > { %v2946_v60 = vpop.f32.mrf.mxu2 }
 0x3be   : > { %v2989_v35 = vpack.c.bf16 %v2800_v11, %v5580_v30  ;;  %v2947_v49 = vadd.f32 %v2946_v60, %v2898_v54  ;;  %v2850_v2 = vpop.f32.mrf.mxu0  ;;  %v2899_v51 = vpop.f32.mrf.mxu1 }
 0x3bf   : > { %v2851_v48 = vadd.f32 %v5712_v55, %v2850_v2 }
 0x3c0   : > { %3069 = vst [vmem:[%s5058_s23 + $0x18] sm:$0xff] %v2989_v35  ;;  %v2990_v27 = vpack.c.bf16 %v2947_v49, %v2947_v49 }
 0x3c1   : > { %v2900_v26 = vadd.f32 %v2899_v51, %v2851_v48 }
 0x3c2   : > { %3070 = vst [vmem:[%s5058_s23 + $0x20] sm:$0xf] %v2990_v27 }
 0x3c3   : > { %v2801_v20 = vpop.f32.mrf.mxu3 }
 0x3c4   : > { %v2802_v61 = vadd.f32 %v2801_v20, %v5589_v1 }
 0x3c5   : > { %v2948_v33 = vpop.f32.mrf.mxu2 }
 0x3c6   : > { %v2994_v50 = vpack.c.bf16 %v2802_v61, %v5587_v43  ;;  %v2949_v62 = vadd.f32 %v2948_v33, %v2900_v26  ;;  %v2853_v30 = vpop.f32.mrf.mxu0  ;;  %v2902_v7 = vpop.f32.mrf.mxu1 }
 0x3c7   : > { %v2854_v58 = vadd.f32 %v5712_v55, %v2853_v30 }
 0x3c8   : > { %3074 = vst [vmem:[%s5058_s23 + $0x3c] sm:$0xff] %v2994_v50  ;;  %v2995_v18 = vpack.c.bf16 %v2949_v62, %v2949_v62 }
 0x3c9   : > { %v2903_v13 = vadd.f32 %v2902_v7, %v2854_v58 }
 0x3ca   : > { %3075 = vst [vmem:[%s5058_s23 + $0x44] sm:$0xf] %v2995_v18 }
 0x3cb   : > { %v2804_v63 = vpop.f32.mrf.mxu3 }
 0x3cc   : > { %v2805_v14 = vadd.f32 %v2804_v63, %v5600_v42 }
 0x3cd   : > { %v2951_v57 = vpop.f32.mrf.mxu2 }
 0x3ce   : > { %v2999_v1 = vpack.c.bf16 %v2805_v14, %v5598_v8  ;;  %v2952_v12 = vadd.f32 %v2951_v57, %v2903_v13  ;;  %v2855_v43 = vpop.f32.mrf.mxu0  ;;  %v2904_v34 = vpop.f32.mrf.mxu1 }
 0x3cf   : > { %v2856_v6 = vadd.f32 %v5712_v55, %v2855_v43 }
 0x3d0   : > { %3079 = vst [vmem:[%s5058_s23 + $0x60] sm:$0xff] %v2999_v1  ;;  %v3000_v17 = vpack.c.bf16 %v2952_v12, %v2952_v12 }
 0x3d1   : > { %v2905_v25 = vadd.f32 %v2904_v34, %v2856_v6 }
 0x3d2   : > { %3080 = vst [vmem:[%s5058_s23 + $0x68] sm:$0xf] %v3000_v17 }
 0x3d3   : > { %v2806_v40 = vpop.f32.mrf.mxu3 }
 0x3d4   : > { %v2807_v21 = vadd.f32 %v2806_v40, %v5607_v38 }
 0x3d5   : > { %v2953_v10 = vpop.f32.mrf.mxu2 }
 0x3d6   : > { %v3004_v42 = vpack.c.bf16 %v2807_v21, %v5605_v4  ;;  %v2954_v29 = vadd.f32 %v2953_v10, %v2905_v25  ;;  %v2858_v8 = vpop.f32.mrf.mxu0  ;;  %v2907_v54 = vpop.f32.mrf.mxu1 }
 0x3d7   : > { %v2859_v37 = vadd.f32 %v5712_v55, %v2858_v8 }
 0x3d8   : > { %3084 = vst [vmem:[%s5058_s23 + $0x84] sm:$0xff] %v3004_v42  ;;  %v3005_v11 = vpack.c.bf16 %v2954_v29, %v2954_v29 }
 0x3d9   : > { %v2908_v60 = vadd.f32 %v2907_v54, %v2859_v37 }
 0x3da   : > { %3085 = vst [vmem:[%s5058_s23 + $0x8c] sm:$0xf] %v3005_v11 }
 0x3db   : > { %v2809_v35 = vpop.f32.mrf.mxu3 }
 0x3dc   : > { %v2810_v49 = vadd.f32 %v2809_v35, %v5618_v41 }
 0x3dd   : > { %v2956_v2 = vpop.f32.mrf.mxu2 }
 0x3de   : > { %v3009_v38 = vpack.c.bf16 %v2810_v49, %v5616_v19  ;;  %v2957_v51 = vadd.f32 %v2956_v2, %v2908_v60  ;;  %v2860_v4 = vpop.f32.mrf.mxu0  ;;  %v2909_v27 = vpop.f32.mrf.mxu1 }
 0x3df   : > { %v2861_v20 = vadd.f32 %v5712_v55, %v2860_v4 }
 0x3e0   : > { %3089 = vst [vmem:[%s5058_s23 + $0xa8] sm:$0xff] %v3009_v38  ;;  %v3010_v48 = vpack.c.bf16 %v2957_v51, %v2957_v51 }
 0x3e1   : > { %v2910_v61 = vadd.f32 %v2909_v27, %v2861_v20 }
 0x3e2   : > { %3090 = vst [vmem:[%s5058_s23 + $0xb0] sm:$0xf] %v3010_v48 }
 0x3e3   : > { %v2811_v26 = vpop.f32.mrf.mxu3 }
 0x3e4   : > { %v2812_v33 = vadd.f32 %v2811_v26, %v5625_v52 }
 0x3e5   : > { %v2958_v50 = vpop.f32.mrf.mxu2 }
 0x3e6   : > { %v3014_v41 = vpack.c.bf16 %v2812_v33, %v5623_v46  ;;  %v2959_v62 = vadd.f32 %v2958_v50, %v2910_v61  ;;  %v2863_v19 = vpop.f32.mrf.mxu0  ;;  %v2912_v30 = vpop.f32.mrf.mxu1 }
 0x3e7   : > { %v2864_v7 = vadd.f32 %v5712_v55, %v2863_v19 }
 0x3e8   : > { %3094 = vst [vmem:[%s5058_s23 + $0xcc] sm:$0xff] %v3014_v41  ;;  %v3015_v58 = vpack.c.bf16 %v2959_v62, %v2959_v62 }
 0x3e9   : > { %v2913_v18 = vadd.f32 %v2912_v30, %v2864_v7 }
 0x3ea   : > { %3095 = vst [vmem:[%s5058_s23 + $0xd4] sm:$0xf] %v3015_v58 }
 0x3eb   : > { %v2814_v13 = vpop.f32.mrf.mxu3 }
 0x3ec   : > { %v2815_v63 = vadd.f32 %v2814_v13, %v5636_v44 }
 0x3ed   : > { %v2961_v14 = vpop.f32.mrf.mxu2 }
 0x3ee   : > { %v3019_v52 = vpack.c.bf16 %v2815_v63, %v5634_v47  ;;  %v2962_v57 = vadd.f32 %v2961_v14, %v2913_v18  ;;  %v2865_v46 = vpop.f32.mrf.mxu0  ;;  %v2914_v1 = vpop.f32.mrf.mxu1 }
 0x3ef   : > { %v2866_v43 = vadd.f32 %v5712_v55, %v2865_v46 }
 0x3f0   : > { %3099 = vst [vmem:[%s5058_s23 + $0xf0] sm:$0xff] %v3019_v52  ;;  %v3020_v12 = vpack.c.bf16 %v2962_v57, %v2962_v57 }
 0x3f1   : > { %v2915_v17 = vadd.f32 %v2914_v1, %v2866_v43 }
 0x3f2   : > { %3100 = vst [vmem:[%s5058_s23 + $0xf8] sm:$0xf] %v3020_v12 }
 0x3f3   : > { %v2816_v34 = vpop.f32.mrf.mxu3 }
 0x3f4   : > { %v2817_v6 = vadd.f32 %v2816_v34, %v5643_v24 }
 0x3f5   : > { %v2963_v40 = vpop.f32.mrf.mxu2 }
 0x3f6   : > { %v3024_v44 = vpack.c.bf16 %v2817_v6, %v5641_v56  ;;  %v2964_v25 = vadd.f32 %v2963_v40, %v2915_v17  ;;  %v2868_v47 = vpop.f32.mrf.mxu0  ;;  %v2917_v21 = vpop.f32.mrf.mxu1 }
 0x3f7   : > { %v2869_v10 = vadd.f32 %v5712_v55, %v2868_v47 }
 0x3f8   : > { %3104 = vst [vmem:[%s5058_s23 + $0x114] sm:$0xff] %v3024_v44  ;;  %v3025_v42 = vpack.c.bf16 %v2964_v25, %v2964_v25 }
 0x3f9   : > { %v2918_v29 = vadd.f32 %v2917_v21, %v2869_v10 }
 0x3fa   : > { %3105 = vst [vmem:[%s5058_s23 + $0x11c] sm:$0xf] %v3025_v42 }
 0x3fb   : > { %v2819_v8 = vpop.f32.mrf.mxu3 }
 0x3fc   : > { %v2820_v54 = vadd.f32 %v2819_v8, %v5654_v59 }
 0x3fd   : > { %v2966_v37 = vpop.f32.mrf.mxu2 }
 0x3fe   : > { %v3029_v24 = vpack.c.bf16 %v2820_v54, %v5652_v32  ;;  %v2967_v11 = vadd.f32 %v2966_v37, %v2918_v29  ;;  %v2870_v56 = vpop.f32.mrf.mxu0  ;;  %v2919_v60 = vpop.f32.mrf.mxu1 }
 0x3ff   : > { %v2871_v49 = vadd.f32 %v5712_v55, %v2870_v56 }
 0x400   : > { %3109 = vst [vmem:[%s5058_s23 + $0x138] sm:$0xff] %v3029_v24  ;;  %v3030_v35 = vpack.c.bf16 %v2967_v11, %v2967_v11 }
 0x401   : > { %v2920_v38 = vadd.f32 %v2919_v60, %v2871_v49 }
 0x402   : > { %3110 = vst [vmem:[%s5058_s23 + $0x140] sm:$0xf] %v3030_v35 }
 0x403   : > { %v2821_v2 = vpop.f32.mrf.mxu3 }
 0x404   : > { %v2822_v51 = vadd.f32 %v2821_v2, %v5661_v28 }
 0x405   : > { %v2968_v4 = vpop.f32.mrf.mxu2 }
 0x406   : > { %v3034_v59 = vpack.c.bf16 %v2822_v51, %v5659_v9  ;;  %v2969_v27 = vadd.f32 %v2968_v4, %v2920_v38  ;;  %v2873_v32 = vpop.f32.mrf.mxu0  ;;  %v2922_v48 = vpop.f32.mrf.mxu1 }
 0x407   : > { %v2874_v20 = vadd.f32 %v5712_v55, %v2873_v32 }
 0x408   : > { %3114 = vst [vmem:[%s5058_s23 + $0x15c] sm:$0xff] %v3034_v59  ;;  %v3035_v26 = vpack.c.bf16 %v2969_v27, %v2969_v27 }
 0x409   : > { %v2923_v61 = vadd.f32 %v2922_v48, %v2874_v20 }
 0x40a   : > { %3115 = vst [vmem:[%s5058_s23 + $0x164] sm:$0xf] %v3035_v26 }
 0x40b   : > { %v2824_v33 = vpop.f32.mrf.mxu3 }
 0x40c   : > { %v2825_v50 = vadd.f32 %v2824_v33, %v5672_v15 }
 0x40d   : > { %v2971_v41 = vpop.f32.mrf.mxu2 }
 0x40e   : > { %v3039_v28 = vpack.c.bf16 %v2825_v50, %v5670_v36  ;;  %v2972_v62 = vadd.f32 %v2971_v41, %v2923_v61  ;;  %v2875_v9 = vpop.f32.mrf.mxu0  ;;  %v2924_v19 = vpop.f32.mrf.mxu1 }
 0x40f   : > { %v2876_v7 = vadd.f32 %v5712_v55, %v2875_v9 }
 0x410   : > { %3119 = vst [vmem:[%s5058_s23 + $0x180] sm:$0xff] %v3039_v28  ;;  %v3040_v30 = vpack.c.bf16 %v2972_v62, %v2972_v62 }
 0x411   : > { %v2925_v18 = vadd.f32 %v2924_v19, %v2876_v7 }
 0x412   : > { %3120 = vst [vmem:[%s5058_s23 + $0x188] sm:$0xf] %v3040_v30 }
 0x413   : > { %v2826_v58 = vpop.f32.mrf.mxu3 }
 0x414   : > { %v2827_v13 = vadd.f32 %v2826_v58, %v5679_v23 }
 0x415   : > { %v2973_v63 = vpop.f32.mrf.mxu2 }
 0x416   : > { %v3044_v15 = vpack.c.bf16 %v2827_v13, %v5677_v31  ;;  %v2974_v14 = vadd.f32 %v2973_v63, %v2925_v18  ;;  %v2878_v36 = vpop.f32.mrf.mxu0  ;;  %v2927_v52 = vpop.f32.mrf.mxu1 }
 0x417   : > { %v2879_v57 = vadd.f32 %v5712_v55, %v2878_v36 }
 0x418   : > { %3124 = vst [vmem:[%s5058_s23 + $0x1a4] sm:$0xff] %v3044_v15  ;;  %v3045_v46 = vpack.c.bf16 %v2974_v14, %v2974_v14 }
 0x419   : > { %v2928_v1 = vadd.f32 %v2927_v52, %v2879_v57 }
 0x41a   : > { %3125 = vst [vmem:[%s5058_s23 + $0x1ac] sm:$0xf] %v3045_v46 }
 0x41b   : > { %v2829_v12 = vpop.f32.mrf.mxu3 }
 0x41c   : > { %v2830_v43 = vadd.f32 %v2829_v12, %v5690_v0 }
 0x41d   : > { %v2976_v34 = vpop.f32.mrf.mxu2 }
 0x41e   : > { %v3049_v23 = vpack.c.bf16 %v2830_v43, %v5688_v39  ;;  %v2977_v17 = vadd.f32 %v2976_v34, %v2928_v1  ;;  %v2880_v31 = vpop.f32.mrf.mxu0  ;;  %v2929_v6 = vpop.f32.mrf.mxu1 }
 0x41f   : > { %v2881_v44 = vadd.f32 %v5712_v55, %v2880_v31 }
 0x420   : > { %3129 = vst [vmem:[%s5058_s23 + $0x1c8] sm:$0xff] %v3049_v23  ;;  %v3050_v40 = vpack.c.bf16 %v2977_v17, %v2977_v17 }
 0x421   : > { %v2930_v47 = vadd.f32 %v2929_v6, %v2881_v44 }
 0x422   : > { %3130 = vst [vmem:[%s5058_s23 + $0x1d0] sm:$0xf] %v3050_v40 }
 0x423   : > { %v2831_v25 = vpop.f32.mrf.mxu3 }
 0x424   : > { %v2832_v21 = vadd.f32 %v2831_v25, %v5697_v53 }
 0x425   : > { %v2978_v10 = vpop.f32.mrf.mxu2 }
 0x426   : > { %v3054_v0 = vpack.c.bf16 %v2832_v21, %v5695_v3  ;;  %v2979_v39 = vadd.f32 %v2978_v10, %v2930_v47  ;;  %v2883_v42 = vpop.f32.mrf.mxu0  ;;  %v2932_v54 = vpop.f32.mrf.mxu1 }
 0x427   : > { %v2884_v29 = vadd.f32 %v5712_v55, %v2883_v42 }
 0x428   : > { %3134 = vst [vmem:[%s5058_s23 + $0x1ec] sm:$0xff] %v3054_v0  ;;  %v3055_v8 = vpack.c.bf16 %v2979_v39, %v2979_v39 }
 0x429   : > { %v2933_v37 = vadd.f32 %v2932_v54, %v2884_v29 }
 0x42a   : > { %3135 = vst [vmem:[%s5058_s23 + $0x1f4] sm:$0xf] %v3055_v8 }
 0x42b   : > { %v2834_v24 = vpop.f32.mrf.mxu3 }
 0x42c   : > { %v2835_v11 = vadd.f32 %v2834_v24, %v5708_v22 }
 0x42d   : > { %v2981_v56 = vpop.f32.mrf.mxu2 }
 0x42e   : > { %v3059_v53 = vpack.c.bf16 %v2835_v11, %v5706_v45  ;;  %v2982_v3 = vadd.f32 %v2981_v56, %v2933_v37  ;;  %v2885_v60 = vpop.f32.mrf.mxu0  ;;  %v2934_v2 = vpop.f32.mrf.mxu1 }
 0x42f   : > { %v2886_v49 = vadd.f32 %v5712_v55, %v2885_v60 }
 0x430   : > { %3139 = vst [vmem:[%s5058_s23 + $0x210] sm:$0xff] %v3059_v53  ;;  %v3060_v35 = vpack.c.bf16 %v2982_v3, %v2982_v3 }
 0x431   : > { %v2935_v38 = vadd.f32 %v2934_v2, %v2886_v49 }
 0x432   : > { %3140 = vst [vmem:[%s5058_s23 + $0x218] sm:$0xf] %v3060_v35 }
 0x433   : > { %v2836_v22 = vpop.f32.mrf.mxu3 }
 0x434   : > { %v2837_v51 = vadd.f32 %v2836_v22, %v5717_v16 }
 0x435   : > { %v2983_v45 = vpop.f32.mrf.mxu2 }
 0x436   : > { %v3064_v4 = vpack.c.bf16 %v2837_v51, %v5715_v5  ;;  %v2984_v59 = vadd.f32 %v2983_v45, %v2935_v38 }
 0x438   : > { %3144 = vst [vmem:[%s5058_s23 + $0x234] sm:$0xff] %v3064_v4  ;;  %v3065_v55 = vpack.c.bf16 %v2984_v59, %v2984_v59 }
 0x43a   : > { %3145 = vst [vmem:[%s5058_s23 + $0x23c] sm:$0xf] %v3065_v55 }
 0x43b   : > { %4573 = shalt.err (!%p4570_p10)
}
 0x43c   : > { %s4624_s24 = smov 576   ;;  %s4625_s26 = smov 36  }
 0x43d   : > { %4390 = dma.vmem_to_hbm [thread:$0]  (%p4712_p3), %s3161_s16, 9216, %s3163_s4, %s3147_s5, %s4624_s24, %s4624_s24, %s4625_s26  }
 0x43e PF: > { %s3177_s30 = sand.u32 1, %s4604_s12   ;;  %p5900_p12 = scmp.ge.s32.totalorder %s4616_s15, 2 }
 0x43f   : > { %s3178_s18 = scalar_lea.sflag [#allocation4], %s3177_s30 }
 0x440   : > { %p4404_p13 = pnand %p5900_p12, %p4681_p6 }
 0x442   : > { %p4405_p0 = pneg %p4404_p13 }
 0x444   : > { %4599 = dma.done.wait (%p4405_p0), %s3178_s18, 9216  }
 0x445   : > { %4601 = vsyncadd (%p4405_p0), %s3178_s18, 4294958080  ;;  %p17_p5 = scmp.ge.s32.totalorder %s4702_s6, 4   ;;  %s5901_s12 = smov %s4608_s13 }
 0x446   : > { %s5902_s13 = smov %s4612_s14  ;;  %s5903_s14 = smov %s4718_s10 }
 0x447   : > { %s5904_s15 = smov %s4702_s6  ;;  %19 = sbr.rel (!%p17_p5) target bundleno = 6 (0x6), region = 85 }
 0x44c   :  { %3184 = vsyncpa [#allocation3], 1 }
 0x44d   :  { %3186 = vsyncpa [#allocation3 + $0x1], 1 }
 0x44e   :  { %3187 = vsyncpa [#allocation6], 1 }
 0x44f   :  { %3188 = vsyncpa [#allocation4], 1 }
 0x450   :  { %3190 = vsyncpa [#allocation4 + $0x1], 1 }

</bundles_post_ra>
